<compile_context>
chip_gen: v7x
topology: tpu7x:2x2x1
jax: 0.10.0
libtpu: 0.0.40
codegen_flags: <defaults>
</compile_context>

<pallas_src>
import functools

import jax
import jax.numpy as jnp
from jax import lax
from jax.experimental import pallas as pl
from jax.experimental.pallas import tpu as pltpu


_VMEM_LIMIT = 48 * 1024 * 1024   # safe on v7x (64 MiB physical), roomy on v5e/v6e
_APPROX_RECIP = True             # softmax denom via EUP vrcp (~1e-3 rel err)


# ----------------------------------------------------------------------------
# helpers: padding / tiling
# ----------------------------------------------------------------------------
def _rup(n, m=128):
    return ((n + m - 1) // m) * m


def _pad2(x, rows, cols):
    return jnp.pad(x, ((0, rows - x.shape[0]), (0, cols - x.shape[1])))


def _pick_tile(dim):
    # dims are pre-padded to multiples of 128; prefer the largest tile <= 512
    # that divides the dim (per-grid-step overhead ~0.35us; 512 tiles ~85% of
    # HBM roofline vs ~29% at 128).
    for t in (512, 256, 128):
        if dim % t == 0:
            return t
    return 128


# ----------------------------------------------------------------------------
# Kernel 1: generic tiled matmul  out = act(A @ B [+ bias])
#   bf16 MXU inputs, f32 VMEM accumulator, optional bias/ReLU fused into the
#   finalize step.
# ----------------------------------------------------------------------------
def _matmul_kernel(*refs, apply_relu, has_bias):
    if has_bias:
        a_ref, b_ref, bias_ref, o_ref, acc_ref = refs
    else:
        a_ref, b_ref, o_ref, acc_ref = refs
        bias_ref = None

    k = pl.program_id(2)

    @pl.when(k == 0)
    def _init():
        acc_ref[...] = jnp.zeros_like(acc_ref)

    acc_ref[...] += jnp.dot(a_ref[...], b_ref[...],
                            preferred_element_type=jnp.float32)

    @pl.when(k == pl.num_programs(2) - 1)
    def _finalize():
        y = acc_ref[...]
        if has_bias:
            y = y + bias_ref[...]
        if apply_relu:
            y = jnp.maximum(y, 0.0)
        o_ref[...] = y.astype(o_ref.dtype)


def matmul_bias_act(a, b, bias=None, *, apply_relu=False,
                    out_dtype=jnp.bfloat16):
    M, K = a.shape
    K2, N = b.shape
    assert K == K2
    tm, tn, tk = _pick_tile(M), _pick_tile(N), _pick_tile(K)
    has_bias = bias is not None

    a = a.astype(jnp.bfloat16)
    b = b.astype(jnp.bfloat16)

    in_specs = [
        pl.BlockSpec((tm, tk), lambda i, j, k: (i, k)),
        pl.BlockSpec((tk, tn), lambda i, j, k: (k, j)),
    ]
    args = [a, b]
    if has_bias:
        in_specs.append(pl.BlockSpec((1, tn), lambda i, j, k: (0, j)))
        args.append(bias.astype(jnp.float32))

    kernel = functools.partial(_matmul_kernel, apply_relu=apply_relu,
                               has_bias=has_bias)
    return pl.pallas_call(
        kernel,
        out_shape=jax.ShapeDtypeStruct((M, N), out_dtype),
        grid_spec=pltpu.PrefetchScalarGridSpec(
            num_scalar_prefetch=0,
            grid=(M // tm, N // tn, K // tk),
            in_specs=in_specs,
            out_specs=pl.BlockSpec((tm, tn), lambda i, j, k: (i, j)),
            scratch_shapes=[pltpu.VMEM((tm, tn), jnp.float32)],
        ),
        compiler_params=pltpu.CompilerParams(
            dimension_semantics=("parallel", "parallel", "arbitrary"),
            vmem_limit_bytes=_VMEM_LIMIT),
    )(*args)


# ----------------------------------------------------------------------------
# Kernel 2: fused TransformerLayer, q-tiled flash-style.
#   grid = (num_q_tiles, num_heads): q tiles parallel (outer), heads reduce
#   into a (tq, Cp) f32 accumulator; residual + LN1 + FFN + LN2 epilogue runs
#   in the last-head step of each q tile.  Q/K/V are precomputed (head-major,
#   true head dim d) by the generic matmul kernel; 1/sqrt(d) is pre-folded
#   into Wq/bq; padded keys are masked with a precomputed additive row.
# ----------------------------------------------------------------------------
def _transformer_kernel(
    x_ref, q_ref, k_ref, v_ref, wo_ref, bo_ref, kmask_ref, cmask_ref,
    g1_ref, be1_ref, w1_ref, b1_ref, w2_ref, b2_ref, g2_ref, be2_ref,
    out_ref, acc_ref, *, c_true,
):
    h = pl.program_id(1)

    @pl.when(h == 0)
    def _init():
        acc_ref[...] = jnp.zeros_like(acc_ref)

    q = q_ref[0]                      # (tq, d) bf16, scale pre-folded
    k = k_ref[0]                      # (Nk, d) bf16
    v = v_ref[0]                      # (Nk, d) bf16

    # s = q @ k^T, contracting over the true head dim (no padded-zero FLOPs)
    s = lax.dot_general(q, k, (((1,), (1,)), ((), ())),
                        preferred_element_type=jnp.float32)       # (tq, Nk)
    s = s + kmask_ref[...]            # additive mask: 0 valid, -1e30 padded

    m = jnp.max(s, axis=-1, keepdims=True)
    p = jnp.exp(s - m)
    l = jnp.sum(p, axis=-1, keepdims=True)
    p = p * pl.reciprocal(l, approx=_APPROX_RECIP)                # EUP path

    o_h = jnp.dot(p.astype(jnp.bfloat16), v,
                  preferred_element_type=jnp.float32)             # (tq, d)
    # per-head slice of Wo (true d rows) accumulated into the output proj
    acc_ref[...] += jnp.dot(o_h.astype(jnp.bfloat16), wo_ref[0],
                            preferred_element_type=jnp.float32)   # (tq, Cp)

    @pl.when(h == pl.num_programs(1) - 1)
    def _finalize():
        cmask = cmask_ref[...]        # (1, Cp): 1 on true hid channels, 0 pad
        inv_c = 1.0 / float(c_true)

        # residual + output-projection bias
        y = x_ref[...].astype(jnp.float32) + acc_ref[...] + bo_ref[...]

        # LayerNorm 1 (stats over the true hid channels only)
        mu = jnp.sum(y * cmask, axis=-1, keepdims=True) * inv_c
        cen = (y - mu) * cmask
        var = jnp.sum(cen * cen, axis=-1, keepdims=True) * inv_c
        y_ln = cen * lax.rsqrt(var + 1e-5) * g1_ref[...] + be1_ref[...]

        # FFN (hid -> hid -> hid) with ReLU
        h1 = jnp.dot(y_ln.astype(jnp.bfloat16), w1_ref[...],
                     preferred_element_type=jnp.float32) + b1_ref[...]
        h1 = jnp.maximum(h1, 0.0)
        f = jnp.dot(h1.astype(jnp.bfloat16), w2_ref[...],
                    preferred_element_type=jnp.float32) + b2_ref[...]

        # residual + LayerNorm 2
        z = y_ln + f
        mu2 = jnp.sum(z * cmask, axis=-1, keepdims=True) * inv_c
        cen2 = (z - mu2) * cmask
        var2 = jnp.sum(cen2 * cen2, axis=-1, keepdims=True) * inv_c
        z_ln = cen2 * lax.rsqrt(var2 + 1e-5) * g2_ref[...] + be2_ref[...]

        out_ref[...] = z_ln.astype(out_ref.dtype)


def transformer_layer(X, Q_hm, K_hm, V_hm, tp, key_mask, ch_mask, *, c_true):
    Np, Cp = X.shape
    H, _, d = Q_hm.shape
    tq = min(_pick_tile(Np), 256)     # keep the (tq, Np) score block modest

    kernel = functools.partial(_transformer_kernel, c_true=c_true)

    const = lambda shape: pl.BlockSpec(shape, lambda qi, h: (0, 0))
    in_specs = [
        pl.BlockSpec((tq, Cp), lambda qi, h: (qi, 0)),       # X q-tile
        pl.BlockSpec((1, tq, d), lambda qi, h: (h, qi, 0)),  # Q head, q-tile
        pl.BlockSpec((1, Np, d), lambda qi, h: (h, 0, 0)),   # K head (all keys)
        pl.BlockSpec((1, Np, d), lambda qi, h: (h, 0, 0)),   # V head
        pl.BlockSpec((1, d, Cp), lambda qi, h: (h, 0, 0)),   # Wo head rows
        const((1, Cp)),                                      # bo
        const((1, Np)),                                      # key mask (add)
        const((1, Cp)),                                      # channel mask
        const((1, Cp)), const((1, Cp)),                      # g1, be1
        const((Cp, Cp)), const((1, Cp)),                     # W1, b1
        const((Cp, Cp)), const((1, Cp)),                     # W2, b2
        const((1, Cp)), const((1, Cp)),                      # g2, be2
    ]
    return pl.pallas_call(
        kernel,
        out_shape=jax.ShapeDtypeStruct((Np, Cp), jnp.bfloat16),
        grid_spec=pltpu.PrefetchScalarGridSpec(
            num_scalar_prefetch=0,
            grid=(Np // tq, H),
            in_specs=in_specs,
            out_specs=pl.BlockSpec((tq, Cp), lambda qi, h: (qi, 0)),
            scratch_shapes=[pltpu.VMEM((tq, Cp), jnp.float32)],
        ),
        compiler_params=pltpu.CompilerParams(
            dimension_semantics=("parallel", "arbitrary"),
            vmem_limit_bytes=_VMEM_LIMIT),
    )(X.astype(jnp.bfloat16), Q_hm, K_hm, V_hm, tp["Wo"], tp["bo"],
      key_mask, ch_mask, tp["g1"], tp["be1"], tp["W1"], tp["b1"],
      tp["W2"], tp["b2"], tp["g2"], tp["be2"])


# ----------------------------------------------------------------------------
# Glue: factored hypergraph Laplacian, parameter init / packing, forward
# ----------------------------------------------------------------------------
def hgnn_factors(H):
    """L = A @ B with A = Dv^{-1/2} H De^{-1} (N,E), B = H^T Dv^{-1/2} (E,N)."""
    dv = H.sum(axis=1)
    de = H.sum(axis=0)
    inv_sqrt_dv = 1.0 / jnp.sqrt(jnp.maximum(dv, 1e-12))
    inv_de = 1.0 / jnp.maximum(de, 1e-12)
    A = inv_sqrt_dv[:, None] * H * inv_de[None, :]
    B = H.T * inv_sqrt_dv[None, :]
    return A, B


def init_params(key, in_ch, hid, num_classes):
    ks = jax.random.split(key, 16)
    n = lambda k, shape: (0.1 * jax.random.normal(k, shape)).astype(jnp.float32)
    return {
        # HGNNConv 1
        "W_c1": n(ks[0], (in_ch, hid)), "b_c1": n(ks[1], (1, hid)),
        # Transformer
        "Wq": n(ks[2], (hid, hid)), "bq": n(ks[3], (1, hid)),
        "Wk": n(ks[4], (hid, hid)), "bk": n(ks[5], (1, hid)),
        "Wv": n(ks[6], (hid, hid)), "bv": n(ks[7], (1, hid)),
        "Wo": n(ks[8], (hid, hid)), "bo": n(ks[9], (1, hid)),
        "g1": jnp.ones((1, hid), jnp.float32), "be1": jnp.zeros((1, hid), jnp.float32),
        "W1": n(ks[10], (hid, hid)), "b1": n(ks[11], (1, hid)),
        "W2": n(ks[12], (hid, hid)), "b2": n(ks[13], (1, hid)),
        "g2": jnp.ones((1, hid), jnp.float32), "be2": jnp.zeros((1, hid), jnp.float32),
        # HGNNConv 2 (is_last=True)
        "W_c2": n(ks[14], (hid, num_classes)), "b_c2": n(ks[15], (1, num_classes)),
    }


def _pack_transformer_params(params, *, num_heads, hid, Cp):
    assert hid % num_heads == 0, "hid_channels must be divisible by num_heads"
    d = hid // num_heads
    scale = 1.0 / float(d) ** 0.5

    pad_blk = lambda W: _pad2(W, Cp, Cp)
    pad_row = lambda v: _pad2(v, 1, Cp)

    # fused QKV projection; 1/sqrt(d) folded into the Q slice
    Wqkv = jnp.concatenate([pad_blk(params["Wq"] * scale),
                            pad_blk(params["Wk"]),
                            pad_blk(params["Wv"])], axis=1)
    bqkv = jnp.concatenate([pad_row(params["bq"] * scale),
                            pad_row(params["bk"]),
                            pad_row(params["bv"])], axis=1)

    # Wo head-major: rows h*d:(h+1)*d belong to head h -> (H, d, Cp)
    Wo_hm = params["Wo"].reshape(num_heads, d, hid)
    Wo_hm = jnp.pad(Wo_hm, ((0, 0), (0, 0), (0, Cp - hid)))

    frow = lambda v: pad_row(v).astype(jnp.float32)
    bmat = lambda m: pad_blk(m).astype(jnp.bfloat16)
    return {
        "Wqkv": Wqkv.astype(jnp.bfloat16), "bqkv": bqkv.astype(jnp.float32),
        "Wo": Wo_hm.astype(jnp.bfloat16), "bo": frow(params["bo"]),
        "g1": frow(params["g1"]), "be1": frow(params["be1"]),
        "W1": bmat(params["W1"]), "b1": frow(params["b1"]),
        "W2": bmat(params["W2"]), "b2": frow(params["b2"]),
        "g2": frow(params["g2"]), "be2": frow(params["be2"]),
    }


@functools.partial(jax.jit, static_argnames=("num_heads", "hid", "num_classes"))
def hgnn_transformer_forward(X, H, params, *, num_heads, hid, num_classes):
    N, Cin = X.shape
    E = H.shape[1]
    d = hid // num_heads
    Np, Ep, Cinp = _rup(N), _rup(E), _rup(Cin)
    Cp, Op = _rup(hid), _rup(num_classes)

    # factored Laplacian (bf16 on the MXU; degree normalization precision note)
    A, B = hgnn_factors(H)
    Ap = _pad2(A, Np, Ep)
    Bp = _pad2(B, Ep, Np)
    Xp = _pad2(X, Np, Cinp)

    # ---- layer 0: HGNNConv (relu; dropout = identity in eval) ----
    Wc1 = _pad2(params["W_c1"], Cinp, Cp)
    bc1 = _pad2(params["b_c1"], 1, Cp)
    xw = matmul_bias_act(Xp, Wc1, bc1)                    # X @ W + b   (bf16)
    m = matmul_bias_act(Bp, xw)                           # B @ (..)    (bf16)
    x1 = matmul_bias_act(Ap, m, apply_relu=True)          # relu(A @ ..) (bf16)

    # ---- layer 1: TransformerLayer ----
    tp = _pack_transformer_params(params, num_heads=num_heads, hid=hid, Cp=Cp)

    # fused QKV pre-pass (single read of x1), then head-major re-layout
    qkv = matmul_bias_act(x1, tp["Wqkv"], tp["bqkv"])     # (Np, 3*Cp) bf16

    def head_major(col0):
        blk = qkv[:, col0:col0 + hid]                     # (Np, hid)
        return blk.reshape(Np, num_heads, d).transpose(1, 0, 2)   # (H, Np, d)

    Q_hm, K_hm, V_hm = head_major(0), head_major(Cp), head_major(2 * Cp)

    key_mask = jnp.where(jnp.arange(Np) < N, 0.0, -1e30) \
                  .astype(jnp.float32)[None, :]           # additive key mask
    ch_mask = (jnp.arange(Cp) < hid).astype(jnp.float32)[None, :]

    x2 = transformer_layer(x1, Q_hm, K_hm, V_hm, tp, key_mask, ch_mask,
                           c_true=hid)                    # (Np, Cp) bf16

    # ---- layer 2: HGNNConv, is_last=True (no activation) ----
    Wc2 = _pad2(params["W_c2"], Cp, Op)
    bc2 = _pad2(params["b_c2"], 1, Op)
    xw2 = matmul_bias_act(x2, Wc2, bc2)
    m2 = matmul_bias_act(Bp, xw2)
    out = matmul_bias_act(Ap, m2, out_dtype=jnp.float32)  # final logits in f32

    return out[:N, :num_classes]


if __name__ == "__main__":
    key = jax.random.PRNGKey(0)
    k_x, k_h, k_p = jax.random.split(key, 3)

    N, E = 16, 8                          # nodes, hyperedges
    in_ch, hid, num_classes, num_heads = 16, 32, 8, 4

    X = jax.random.normal(k_x, (N, in_ch), jnp.float32)

    # synthetic hypergraph incidence matrix (N, E); every node / edge non-empty
    H = (jax.random.uniform(k_h, (N, E)) > 0.5).astype(jnp.float32)
    H = H.at[:, 0].set(1.0)
    H = H.at[0, :].set(1.0)

    params = init_params(k_p, in_ch, hid, num_classes)

    out = hgnn_transformer_forward(X, H, params, num_heads=num_heads,
                                   hid=hid, num_classes=num_classes)
    out = jax.block_until_ready(out)

    assert out.shape == (N, num_classes)
    assert bool(jnp.all(jnp.isfinite(out)))
    print("KERNEL_OK")
</pallas_src>

<mosaic_0001>
module attributes {stable_mosaic.version = 11 : i64} {
  func.func @_matmul_kernel(%arg0: i32, %arg1: i32, %arg2: i32, %arg3: memref<128x128xbf16, #tpu.memory_space<vmem>>, %arg4: memref<128x128xbf16, #tpu.memory_space<vmem>>, %arg5: memref<1x128xf32, #tpu.memory_space<vmem>>, %arg6: memref<128x128xbf16, #tpu.memory_space<vmem>>, %arg7: memref<128x128xf32, #tpu.memory_space<vmem>>) attributes {dimension_semantics = [#tpu.dimension_semantics<parallel>, #tpu.dimension_semantics<parallel>, #tpu.dimension_semantics<arbitrary>], iteration_bounds = array<i64: 1, 1, 1>, scalar_prefetch = 0 : i64, scratch_operands = 1 : i64, tpu.core_type = #tpu.core_type<tc>, window_params = [{transform_indices = @transform_0, window_bounds = array<i64: 128, 128>}, {transform_indices = @transform_1, window_bounds = array<i64: 128, 128>}, {transform_indices = @transform_2, window_bounds = array<i64: 1, 128>}, {transform_indices = @transform_3, window_bounds = array<i64: 128, 128>}]} {
    %c0_i32 = arith.constant 0 : i32
    %0 = arith.cmpi eq, %arg2, %c0_i32 : i32
    %1 = arith.extui %0 : i1 to i32
    %c0_i32_0 = arith.constant 0 : i32
    %2 = arith.cmpi ne, %1, %c0_i32_0 : i32
    scf.if %2 {
      %cst_10 = arith.constant 0.000000e+00 : f32
      %12 = vector.broadcast %cst_10 : f32 to vector<128x128xf32>
      %c0_11 = arith.constant 0 : index
      %c0_12 = arith.constant 0 : index
      %13 = vector.load %arg7[%c0_11, %c0_12] : memref<128x128xf32, #tpu.memory_space<vmem>>, vector<128x128xf32>
      tpu.vector_store %arg7[%c0_11, %c0_12], %12 {strides = array<i32>} : memref<128x128xf32, #tpu.memory_space<vmem>>, vector<128x128xf32>,
    } else {
    }
    %c0 = arith.constant 0 : index
    %c0_1 = arith.constant 0 : index
    %3 = vector.load %arg7[%c0, %c0_1] : memref<128x128xf32, #tpu.memory_space<vmem>>, vector<128x128xf32>
    %c0_2 = arith.constant 0 : index
    %c0_3 = arith.constant 0 : index
    %4 = vector.load %arg3[%c0_2, %c0_3] : memref<128x128xbf16, #tpu.memory_space<vmem>>, vector<128x128xbf16>
    %c0_4 = arith.constant 0 : index
    %c0_5 = arith.constant 0 : index
    %5 = vector.load %arg4[%c0_4, %c0_5] : memref<128x128xbf16, #tpu.memory_space<vmem>>, vector<128x128xbf16>
    %cst = arith.constant dense<0.000000e+00> : vector<128x128xf32>
    %6 = tpu.matmul %4, %5, %cst {dimension_numbers = #tpu.dot_dimension_numbers<[1], [0], [0], [1], [0, 0, 1, 1], [], []>} : vector<128x128xbf16>, vector<128x128xbf16>, vector<128x128xf32> -> vector<128x128xf32>
    %7 = arith.addf %3, %6 : vector<128x128xf32>
    %c0_6 = arith.constant 0 : index
    %c0_7 = arith.constant 0 : index
    %8 = vector.load %arg7[%c0_6, %c0_7] : memref<128x128xf32, #tpu.memory_space<vmem>>, vector<128x128xf32>
    tpu.vector_store %arg7[%c0_6, %c0_7], %7 {strides = array<i32>} : memref<128x128xf32, #tpu.memory_space<vmem>>, vector<128x128xf32>,
    %c0_i32_8 = arith.constant 0 : i32
    %9 = arith.cmpi eq, %arg2, %c0_i32_8 : i32
    %10 = arith.extui %9 : i1 to i32
    %c0_i32_9 = arith.constant 0 : i32
    %11 = arith.cmpi ne, %10, %c0_i32_9 : i32
    scf.if %11 {
      %c0_10 = arith.constant 0 : index
      %c0_11 = arith.constant 0 : index
      %12 = vector.load %arg7[%c0_10, %c0_11] : memref<128x128xf32, #tpu.memory_space<vmem>>, vector<128x128xf32>
      %c0_12 = arith.constant 0 : index
      %c0_13 = arith.constant 0 : index
      %13 = vector.load %arg5[%c0_12, %c0_13] : memref<1x128xf32, #tpu.memory_space<vmem>>, vector<1x128xf32>
      %14 = vector.broadcast %13 : vector<1x128xf32> to vector<128x128xf32>
      %15 = arith.addf %12, %14 : vector<128x128xf32>
      %16 = arith.truncf %15 : vector<128x128xf32> to vector<128x128xbf16>
      %c0_14 = arith.constant 0 : index
      %c0_15 = arith.constant 0 : index
      %17 = vector.load %arg6[%c0_14, %c0_15] : memref<128x128xbf16, #tpu.memory_space<vmem>>, vector<128x128xbf16>
      tpu.vector_store %arg6[%c0_14, %c0_15], %16 {strides = array<i32>} : memref<128x128xbf16, #tpu.memory_space<vmem>>, vector<128x128xbf16>,
    } else {
    }
    return
  }
  func.func @transform_0(%arg0: i32, %arg1: i32, %arg2: i32) -> (i32, i32) {
    %c0_i32 = arith.constant 0 : i32
    return %arg0, %arg2 : i32, i32
  }
  func.func @transform_1(%arg0: i32, %arg1: i32, %arg2: i32) -> (i32, i32) {
    %c0_i32 = arith.constant 0 : i32
    return %arg2, %arg1 : i32, i32
  }
  func.func @transform_2(%arg0: i32, %arg1: i32, %arg2: i32) -> (i32, i32) {
    %c0_i32 = arith.constant 0 : i32
    %c0_i32_0 = arith.constant 0 : i32
    return %c0_i32, %arg1 : i32, i32
  }
  func.func @transform_3(%arg0: i32, %arg1: i32, %arg2: i32) -> (i32, i32) {
    %c0_i32 = arith.constant 0 : i32
    return %arg0, %arg1 : i32, i32
  }
}

module attributes {stable_mosaic.version = 11 : i64} {
  func.func @_matmul_kernel(%arg0: i32, %arg1: i32, %arg2: i32, %arg3: memref<128x128xbf16, #tpu.memory_space<vmem>>, %arg4: memref<128x128xbf16, #tpu.memory_space<vmem>>, %arg5: memref<128x128xbf16, #tpu.memory_space<vmem>>, %arg6: memref<128x128xf32, #tpu.memory_space<vmem>>) attributes {dimension_semantics = [#tpu.dimension_semantics<parallel>, #tpu.dimension_semantics<parallel>, #tpu.dimension_semantics<arbitrary>], iteration_bounds = array<i64: 1, 1, 1>, scalar_prefetch = 0 : i64, scratch_operands = 1 : i64, tpu.core_type = #tpu.core_type<tc>, window_params = [{transform_indices = @transform_0, window_bounds = array<i64: 128, 128>}, {transform_indices = @transform_1, window_bounds = array<i64: 128, 128>}, {transform_indices = @transform_2, window_bounds = array<i64: 128, 128>}]} {
    %c0_i32 = arith.constant 0 : i32
    %0 = arith.cmpi eq, %arg2, %c0_i32 : i32
    %1 = arith.extui %0 : i1 to i32
    %c0_i32_0 = arith.constant 0 : i32
    %2 = arith.cmpi ne, %1, %c0_i32_0 : i32
    scf.if %2 {
      %cst_10 = arith.constant 0.000000e+00 : f32
      %12 = vector.broadcast %cst_10 : f32 to vector<128x128xf32>
      %c0_11 = arith.constant 0 : index
      %c0_12 = arith.constant 0 : index
      %13 = vector.load %arg6[%c0_11, %c0_12] : memref<128x128xf32, #tpu.memory_space<vmem>>, vector<128x128xf32>
      tpu.vector_store %arg6[%c0_11, %c0_12], %12 {strides = array<i32>} : memref<128x128xf32, #tpu.memory_space<vmem>>, vector<128x128xf32>,
    } else {
    }
    %c0 = arith.constant 0 : index
    %c0_1 = arith.constant 0 : index
    %3 = vector.load %arg6[%c0, %c0_1] : memref<128x128xf32, #tpu.memory_space<vmem>>, vector<128x128xf32>
    %c0_2 = arith.constant 0 : index
    %c0_3 = arith.constant 0 : index
    %4 = vector.load %arg3[%c0_2, %c0_3] : memref<128x128xbf16, #tpu.memory_space<vmem>>, vector<128x128xbf16>
    %c0_4 = arith.constant 0 : index
    %c0_5 = arith.constant 0 : index
    %5 = vector.load %arg4[%c0_4, %c0_5] : memref<128x128xbf16, #tpu.memory_space<vmem>>, vector<128x128xbf16>
    %cst = arith.constant dense<0.000000e+00> : vector<128x128xf32>
    %6 = tpu.matmul %4, %5, %cst {dimension_numbers = #tpu.dot_dimension_numbers<[1], [0], [0], [1], [0, 0, 1, 1], [], []>} : vector<128x128xbf16>, vector<128x128xbf16>, vector<128x128xf32> -> vector<128x128xf32>
    %7 = arith.addf %3, %6 : vector<128x128xf32>
    %c0_6 = arith.constant 0 : index
    %c0_7 = arith.constant 0 : index
    %8 = vector.load %arg6[%c0_6, %c0_7] : memref<128x128xf32, #tpu.memory_space<vmem>>, vector<128x128xf32>
    tpu.vector_store %arg6[%c0_6, %c0_7], %7 {strides = array<i32>} : memref<128x128xf32, #tpu.memory_space<vmem>>, vector<128x128xf32>,
    %c0_i32_8 = arith.constant 0 : i32
    %9 = arith.cmpi eq, %arg2, %c0_i32_8 : i32
    %10 = arith.extui %9 : i1 to i32
    %c0_i32_9 = arith.constant 0 : i32
    %11 = arith.cmpi ne, %10, %c0_i32_9 : i32
    scf.if %11 {
      %c0_10 = arith.constant 0 : index
      %c0_11 = arith.constant 0 : index
      %12 = vector.load %arg6[%c0_10, %c0_11] : memref<128x128xf32, #tpu.memory_space<vmem>>, vector<128x128xf32>
      %13 = arith.truncf %12 : vector<128x128xf32> to vector<128x128xbf16>
      %c0_12 = arith.constant 0 : index
      %c0_13 = arith.constant 0 : index
      %14 = vector.load %arg5[%c0_12, %c0_13] : memref<128x128xbf16, #tpu.memory_space<vmem>>, vector<128x128xbf16>
      tpu.vector_store %arg5[%c0_12, %c0_13], %13 {strides = array<i32>} : memref<128x128xbf16, #tpu.memory_space<vmem>>, vector<128x128xbf16>,
    } else {
    }
    return
  }
  func.func @transform_0(%arg0: i32, %arg1: i32, %arg2: i32) -> (i32, i32) {
    %c0_i32 = arith.constant 0 : i32
    return %arg0, %arg2 : i32, i32
  }
  func.func @transform_1(%arg0: i32, %arg1: i32, %arg2: i32) -> (i32, i32) {
    %c0_i32 = arith.constant 0 : i32
    return %arg2, %arg1 : i32, i32
  }
  func.func @transform_2(%arg0: i32, %arg1: i32, %arg2: i32) -> (i32, i32) {
    %c0_i32 = arith.constant 0 : i32
    return %arg0, %arg1 : i32, i32
  }
}

module attributes {stable_mosaic.version = 11 : i64} {
  func.func @_matmul_kernel(%arg0: i32, %arg1: i32, %arg2: i32, %arg3: memref<128x128xbf16, #tpu.memory_space<vmem>>, %arg4: memref<128x128xbf16, #tpu.memory_space<vmem>>, %arg5: memref<128x128xbf16, #tpu.memory_space<vmem>>, %arg6: memref<128x128xf32, #tpu.memory_space<vmem>>) attributes {dimension_semantics = [#tpu.dimension_semantics<parallel>, #tpu.dimension_semantics<parallel>, #tpu.dimension_semantics<arbitrary>], iteration_bounds = array<i64: 1, 1, 1>, scalar_prefetch = 0 : i64, scratch_operands = 1 : i64, tpu.core_type = #tpu.core_type<tc>, window_params = [{transform_indices = @transform_0, window_bounds = array<i64: 128, 128>}, {transform_indices = @transform_1, window_bounds = array<i64: 128, 128>}, {transform_indices = @transform_2, window_bounds = array<i64: 128, 128>}]} {
    %c0_i32 = arith.constant 0 : i32
    %0 = arith.cmpi eq, %arg2, %c0_i32 : i32
    %1 = arith.extui %0 : i1 to i32
    %c0_i32_0 = arith.constant 0 : i32
    %2 = arith.cmpi ne, %1, %c0_i32_0 : i32
    scf.if %2 {
      %cst_10 = arith.constant 0.000000e+00 : f32
      %12 = vector.broadcast %cst_10 : f32 to vector<128x128xf32>
      %c0_11 = arith.constant 0 : index
      %c0_12 = arith.constant 0 : index
      %13 = vector.load %arg6[%c0_11, %c0_12] : memref<128x128xf32, #tpu.memory_space<vmem>>, vector<128x128xf32>
      tpu.vector_store %arg6[%c0_11, %c0_12], %12 {strides = array<i32>} : memref<128x128xf32, #tpu.memory_space<vmem>>, vector<128x128xf32>,
    } else {
    }
    %c0 = arith.constant 0 : index
    %c0_1 = arith.constant 0 : index
    %3 = vector.load %arg6[%c0, %c0_1] : memref<128x128xf32, #tpu.memory_space<vmem>>, vector<128x128xf32>
    %c0_2 = arith.constant 0 : index
    %c0_3 = arith.constant 0 : index
    %4 = vector.load %arg3[%c0_2, %c0_3] : memref<128x128xbf16, #tpu.memory_space<vmem>>, vector<128x128xbf16>
    %c0_4 = arith.constant 0 : index
    %c0_5 = arith.constant 0 : index
    %5 = vector.load %arg4[%c0_4, %c0_5] : memref<128x128xbf16, #tpu.memory_space<vmem>>, vector<128x128xbf16>
    %cst = arith.constant dense<0.000000e+00> : vector<128x128xf32>
    %6 = tpu.matmul %4, %5, %cst {dimension_numbers = #tpu.dot_dimension_numbers<[1], [0], [0], [1], [0, 0, 1, 1], [], []>} : vector<128x128xbf16>, vector<128x128xbf16>, vector<128x128xf32> -> vector<128x128xf32>
    %7 = arith.addf %3, %6 : vector<128x128xf32>
    %c0_6 = arith.constant 0 : index
    %c0_7 = arith.constant 0 : index
    %8 = vector.load %arg6[%c0_6, %c0_7] : memref<128x128xf32, #tpu.memory_space<vmem>>, vector<128x128xf32>
    tpu.vector_store %arg6[%c0_6, %c0_7], %7 {strides = array<i32>} : memref<128x128xf32, #tpu.memory_space<vmem>>, vector<128x128xf32>,
    %c0_i32_8 = arith.constant 0 : i32
    %9 = arith.cmpi eq, %arg2, %c0_i32_8 : i32
    %10 = arith.extui %9 : i1 to i32
    %c0_i32_9 = arith.constant 0 : i32
    %11 = arith.cmpi ne, %10, %c0_i32_9 : i32
    scf.if %11 {
      %c0_10 = arith.constant 0 : index
      %c0_11 = arith.constant 0 : index
      %12 = vector.load %arg6[%c0_10, %c0_11] : memref<128x128xf32, #tpu.memory_space<vmem>>, vector<128x128xf32>
      %cst_12 = arith.constant 0.000000e+00 : f32
      %13 = vector.broadcast %cst_12 : f32 to vector<128x128xf32>
      %14 = arith.maximumf %12, %13 : vector<128x128xf32>
      %15 = arith.truncf %14 : vector<128x128xf32> to vector<128x128xbf16>
      %c0_13 = arith.constant 0 : index
      %c0_14 = arith.constant 0 : index
      %16 = vector.load %arg5[%c0_13, %c0_14] : memref<128x128xbf16, #tpu.memory_space<vmem>>, vector<128x128xbf16>
      tpu.vector_store %arg5[%c0_13, %c0_14], %15 {strides = array<i32>} : memref<128x128xbf16, #tpu.memory_space<vmem>>, vector<128x128xbf16>,
    } else {
    }
    return
  }
  func.func @transform_0(%arg0: i32, %arg1: i32, %arg2: i32) -> (i32, i32) {
    %c0_i32 = arith.constant 0 : i32
    return %arg0, %arg2 : i32, i32
  }
  func.func @transform_1(%arg0: i32, %arg1: i32, %arg2: i32) -> (i32, i32) {
    %c0_i32 = arith.constant 0 : i32
    return %arg2, %arg1 : i32, i32
  }
  func.func @transform_2(%arg0: i32, %arg1: i32, %arg2: i32) -> (i32, i32) {
    %c0_i32 = arith.constant 0 : i32
    return %arg0, %arg1 : i32, i32
  }
}

module attributes {stable_mosaic.version = 11 : i64} {
  func.func @_matmul_kernel(%arg0: i32, %arg1: i32, %arg2: i32, %arg3: memref<128x128xbf16, #tpu.memory_space<vmem>>, %arg4: memref<128x128xbf16, #tpu.memory_space<vmem>>, %arg5: memref<1x128xf32, #tpu.memory_space<vmem>>, %arg6: memref<128x128xbf16, #tpu.memory_space<vmem>>, %arg7: memref<128x128xf32, #tpu.memory_space<vmem>>) attributes {dimension_semantics = [#tpu.dimension_semantics<parallel>, #tpu.dimension_semantics<parallel>, #tpu.dimension_semantics<arbitrary>], iteration_bounds = array<i64: 1, 3, 1>, scalar_prefetch = 0 : i64, scratch_operands = 1 : i64, tpu.core_type = #tpu.core_type<tc>, window_params = [{transform_indices = @transform_0, window_bounds = array<i64: 128, 128>}, {transform_indices = @transform_1, window_bounds = array<i64: 128, 128>}, {transform_indices = @transform_2, window_bounds = array<i64: 1, 128>}, {transform_indices = @transform_3, window_bounds = array<i64: 128, 128>}]} {
    %c0_i32 = arith.constant 0 : i32
    %0 = arith.cmpi eq, %arg2, %c0_i32 : i32
    %1 = arith.extui %0 : i1 to i32
    %c0_i32_0 = arith.constant 0 : i32
    %2 = arith.cmpi ne, %1, %c0_i32_0 : i32
    scf.if %2 {
      %cst_10 = arith.constant 0.000000e+00 : f32
      %12 = vector.broadcast %cst_10 : f32 to vector<128x128xf32>
      %c0_11 = arith.constant 0 : index
      %c0_12 = arith.constant 0 : index
      %13 = vector.load %arg7[%c0_11, %c0_12] : memref<128x128xf32, #tpu.memory_space<vmem>>, vector<128x128xf32>
      tpu.vector_store %arg7[%c0_11, %c0_12], %12 {strides = array<i32>} : memref<128x128xf32, #tpu.memory_space<vmem>>, vector<128x128xf32>,
    } else {
    }
    %c0 = arith.constant 0 : index
    %c0_1 = arith.constant 0 : index
    %3 = vector.load %arg7[%c0, %c0_1] : memref<128x128xf32, #tpu.memory_space<vmem>>, vector<128x128xf32>
    %c0_2 = arith.constant 0 : index
    %c0_3 = arith.constant 0 : index
    %4 = vector.load %arg3[%c0_2, %c0_3] : memref<128x128xbf16, #tpu.memory_space<vmem>>, vector<128x128xbf16>
    %c0_4 = arith.constant 0 : index
    %c0_5 = arith.constant 0 : index
    %5 = vector.load %arg4[%c0_4, %c0_5] : memref<128x128xbf16, #tpu.memory_space<vmem>>, vector<128x128xbf16>
    %cst = arith.constant dense<0.000000e+00> : vector<128x128xf32>
    %6 = tpu.matmul %4, %5, %cst {dimension_numbers = #tpu.dot_dimension_numbers<[1], [0], [0], [1], [0, 0, 1, 1], [], []>} : vector<128x128xbf16>, vector<128x128xbf16>, vector<128x128xf32> -> vector<128x128xf32>
    %7 = arith.addf %3, %6 : vector<128x128xf32>
    %c0_6 = arith.constant 0 : index
    %c0_7 = arith.constant 0 : index
    %8 = vector.load %arg7[%c0_6, %c0_7] : memref<128x128xf32, #tpu.memory_space<vmem>>, vector<128x128xf32>
    tpu.vector_store %arg7[%c0_6, %c0_7], %7 {strides = array<i32>} : memref<128x128xf32, #tpu.memory_space<vmem>>, vector<128x128xf32>,
    %c0_i32_8 = arith.constant 0 : i32
    %9 = arith.cmpi eq, %arg2, %c0_i32_8 : i32
    %10 = arith.extui %9 : i1 to i32
    %c0_i32_9 = arith.constant 0 : i32
    %11 = arith.cmpi ne, %10, %c0_i32_9 : i32
    scf.if %11 {
      %c0_10 = arith.constant 0 : index
      %c0_11 = arith.constant 0 : index
      %12 = vector.load %arg7[%c0_10, %c0_11] : memref<128x128xf32, #tpu.memory_space<vmem>>, vector<128x128xf32>
      %c0_12 = arith.constant 0 : index
      %c0_13 = arith.constant 0 : index
      %13 = vector.load %arg5[%c0_12, %c0_13] : memref<1x128xf32, #tpu.memory_space<vmem>>, vector<1x128xf32>
      %14 = vector.broadcast %13 : vector<1x128xf32> to vector<128x128xf32>
      %15 = arith.addf %12, %14 : vector<128x128xf32>
      %16 = arith.truncf %15 : vector<128x128xf32> to vector<128x128xbf16>
      %c0_14 = arith.constant 0 : index
      %c0_15 = arith.constant 0 : index
      %17 = vector.load %arg6[%c0_14, %c0_15] : memref<128x128xbf16, #tpu.memory_space<vmem>>, vector<128x128xbf16>
      tpu.vector_store %arg6[%c0_14, %c0_15], %16 {strides = array<i32>} : memref<128x128xbf16, #tpu.memory_space<vmem>>, vector<128x128xbf16>,
    } else {
    }
    return
  }
  func.func @transform_0(%arg0: i32, %arg1: i32, %arg2: i32) -> (i32, i32) {
    %c0_i32 = arith.constant 0 : i32
    return %arg0, %arg2 : i32, i32
  }
  func.func @transform_1(%arg0: i32, %arg1: i32, %arg2: i32) -> (i32, i32) {
    %c0_i32 = arith.constant 0 : i32
    return %arg2, %arg1 : i32, i32
  }
  func.func @transform_2(%arg0: i32, %arg1: i32, %arg2: i32) -> (i32, i32) {
    %c0_i32 = arith.constant 0 : i32
    %c0_i32_0 = arith.constant 0 : i32
    return %c0_i32, %arg1 : i32, i32
  }
  func.func @transform_3(%arg0: i32, %arg1: i32, %arg2: i32) -> (i32, i32) {
    %c0_i32 = arith.constant 0 : i32
    return %arg0, %arg1 : i32, i32
  }
}

module attributes {stable_mosaic.version = 11 : i64} {
  func.func @_transformer_kernel(%arg0: i32, %arg1: i32, %arg2: memref<128x128xbf16, #tpu.memory_space<vmem>>, %arg3: memref<1x128x8xbf16, #tpu.memory_space<vmem>>, %arg4: memref<1x128x8xbf16, #tpu.memory_space<vmem>>, %arg5: memref<1x128x8xbf16, #tpu.memory_space<vmem>>, %arg6: memref<1x8x128xbf16, #tpu.memory_space<vmem>>, %arg7: memref<1x128xf32, #tpu.memory_space<vmem>>, %arg8: memref<1x128xf32, #tpu.memory_space<vmem>>, %arg9: memref<1x128xf32, #tpu.memory_space<vmem>>, %arg10: memref<1x128xf32, #tpu.memory_space<vmem>>, %arg11: memref<1x128xf32, #tpu.memory_space<vmem>>, %arg12: memref<128x128xbf16, #tpu.memory_space<vmem>>, %arg13: memref<1x128xf32, #tpu.memory_space<vmem>>, %arg14: memref<128x128xbf16, #tpu.memory_space<vmem>>, %arg15: memref<1x128xf32, #tpu.memory_space<vmem>>, %arg16: memref<1x128xf32, #tpu.memory_space<vmem>>, %arg17: memref<1x128xf32, #tpu.memory_space<vmem>>, %arg18: memref<128x128xbf16, #tpu.memory_space<vmem>>, %arg19: memref<128x128xf32, #tpu.memory_space<vmem>>) attributes {dimension_semantics = [#tpu.dimension_semantics<parallel>, #tpu.dimension_semantics<arbitrary>], iteration_bounds = array<i64: 1, 4>, scalar_prefetch = 0 : i64, scratch_operands = 1 : i64, tpu.core_type = #tpu.core_type<tc>, window_params = [{transform_indices = @transform_0, window_bounds = array<i64: 128, 128>}, {transform_indices = @transform_1, window_bounds = array<i64: 1, 128, 8>}, {transform_indices = @transform_2, window_bounds = array<i64: 1, 128, 8>}, {transform_indices = @transform_3, window_bounds = array<i64: 1, 128, 8>}, {transform_indices = @transform_4, window_bounds = array<i64: 1, 8, 128>}, {pipeline_mode = #tpu.pipeline_mode<synchronous>, transform_indices = @transform_5, window_bounds = array<i64: 1, 128>}, {pipeline_mode = #tpu.pipeline_mode<synchronous>, transform_indices = @transform_6, window_bounds = array<i64: 1, 128>}, {pipeline_mode = #tpu.pipeline_mode<synchronous>, transform_indices = @transform_7, window_bounds = array<i64: 1, 128>}, {pipeline_mode = #tpu.pipeline_mode<synchronous>, transform_indices = @transform_8, window_bounds = array<i64: 1, 128>}, {pipeline_mode = #tpu.pipeline_mode<synchronous>, transform_indices = @transform_9, window_bounds = array<i64: 1, 128>}, {pipeline_mode = #tpu.pipeline_mode<synchronous>, transform_indices = @transform_10, window_bounds = array<i64: 128, 128>}, {pipeline_mode = #tpu.pipeline_mode<synchronous>, transform_indices = @transform_11, window_bounds = array<i64: 1, 128>}, {pipeline_mode = #tpu.pipeline_mode<synchronous>, transform_indices = @transform_12, window_bounds = array<i64: 128, 128>}, {pipeline_mode = #tpu.pipeline_mode<synchronous>, transform_indices = @transform_13, window_bounds = array<i64: 1, 128>}, {pipeline_mode = #tpu.pipeline_mode<synchronous>, transform_indices = @transform_14, window_bounds = array<i64: 1, 128>}, {pipeline_mode = #tpu.pipeline_mode<synchronous>, transform_indices = @transform_15, window_bounds = array<i64: 1, 128>}, {transform_indices = @transform_16, window_bounds = array<i64: 128, 128>}]} {
    %c0_i32 = arith.constant 0 : i32
    %0 = arith.cmpi eq, %arg1, %c0_i32 : i32
    %1 = arith.extui %0 : i1 to i32
    %c0_i32_0 = arith.constant 0 : i32
    %2 = arith.cmpi ne, %1, %c0_i32_0 : i32
    scf.if %2 {
      %cst_23 = arith.constant 0.000000e+00 : f32
      %35 = vector.broadcast %cst_23 : f32 to vector<128x128xf32>
      %c0_24 = arith.constant 0 : index
      %c0_25 = arith.constant 0 : index
      %36 = vector.load %arg19[%c0_24, %c0_25] : memref<128x128xf32, #tpu.memory_space<vmem>>, vector<128x128xf32>
      tpu.vector_store %arg19[%c0_24, %c0_25], %35 {strides = array<i32>} : memref<128x128xf32, #tpu.memory_space<vmem>>, vector<128x128xf32>,
    } else {
    }
    %c0 = arith.constant 0 : index
    %c0_1 = arith.constant 0 : index
    %c0_2 = arith.constant 0 : index
    %3 = vector.load %arg3[%c0, %c0_1, %c0_2] : memref<1x128x8xbf16, #tpu.memory_space<vmem>>, vector<1x128x8xbf16>
    %4 = vector.shape_cast %3 : vector<1x128x8xbf16> to vector<128x8xbf16>
    %c0_3 = arith.constant 0 : index
    %c0_4 = arith.constant 0 : index
    %c0_5 = arith.constant 0 : index
    %5 = vector.load %arg4[%c0_3, %c0_4, %c0_5] : memref<1x128x8xbf16, #tpu.memory_space<vmem>>, vector<1x128x8xbf16>
    %6 = vector.shape_cast %5 : vector<1x128x8xbf16> to vector<128x8xbf16>
    %c0_6 = arith.constant 0 : index
    %c0_7 = arith.constant 0 : index
    %c0_8 = arith.constant 0 : index
    %7 = vector.load %arg5[%c0_6, %c0_7, %c0_8] : memref<1x128x8xbf16, #tpu.memory_space<vmem>>, vector<1x128x8xbf16>
    %8 = vector.shape_cast %7 : vector<1x128x8xbf16> to vector<128x8xbf16>
    %cst = arith.constant dense<0.000000e+00> : vector<128x128xf32>
    %9 = tpu.matmul %4, %6, %cst {dimension_numbers = #tpu.dot_dimension_numbers<[1], [1], [0], [0], [0, 0, 1, 0], [], []>} : vector<128x8xbf16>, vector<128x8xbf16>, vector<128x128xf32> -> vector<128x128xf32>
    %c0_9 = arith.constant 0 : index
    %c0_10 = arith.constant 0 : index
    %10 = vector.load %arg8[%c0_9, %c0_10] : memref<1x128xf32, #tpu.memory_space<vmem>>, vector<1x128xf32>
    %11 = vector.broadcast %10 : vector<1x128xf32> to vector<128x128xf32>
    %12 = arith.addf %9, %11 : vector<128x128xf32>
    %cst_11 = arith.constant dense<0xFF800000> : vector<128xf32>
    %13 = vector.multi_reduction <maximumf>, %12, %cst_11 [1] : vector<128x128xf32> to vector<128xf32>
    %14 = vector.shape_cast %13 : vector<128xf32> to vector<128x1xf32>
    %15 = vector.broadcast %14 : vector<128x1xf32> to vector<128x128xf32>
    %16 = arith.subf %12, %15 : vector<128x128xf32>
    %17 = math.exp %16 : vector<128x128xf32>
    %cst_12 = arith.constant dense<0.000000e+00> : vector<128xf32>
    %18 = vector.multi_reduction <add>, %17, %cst_12 [1] : vector<128x128xf32> to vector<128xf32>
    %19 = vector.shape_cast %18 : vector<128xf32> to vector<128x1xf32>
    %20 = tpu.reciprocal %19 {approx = true} : vector<128x1xf32> -> vector<128x1xf32>
    %21 = vector.broadcast %20 : vector<128x1xf32> to vector<128x128xf32>
    %22 = arith.mulf %17, %21 : vector<128x128xf32>
    %23 = arith.truncf %22 : vector<128x128xf32> to vector<128x128xbf16>
    %cst_13 = arith.constant dense<0.000000e+00> : vector<128x8xf32>
    %24 = tpu.matmul %23, %8, %cst_13 {dimension_numbers = #tpu.dot_dimension_numbers<[1], [0], [0], [1], [0, 0, 1, 1], [], []>} : vector<128x128xbf16>, vector<128x8xbf16>, vector<128x8xf32> -> vector<128x8xf32>
    %c0_14 = arith.constant 0 : index
    %c0_15 = arith.constant 0 : index
    %25 = vector.load %arg19[%c0_14, %c0_15] : memref<128x128xf32, #tpu.memory_space<vmem>>, vector<128x128xf32>
    %26 = arith.truncf %24 : vector<128x8xf32> to vector<128x8xbf16>
    %c0_16 = arith.constant 0 : index
    %c0_17 = arith.constant 0 : index
    %c0_18 = arith.constant 0 : index
    %27 = vector.load %arg6[%c0_16, %c0_17, %c0_18] : memref<1x8x128xbf16, #tpu.memory_space<vmem>>, vector<1x8x128xbf16>
    %28 = vector.shape_cast %27 : vector<1x8x128xbf16> to vector<8x128xbf16>
    %cst_19 = arith.constant dense<0.000000e+00> : vector<128x128xf32>
    %29 = tpu.matmul %26, %28, %cst_19 {dimension_numbers = #tpu.dot_dimension_numbers<[1], [0], [0], [1], [0, 0, 1, 1], [], []>} : vector<128x8xbf16>, vector<8x128xbf16>, vector<128x128xf32> -> vector<128x128xf32>
    %30 = arith.addf %25, %29 : vector<128x128xf32>
    %c0_20 = arith.constant 0 : index
    %c0_21 = arith.constant 0 : index
    %31 = vector.load %arg19[%c0_20, %c0_21] : memref<128x128xf32, #tpu.memory_space<vmem>>, vector<128x128xf32>
    tpu.vector_store %arg19[%c0_20, %c0_21], %30 {strides = array<i32>} : memref<128x128xf32, #tpu.memory_space<vmem>>, vector<128x128xf32>,
    %c3_i32 = arith.constant 3 : i32
    %32 = arith.cmpi eq, %arg1, %c3_i32 : i32
    %33 = arith.extui %32 : i1 to i32
    %c0_i32_22 = arith.constant 0 : i32
    %34 = arith.cmpi ne, %33, %c0_i32_22 : i32
    scf.if %34 {
      %c0_23 = arith.constant 0 : index
      %c0_24 = arith.constant 0 : index
      %35 = vector.load %arg9[%c0_23, %c0_24] : memref<1x128xf32, #tpu.memory_space<vmem>>, vector<1x128xf32>
      %c0_25 = arith.constant 0 : index
      %c0_26 = arith.constant 0 : index
      %36 = vector.load %arg2[%c0_25, %c0_26] : memref<128x128xbf16, #tpu.memory_space<vmem>>, vector<128x128xbf16>
      %37 = arith.extf %36 : vector<128x128xbf16> to vector<128x128xf32>
      %c0_27 = arith.constant 0 : index
      %c0_28 = arith.constant 0 : index
      %38 = vector.load %arg19[%c0_27, %c0_28] : memref<128x128xf32, #tpu.memory_space<vmem>>, vector<128x128xf32>
      %39 = arith.addf %37, %38 : vector<128x128xf32>
      %c0_29 = arith.constant 0 : index
      %c0_30 = arith.constant 0 : index
      %40 = vector.load %arg7[%c0_29, %c0_30] : memref<1x128xf32, #tpu.memory_space<vmem>>, vector<1x128xf32>
      %41 = vector.broadcast %40 : vector<1x128xf32> to vector<128x128xf32>
      %42 = arith.addf %39, %41 : vector<128x128xf32>
      %43 = vector.broadcast %35 : vector<1x128xf32> to vector<128x128xf32>
      %44 = arith.mulf %42, %43 : vector<128x128xf32>
      %cst_31 = arith.constant dense<0.000000e+00> : vector<128xf32>
      %45 = vector.multi_reduction <add>, %44, %cst_31 [1] : vector<128x128xf32> to vector<128xf32>
      %46 = vector.shape_cast %45 : vector<128xf32> to vector<128x1xf32>
      %cst_32 = arith.constant 3.125000e-02 : f32
      %47 = vector.broadcast %cst_32 : f32 to vector<128x1xf32>
      %48 = arith.mulf %46, %47 : vector<128x1xf32>
      %49 = vector.broadcast %48 : vector<128x1xf32> to vector<128x128xf32>
      %50 = arith.subf %42, %49 : vector<128x128xf32>
      %51 = vector.broadcast %35 : vector<1x128xf32> to vector<128x128xf32>
      %52 = arith.mulf %50, %51 : vector<128x128xf32>
      %53 = arith.mulf %52, %52 : vector<128x128xf32>
      %cst_33 = arith.constant dense<0.000000e+00> : vector<128xf32>
      %54 = vector.multi_reduction <add>, %53, %cst_33 [1] : vector<128x128xf32> to vector<128xf32>
      %55 = vector.shape_cast %54 : vector<128xf32> to vector<128x1xf32>
      %cst_34 = arith.constant 3.125000e-02 : f32
      %56 = vector.broadcast %cst_34 : f32 to vector<128x1xf32>
      %57 = arith.mulf %55, %56 : vector<128x1xf32>
      %cst_35 = arith.constant 9.99999974E-6 : f32
      %58 = vector.broadcast %cst_35 : f32 to vector<128x1xf32>
      %59 = arith.addf %57, %58 : vector<128x1xf32>
      %60 = math.rsqrt %59 : vector<128x1xf32>
      %61 = vector.broadcast %60 : vector<128x1xf32> to vector<128x128xf32>
      %62 = arith.mulf %52, %61 : vector<128x128xf32>
      %c0_36 = arith.constant 0 : index
      %c0_37 = arith.constant 0 : index
      %63 = vector.load %arg10[%c0_36, %c0_37] : memref<1x128xf32, #tpu.memory_space<vmem>>, vector<1x128xf32>
      %64 = vector.broadcast %63 : vector<1x128xf32> to vector<128x128xf32>
      %65 = arith.mulf %62, %64 : vector<128x128xf32>
      %c0_38 = arith.constant 0 : index
      %c0_39 = arith.constant 0 : index
      %66 = vector.load %arg11[%c0_38, %c0_39] : memref<1x128xf32, #tpu.memory_space<vmem>>, vector<1x128xf32>
      %67 = vector.broadcast %66 : vector<1x128xf32> to vector<128x128xf32>
      %68 = arith.addf %65, %67 : vector<128x128xf32>
      %69 = arith.truncf %68 : vector<128x128xf32> to vector<128x128xbf16>
      %c0_40 = arith.constant 0 : index
      %c0_41 = arith.constant 0 : index
      %70 = vector.load %arg12[%c0_40, %c0_41] : memref<128x128xbf16, #tpu.memory_space<vmem>>, vector<128x128xbf16>
      %cst_42 = arith.constant dense<0.000000e+00> : vector<128x128xf32>
      %71 = tpu.matmul %69, %70, %cst_42 {dimension_numbers = #tpu.dot_dimension_numbers<[1], [0], [0], [1], [0, 0, 1, 1], [], []>} : vector<128x128xbf16>, vector<128x128xbf16>, vector<128x128xf32> -> vector<128x128xf32>
      %c0_43 = arith.constant 0 : index
      %c0_44 = arith.constant 0 : index
      %72 = vector.load %arg13[%c0_43, %c0_44] : memref<1x128xf32, #tpu.memory_space<vmem>>, vector<1x128xf32>
      %73 = vector.broadcast %72 : vector<1x128xf32> to vector<128x128xf32>
      %74 = arith.addf %71, %73 : vector<128x128xf32>
      %cst_45 = arith.constant 0.000000e+00 : f32
      %75 = vector.broadcast %cst_45 : f32 to vector<128x128xf32>
      %76 = arith.maximumf %74, %75 : vector<128x128xf32>
      %77 = arith.truncf %76 : vector<128x128xf32> to vector<128x128xbf16>
      %c0_46 = arith.constant 0 : index
      %c0_47 = arith.constant 0 : index
      %78 = vector.load %arg14[%c0_46, %c0_47] : memref<128x128xbf16, #tpu.memory_space<vmem>>, vector<128x128xbf16>
      %cst_48 = arith.constant dense<0.000000e+00> : vector<128x128xf32>
      %79 = tpu.matmul %77, %78, %cst_48 {dimension_numbers = #tpu.dot_dimension_numbers<[1], [0], [0], [1], [0, 0, 1, 1], [], []>} : vector<128x128xbf16>, vector<128x128xbf16>, vector<128x128xf32> -> vector<128x128xf32>
      %c0_49 = arith.constant 0 : index
      %c0_50 = arith.constant 0 : index
      %80 = vector.load %arg15[%c0_49, %c0_50] : memref<1x128xf32, #tpu.memory_space<vmem>>, vector<1x128xf32>
      %81 = vector.broadcast %80 : vector<1x128xf32> to vector<128x128xf32>
      %82 = arith.addf %79, %81 : vector<128x128xf32>
      %83 = arith.addf %68, %82 : vector<128x128xf32>
      %84 = vector.broadcast %35 : vector<1x128xf32> to vector<128x128xf32>
      %85 = arith.mulf %83, %84 : vector<128x128xf32>
      %cst_51 = arith.constant dense<0.000000e+00> : vector<128xf32>
      %86 = vector.multi_reduction <add>, %85, %cst_51 [1] : vector<128x128xf32> to vector<128xf32>
      %87 = vector.shape_cast %86 : vector<128xf32> to vector<128x1xf32>
      %cst_52 = arith.constant 3.125000e-02 : f32
      %88 = vector.broadcast %cst_52 : f32 to vector<128x1xf32>
      %89 = arith.mulf %87, %88 : vector<128x1xf32>
      %90 = vector.broadcast %89 : vector<128x1xf32> to vector<128x128xf32>
      %91 = arith.subf %83, %90 : vector<128x128xf32>
      %92 = vector.broadcast %35 : vector<1x128xf32> to vector<128x128xf32>
      %93 = arith.mulf %91, %92 : vector<128x128xf32>
      %94 = arith.mulf %93, %93 : vector<128x128xf32>
      %cst_53 = arith.constant dense<0.000000e+00> : vector<128xf32>
      %95 = vector.multi_reduction <add>, %94, %cst_53 [1] : vector<128x128xf32> to vector<128xf32>
      %96 = vector.shape_cast %95 : vector<128xf32> to vector<128x1xf32>
      %cst_54 = arith.constant 3.125000e-02 : f32
      %97 = vector.broadcast %cst_54 : f32 to vector<128x1xf32>
      %98 = arith.mulf %96, %97 : vector<128x1xf32>
      %cst_55 = arith.constant 9.99999974E-6 : f32
      %99 = vector.broadcast %cst_55 : f32 to vector<128x1xf32>
      %100 = arith.addf %98, %99 : vector<128x1xf32>
      %101 = math.rsqrt %100 : vector<128x1xf32>
      %102 = vector.broadcast %101 : vector<128x1xf32> to vector<128x128xf32>
      %103 = arith.mulf %93, %102 : vector<128x128xf32>
      %c0_56 = arith.constant 0 : index
      %c0_57 = arith.constant 0 : index
      %104 = vector.load %arg16[%c0_56, %c0_57] : memref<1x128xf32, #tpu.memory_space<vmem>>, vector<1x128xf32>
      %105 = vector.broadcast %104 : vector<1x128xf32> to vector<128x128xf32>
      %106 = arith.mulf %103, %105 : vector<128x128xf32>
      %c0_58 = arith.constant 0 : index
      %c0_59 = arith.constant 0 : index
      %107 = vector.load %arg17[%c0_58, %c0_59] : memref<1x128xf32, #tpu.memory_space<vmem>>, vector<1x128xf32>
      %108 = vector.broadcast %107 : vector<1x128xf32> to vector<128x128xf32>
      %109 = arith.addf %106, %108 : vector<128x128xf32>
      %110 = arith.truncf %109 : vector<128x128xf32> to vector<128x128xbf16>
      %c0_60 = arith.constant 0 : index
      %c0_61 = arith.constant 0 : index
      %111 = vector.load %arg18[%c0_60, %c0_61] : memref<128x128xbf16, #tpu.memory_space<vmem>>, vector<128x128xbf16>
      tpu.vector_store %arg18[%c0_60, %c0_61], %110 {strides = array<i32>} : memref<128x128xbf16, #tpu.memory_space<vmem>>, vector<128x128xbf16>,
    } else {
    }
    return
  }
  func.func @transform_0(%arg0: i32, %arg1: i32) -> (i32, i32) {
    %c0_i32 = arith.constant 0 : i32
    %c0_i32_0 = arith.constant 0 : i32
    return %arg0, %c0_i32 : i32, i32
  }
  func.func @transform_1(%arg0: i32, %arg1: i32) -> (i32, i32, i32) {
    %c0_i32 = arith.constant 0 : i32
    %c0_i32_0 = arith.constant 0 : i32
    return %arg1, %arg0, %c0_i32 : i32, i32, i32
  }
  func.func @transform_2(%arg0: i32, %arg1: i32) -> (i32, i32, i32) {
    %c0_i32 = arith.constant 0 : i32
    %c0_i32_0 = arith.constant 0 : i32
    %c0_i32_1 = arith.constant 0 : i32
    return %arg1, %c0_i32, %c0_i32_0 : i32, i32, i32
  }
  func.func @transform_3(%arg0: i32, %arg1: i32) -> (i32, i32, i32) {
    %c0_i32 = arith.constant 0 : i32
    %c0_i32_0 = arith.constant 0 : i32
    %c0_i32_1 = arith.constant 0 : i32
    return %arg1, %c0_i32, %c0_i32_0 : i32, i32, i32
  }
  func.func @transform_4(%arg0: i32, %arg1: i32) -> (i32, i32, i32) {
    %c0_i32 = arith.constant 0 : i32
    %c0_i32_0 = arith.constant 0 : i32
    %c0_i32_1 = arith.constant 0 : i32
    return %arg1, %c0_i32, %c0_i32_0 : i32, i32, i32
  }
  func.func @transform_5(%arg0: i32, %arg1: i32) -> (i32, i32) {
    %c0_i32 = arith.constant 0 : i32
    %c0_i32_0 = arith.constant 0 : i32
    %c0_i32_1 = arith.constant 0 : i32
    return %c0_i32, %c0_i32_0 : i32, i32
  }
  func.func @transform_6(%arg0: i32, %arg1: i32) -> (i32, i32) {
    %c0_i32 = arith.constant 0 : i32
    %c0_i32_0 = arith.constant 0 : i32
    %c0_i32_1 = arith.constant 0 : i32
    return %c0_i32, %c0_i32_0 : i32, i32
  }
  func.func @transform_7(%arg0: i32, %arg1: i32) -> (i32, i32) {
    %c0_i32 = arith.constant 0 : i32
    %c0_i32_0 = arith.constant 0 : i32
    %c0_i32_1 = arith.constant 0 : i32
    return %c0_i32, %c0_i32_0 : i32, i32
  }
  func.func @transform_8(%arg0: i32, %arg1: i32) -> (i32, i32) {
    %c0_i32 = arith.constant 0 : i32
    %c0_i32_0 = arith.constant 0 : i32
    %c0_i32_1 = arith.constant 0 : i32
    return %c0_i32, %c0_i32_0 : i32, i32
  }
  func.func @transform_9(%arg0: i32, %arg1: i32) -> (i32, i32) {
    %c0_i32 = arith.constant 0 : i32
    %c0_i32_0 = arith.constant 0 : i32
    %c0_i32_1 = arith.constant 0 : i32
    return %c0_i32, %c0_i32_0 : i32, i32
  }
  func.func @transform_10(%arg0: i32, %arg1: i32) -> (i32, i32) {
    %c0_i32 = arith.constant 0 : i32
    %c0_i32_0 = arith.constant 0 : i32
    %c0_i32_1 = arith.constant 0 : i32
    return %c0_i32, %c0_i32_0 : i32, i32
  }
  func.func @transform_11(%arg0: i32, %arg1: i32) -> (i32, i32) {
    %c0_i32 = arith.constant 0 : i32
    %c0_i32_0 = arith.constant 0 : i32
    %c0_i32_1 = arith.constant 0 : i32
    return %c0_i32, %c0_i32_0 : i32, i32
  }
  func.func @transform_12(%arg0: i32, %arg1: i32) -> (i32, i32) {
    %c0_i32 = arith.constant 0 : i32
    %c0_i32_0 = arith.constant 0 : i32
    %c0_i32_1 = arith.constant 0 : i32
    return %c0_i32, %c0_i32_0 : i32, i32
  }
  func.func @transform_13(%arg0: i32, %arg1: i32) -> (i32, i32) {
    %c0_i32 = arith.constant 0 : i32
    %c0_i32_0 = arith.constant 0 : i32
    %c0_i32_1 = arith.constant 0 : i32
    return %c0_i32, %c0_i32_0 : i32, i32
  }
  func.func @transform_14(%arg0: i32, %arg1: i32) -> (i32, i32) {
    %c0_i32 = arith.constant 0 : i32
    %c0_i32_0 = arith.constant 0 : i32
    %c0_i32_1 = arith.constant 0 : i32
    return %c0_i32, %c0_i32_0 : i32, i32
  }
  func.func @transform_15(%arg0: i32, %arg1: i32) -> (i32, i32) {
    %c0_i32 = arith.constant 0 : i32
    %c0_i32_0 = arith.constant 0 : i32
    %c0_i32_1 = arith.constant 0 : i32
    return %c0_i32, %c0_i32_0 : i32, i32
  }
  func.func @transform_16(%arg0: i32, %arg1: i32) -> (i32, i32) {
    %c0_i32 = arith.constant 0 : i32
    %c0_i32_0 = arith.constant 0 : i32
    return %arg0, %c0_i32 : i32, i32
  }
}

module attributes {stable_mosaic.version = 11 : i64} {
  func.func @_matmul_kernel(%arg0: i32, %arg1: i32, %arg2: i32, %arg3: memref<128x128xbf16, #tpu.memory_space<vmem>>, %arg4: memref<128x128xbf16, #tpu.memory_space<vmem>>, %arg5: memref<128x128xf32, #tpu.memory_space<vmem>>, %arg6: memref<128x128xf32, #tpu.memory_space<vmem>>) attributes {dimension_semantics = [#tpu.dimension_semantics<parallel>, #tpu.dimension_semantics<parallel>, #tpu.dimension_semantics<arbitrary>], iteration_bounds = array<i64: 1, 1, 1>, scalar_prefetch = 0 : i64, scratch_operands = 1 : i64, tpu.core_type = #tpu.core_type<tc>, window_params = [{transform_indices = @transform_0, window_bounds = array<i64: 128, 128>}, {transform_indices = @transform_1, window_bounds = array<i64: 128, 128>}, {transform_indices = @transform_2, window_bounds = array<i64: 128, 128>}]} {
    %c0_i32 = arith.constant 0 : i32
    %0 = arith.cmpi eq, %arg2, %c0_i32 : i32
    %1 = arith.extui %0 : i1 to i32
    %c0_i32_0 = arith.constant 0 : i32
    %2 = arith.cmpi ne, %1, %c0_i32_0 : i32
    scf.if %2 {
      %cst_10 = arith.constant 0.000000e+00 : f32
      %12 = vector.broadcast %cst_10 : f32 to vector<128x128xf32>
      %c0_11 = arith.constant 0 : index
      %c0_12 = arith.constant 0 : index
      %13 = vector.load %arg6[%c0_11, %c0_12] : memref<128x128xf32, #tpu.memory_space<vmem>>, vector<128x128xf32>
      tpu.vector_store %arg6[%c0_11, %c0_12], %12 {strides = array<i32>} : memref<128x128xf32, #tpu.memory_space<vmem>>, vector<128x128xf32>,
    } else {
    }
    %c0 = arith.constant 0 : index
    %c0_1 = arith.constant 0 : index
    %3 = vector.load %arg6[%c0, %c0_1] : memref<128x128xf32, #tpu.memory_space<vmem>>, vector<128x128xf32>
    %c0_2 = arith.constant 0 : index
    %c0_3 = arith.constant 0 : index
    %4 = vector.load %arg3[%c0_2, %c0_3] : memref<128x128xbf16, #tpu.memory_space<vmem>>, vector<128x128xbf16>
    %c0_4 = arith.constant 0 : index
    %c0_5 = arith.constant 0 : index
    %5 = vector.load %arg4[%c0_4, %c0_5] : memref<128x128xbf16, #tpu.memory_space<vmem>>, vector<128x128xbf16>
    %cst = arith.constant dense<0.000000e+00> : vector<128x128xf32>
    %6 = tpu.matmul %4, %5, %cst {dimension_numbers = #tpu.dot_dimension_numbers<[1], [0], [0], [1], [0, 0, 1, 1], [], []>} : vector<128x128xbf16>, vector<128x128xbf16>, vector<128x128xf32> -> vector<128x128xf32>
    %7 = arith.addf %3, %6 : vector<128x128xf32>
    %c0_6 = arith.constant 0 : index
    %c0_7 = arith.constant 0 : index
    %8 = vector.load %arg6[%c0_6, %c0_7] : memref<128x128xf32, #tpu.memory_space<vmem>>, vector<128x128xf32>
    tpu.vector_store %arg6[%c0_6, %c0_7], %7 {strides = array<i32>} : memref<128x128xf32, #tpu.memory_space<vmem>>, vector<128x128xf32>,
    %c0_i32_8 = arith.constant 0 : i32
    %9 = arith.cmpi eq, %arg2, %c0_i32_8 : i32
    %10 = arith.extui %9 : i1 to i32
    %c0_i32_9 = arith.constant 0 : i32
    %11 = arith.cmpi ne, %10, %c0_i32_9 : i32
    scf.if %11 {
      %c0_10 = arith.constant 0 : index
      %c0_11 = arith.constant 0 : index
      %12 = vector.load %arg6[%c0_10, %c0_11] : memref<128x128xf32, #tpu.memory_space<vmem>>, vector<128x128xf32>
      %c0_12 = arith.constant 0 : index
      %c0_13 = arith.constant 0 : index
      %13 = vector.load %arg5[%c0_12, %c0_13] : memref<128x128xf32, #tpu.memory_space<vmem>>, vector<128x128xf32>
      tpu.vector_store %arg5[%c0_12, %c0_13], %12 {strides = array<i32>} : memref<128x128xf32, #tpu.memory_space<vmem>>, vector<128x128xf32>,
    } else {
    }
    return
  }
  func.func @transform_0(%arg0: i32, %arg1: i32, %arg2: i32) -> (i32, i32) {
    %c0_i32 = arith.constant 0 : i32
    return %arg0, %arg2 : i32, i32
  }
  func.func @transform_1(%arg0: i32, %arg1: i32, %arg2: i32) -> (i32, i32) {
    %c0_i32 = arith.constant 0 : i32
    return %arg2, %arg1 : i32, i32
  }
  func.func @transform_2(%arg0: i32, %arg1: i32, %arg2: i32) -> (i32, i32) {
    %c0_i32 = arith.constant 0 : i32
    return %arg0, %arg1 : i32, i32
  }
}

</mosaic_0001>

<bundles_post_ra>
// kernel: hgnn_transformer_forward.8
= control target key start
LH: loop header
LB: loop body
LE: loop exit
PB: predicated region body
PF: predicated region fallthrough
CT: control target
= control target key end

     0   :  { %s705_s1 = inlined_call_operand.vmem [shape: bf16[128,128], index: 1, kind: input, shape index: {}]   ;;  %s706_s0 = inlined_call_operand.vmem [shape: bf16[128,128], index: 0, kind: input, shape index: {}]   ;;  %s707_s2 = inlined_call_operand.vmem [shape: f32[1,128], index: 2, kind: input, shape index: {}]   ;;  %s708_s3 = inlined_call_operand.vmem [shape: bf16[128,128], index: 3, kind: output, shape index: {}]  }
   0x1   :  { %v594_v0 = vld [vmem:[%s705_s1] sm:$0xff]   ;;  %v595_v1 = vld [vmem:[%s705_s1 + $0x8] sm:$0xff]   ;;  %v596_v2 = vld [vmem:[%s705_s1 + $0x10] sm:$0xff]  }
   0x2   :  { %546 = vmatprep.subr.bf16.mxu0 %v594_v0  ;;  %578 = vmatprep.subr.bf16.mxu1 %v594_v0  ;;  %v597_v3 = vld [vmem:[%s705_s1 + $0x18] sm:$0xff]   ;;  %v602_v4 = vld [vmem:[%s706_s0] sm:$0xff]   ;;  %v599_v7 = vld [vmem:[%s705_s1 + $0x28] sm:$0xff]  }
   0x3   :  { %547 = vmatpush3.bf16.msra.mxu0 %v594_v0  ;;  %586 = vmatpush3.bf16.msra.mxu1 %v594_v0  ;;  %v603_v5 = vld [vmem:[%s706_s0 + $0x20] sm:$0xff]   ;;  %v600_v8 = vld [vmem:[%s705_s1 + $0x30] sm:$0xff]   ;;  %v601_v9 = vld [vmem:[%s705_s1 + $0x38] sm:$0xff]  }
   0x4   :  { %548 = vmatprep.subr.bf16.mxu0 %v595_v1  ;;  %579 = vmatprep.subr.bf16.mxu1 %v595_v1  ;;  %v598_v6 = vld [vmem:[%s705_s1 + $0x20] sm:$0xff]   ;;  %v604_v10 = vld [vmem:[%s706_s0 + $0x8] sm:$0xff]   ;;  %v606_v12 = vld [vmem:[%s706_s0 + $0x10] sm:$0xff]  }
   0x5   :  { %562 = vmatprep.mubr.bf16.mxu0 %v602_v4  ;;  %570 = vmatprep.mubr.bf16.mxu1 %v603_v5  ;;  %v605_v11 = vld [vmem:[%s706_s0 + $0x28] sm:$0xff]   ;;  %v607_v13 = vld [vmem:[%s706_s0 + $0x30] sm:$0xff]   ;;  %v608_v14 = vld [vmem:[%s706_s0 + $0x18] sm:$0xff]  }
   0x6   :  { %v609_v15 = vld [vmem:[%s706_s0 + $0x38] sm:$0xff]   ;;  %v450_v17 = vld [vmem:[%s707_s2] ss:$0 sm:$0xff] }
   0x7   :  { %549 = vmatpush3.bf16.msra.mxu0 %v595_v1  ;;  %587 = vmatpush3.bf16.msra.mxu1 %v595_v1 }
   0x8   :  { %550 = vmatprep.subr.bf16.mxu0 %v596_v2  ;;  %580 = vmatprep.subr.bf16.mxu1 %v596_v2 }
   0xb   :  { %551 = vmatpush3.bf16.msra.mxu0 %v596_v2  ;;  %588 = vmatpush3.bf16.msra.mxu1 %v596_v2 }
   0xc   :  { %552 = vmatprep.subr.bf16.mxu0 %v597_v3  ;;  %581 = vmatprep.subr.bf16.mxu1 %v597_v3 }
   0xf   :  { %553 = vmatpush3.bf16.msra.mxu0 %v597_v3  ;;  %589 = vmatpush3.bf16.msra.mxu1 %v597_v3 }
  0x10   :  { %554 = vmatprep.subr.bf16.mxu0 %v598_v6  ;;  %582 = vmatprep.subr.bf16.mxu1 %v598_v6 }
  0x13   :  { %555 = vmatpush3.bf16.msra.mxu0 %v598_v6  ;;  %590 = vmatpush3.bf16.msra.mxu1 %v598_v6 }
  0x14   :  { %556 = vmatprep.subr.bf16.mxu0 %v599_v7  ;;  %583 = vmatprep.subr.bf16.mxu1 %v599_v7 }
  0x17   :  { %557 = vmatpush3.bf16.msra.mxu0 %v599_v7  ;;  %591 = vmatpush3.bf16.msra.mxu1 %v599_v7 }
  0x18   :  { %558 = vmatprep.subr.bf16.mxu0 %v600_v8  ;;  %584 = vmatprep.subr.bf16.mxu1 %v600_v8 }
  0x1b   :  { %559 = vmatpush3.bf16.msra.mxu0 %v600_v8  ;;  %592 = vmatpush3.bf16.msra.mxu1 %v600_v8 }
  0x1c   :  { %560 = vmatprep.subr.bf16.mxu0 %v601_v9  ;;  %585 = vmatprep.subr.bf16.mxu1 %v601_v9 }
  0x1f   :  { %561 = vmatpush3.bf16.msra.mxu0 %v601_v9  ;;  %593 = vmatpush3.bf16.msra.mxu1 %v601_v9 }
  0x22   :  { %563 = vmatmul.mubr.bf16.vlgmr.msra.gmra.mrb[0].mxu0 %v604_v10  ;;  %571 = vmatmul.mubr.bf16.vlgmr.msra.gmra.mrb[0].mxu1 %v605_v11 }
  0x23   :  { %566 = vmatprep.mubr.bf16.mxu0 %v606_v12  ;;  %574 = vmatprep.mubr.bf16.mxu1 %v607_v13 }
  0x2a   :  { %567 = vmatmul.mubr.bf16.gmra.mrb[4].mxu0 %v608_v14  ;;  %575 = vmatmul.mubr.bf16.gmra.mrb[4].mxu1 %v609_v15 }
  0xf5   :  { %v564_v16 = vpop.f32.mrb[0].mxu0  ;;  %v572_v18 = vpop.f32.mrb[0].mxu1 }
  0xf6   :  { %v213_v19 = vpop.f32.mrb[1].mxu0  ;;  %v245_v20 = vpop.f32.mrb[1].mxu1  ;;  %v336_v23 = vadd.f32 %v564_v16, %v450_v17  ;;  %v344_v24 = vadd.f32 %v572_v18, %v450_v17 }
  0xf7   :  { %v565_v21 = vpop.f32.mrb[2].mxu0  ;;  %v573_v22 = vpop.f32.mrb[2].mxu1  ;;  %v334_v29 = vadd.f32 %v450_v17, %v213_v19  ;;  %v342_v30 = vadd.f32 %v450_v17, %v245_v20 }
  0xf8   :  { %v337_v25 = vadd.f32 %v565_v21, %v450_v17  ;;  %v345_v26 = vadd.f32 %v573_v22, %v450_v17  ;;  %v216_v27 = vpop.f32.mrb[3].mxu0  ;;  %v248_v28 = vpop.f32.mrb[3].mxu1 }
  0xf9   :  { %v335_v31 = vadd.f32 %v450_v17, %v216_v27  ;;  %v343_v32 = vadd.f32 %v450_v17, %v248_v28 }
  0xfa   :  { %v491_v33 = vpack.c.bf16 %v337_v25, %v336_v23  ;;  %v511_v34 = vpack.c.bf16 %v345_v26, %v344_v24 }
  0xfb   :  { %v486_v35 = vpack.c.bf16 %v335_v31, %v334_v29  ;;  %v506_v36 = vpack.c.bf16 %v343_v32, %v342_v30 }
  0xfc   :  { %523 = vst [vmem:[%s708_s3 + $0x8] sm:$0xff] %v491_v33   ;;  %527 = vst [vmem:[%s708_s3 + $0x28] sm:$0xff] %v511_v34  }
  0xfd   :  { %487 = vst [vmem:[%s708_s3] sm:$0xff] %v486_v35   ;;  %526 = vst [vmem:[%s708_s3 + $0x20] sm:$0xff] %v506_v36   ;;  %v568_v37 = vpop.f32.mrb[4].mxu0  ;;  %v576_v38 = vpop.f32.mrb[4].mxu1 }
  0xfe   :  { %v229_v39 = vpop.f32.mrb[5].mxu0  ;;  %v261_v40 = vpop.f32.mrb[5].mxu1  ;;  %v340_v43 = vadd.f32 %v568_v37, %v450_v17  ;;  %v348_v44 = vadd.f32 %v576_v38, %v450_v17 }
  0xff   :  { %v569_v41 = vpop.f32.mrb[6].mxu0  ;;  %v577_v42 = vpop.f32.mrb[6].mxu1  ;;  %v338_v49 = vadd.f32 %v450_v17, %v229_v39  ;;  %v346_v50 = vadd.f32 %v450_v17, %v261_v40 }
 0x100   :  { %v341_v45 = vadd.f32 %v569_v41, %v450_v17  ;;  %v349_v46 = vadd.f32 %v577_v42, %v450_v17  ;;  %v232_v47 = vpop.f32.mrb[7].mxu0  ;;  %v264_v48 = vpop.f32.mrb[7].mxu1 }
 0x101   :  { %v339_v51 = vadd.f32 %v450_v17, %v232_v47  ;;  %v347_v52 = vadd.f32 %v450_v17, %v264_v48 }
 0x102   :  { %v501_v53 = vpack.c.bf16 %v341_v45, %v340_v43  ;;  %v521_v54 = vpack.c.bf16 %v349_v46, %v348_v44 }
 0x103   :  { %v496_v55 = vpack.c.bf16 %v339_v51, %v338_v49  ;;  %v516_v56 = vpack.c.bf16 %v347_v52, %v346_v50 }
 0x104   :  { %525 = vst [vmem:[%s708_s3 + $0x18] sm:$0xff] %v501_v53   ;;  %529 = vst [vmem:[%s708_s3 + $0x38] sm:$0xff] %v521_v54  }
 0x105   :  { %524 = vst [vmem:[%s708_s3 + $0x10] sm:$0xff] %v496_v55   ;;  %528 = vst [vmem:[%s708_s3 + $0x30] sm:$0xff] %v516_v56  }

// kernel: hgnn_transformer_forward.10
= control target key start
LH: loop header
LB: loop body
LE: loop exit
PB: predicated region body
PF: predicated region fallthrough
CT: control target
= control target key end

     0   :  { %s686_s1 = inlined_call_operand.vmem [shape: bf16[128,128], index: 1, kind: input, shape index: {}]   ;;  %s687_s0 = inlined_call_operand.vmem [shape: bf16[128,128], index: 0, kind: input, shape index: {}]   ;;  %s688_s2 = inlined_call_operand.vmem [shape: bf16[128,128], index: 2, kind: output, shape index: {}]  }
   0x1   :  { %v583_v0 = vld [vmem:[%s686_s1] sm:$0xff]   ;;  %v584_v1 = vld [vmem:[%s686_s1 + $0x8] sm:$0xff]   ;;  %v585_v2 = vld [vmem:[%s686_s1 + $0x10] sm:$0xff]  }
   0x2   :  { %535 = vmatprep.subr.bf16.mxu0 %v583_v0  ;;  %567 = vmatprep.subr.bf16.mxu1 %v583_v0  ;;  %v586_v3 = vld [vmem:[%s686_s1 + $0x18] sm:$0xff]   ;;  %v591_v4 = vld [vmem:[%s687_s0] sm:$0xff]   ;;  %v588_v7 = vld [vmem:[%s686_s1 + $0x28] sm:$0xff]  }
   0x3   :  { %536 = vmatpush3.bf16.msra.mxu0 %v583_v0  ;;  %575 = vmatpush3.bf16.msra.mxu1 %v583_v0  ;;  %v592_v5 = vld [vmem:[%s687_s0 + $0x20] sm:$0xff]   ;;  %v589_v8 = vld [vmem:[%s686_s1 + $0x30] sm:$0xff]   ;;  %v590_v9 = vld [vmem:[%s686_s1 + $0x38] sm:$0xff]  }
   0x4   :  { %537 = vmatprep.subr.bf16.mxu0 %v584_v1  ;;  %568 = vmatprep.subr.bf16.mxu1 %v584_v1  ;;  %v587_v6 = vld [vmem:[%s686_s1 + $0x20] sm:$0xff]   ;;  %v593_v10 = vld [vmem:[%s687_s0 + $0x8] sm:$0xff]   ;;  %v595_v12 = vld [vmem:[%s687_s0 + $0x10] sm:$0xff]  }
   0x5   :  { %551 = vmatprep.mubr.bf16.mxu0 %v591_v4  ;;  %559 = vmatprep.mubr.bf16.mxu1 %v592_v5  ;;  %v594_v11 = vld [vmem:[%s687_s0 + $0x28] sm:$0xff]   ;;  %v596_v13 = vld [vmem:[%s687_s0 + $0x30] sm:$0xff]   ;;  %v597_v14 = vld [vmem:[%s687_s0 + $0x18] sm:$0xff]  }
   0x6   :  { %v598_v15 = vld [vmem:[%s687_s0 + $0x38] sm:$0xff]  }
   0x7   :  { %538 = vmatpush3.bf16.msra.mxu0 %v584_v1  ;;  %576 = vmatpush3.bf16.msra.mxu1 %v584_v1 }
   0x8   :  { %539 = vmatprep.subr.bf16.mxu0 %v585_v2  ;;  %569 = vmatprep.subr.bf16.mxu1 %v585_v2 }
   0xb   :  { %540 = vmatpush3.bf16.msra.mxu0 %v585_v2  ;;  %577 = vmatpush3.bf16.msra.mxu1 %v585_v2 }
   0xc   :  { %541 = vmatprep.subr.bf16.mxu0 %v586_v3  ;;  %570 = vmatprep.subr.bf16.mxu1 %v586_v3 }
   0xf   :  { %542 = vmatpush3.bf16.msra.mxu0 %v586_v3  ;;  %578 = vmatpush3.bf16.msra.mxu1 %v586_v3 }
  0x10   :  { %543 = vmatprep.subr.bf16.mxu0 %v587_v6  ;;  %571 = vmatprep.subr.bf16.mxu1 %v587_v6 }
  0x13   :  { %544 = vmatpush3.bf16.msra.mxu0 %v587_v6  ;;  %579 = vmatpush3.bf16.msra.mxu1 %v587_v6 }
  0x14   :  { %545 = vmatprep.subr.bf16.mxu0 %v588_v7  ;;  %572 = vmatprep.subr.bf16.mxu1 %v588_v7 }
  0x17   :  { %546 = vmatpush3.bf16.msra.mxu0 %v588_v7  ;;  %580 = vmatpush3.bf16.msra.mxu1 %v588_v7 }
  0x18   :  { %547 = vmatprep.subr.bf16.mxu0 %v589_v8  ;;  %573 = vmatprep.subr.bf16.mxu1 %v589_v8 }
  0x1b   :  { %548 = vmatpush3.bf16.msra.mxu0 %v589_v8  ;;  %581 = vmatpush3.bf16.msra.mxu1 %v589_v8 }
  0x1c   :  { %549 = vmatprep.subr.bf16.mxu0 %v590_v9  ;;  %574 = vmatprep.subr.bf16.mxu1 %v590_v9 }
  0x1f   :  { %550 = vmatpush3.bf16.msra.mxu0 %v590_v9  ;;  %582 = vmatpush3.bf16.msra.mxu1 %v590_v9 }
  0x22   :  { %552 = vmatmul.mubr.bf16.vlgmr.msra.gmra.mrb[0].mxu0 %v593_v10  ;;  %560 = vmatmul.mubr.bf16.vlgmr.msra.gmra.mrb[0].mxu1 %v594_v11 }
  0x23   :  { %555 = vmatprep.mubr.bf16.mxu0 %v595_v12  ;;  %563 = vmatprep.mubr.bf16.mxu1 %v596_v13 }
  0x2a   :  { %556 = vmatmul.mubr.bf16.gmra.mrb[4].mxu0 %v597_v14  ;;  %564 = vmatmul.mubr.bf16.gmra.mrb[4].mxu1 %v598_v15 }
  0xf5   :  { %v553_v16 = vpop.f32.mrb[0].mxu0  ;;  %v561_v17 = vpop.f32.mrb[0].mxu1 }
  0xf6   :  { %v210_v18 = vpop.f32.mrb[1].mxu0  ;;  %v242_v19 = vpop.f32.mrb[1].mxu1  ;;  %v326_v22 = vmax.f32 %v553_v16, 0.0  ;;  %v334_v23 = vmax.f32 %v561_v17, 0.0 }
  0xf7   :  { %v554_v20 = vpop.f32.mrb[2].mxu0  ;;  %v562_v21 = vpop.f32.mrb[2].mxu1  ;;  %v324_v28 = vmax.f32 %v210_v18, 0.0  ;;  %v332_v29 = vmax.f32 %v242_v19, 0.0 }
  0xf8   :  { %v327_v24 = vmax.f32 %v554_v20, 0.0  ;;  %v335_v25 = vmax.f32 %v562_v21, 0.0  ;;  %v213_v26 = vpop.f32.mrb[3].mxu0  ;;  %v245_v27 = vpop.f32.mrb[3].mxu1 }
  0xf9   :  { %v325_v30 = vmax.f32 %v213_v26, 0.0  ;;  %v333_v31 = vmax.f32 %v245_v27, 0.0 }
  0xfa   :  { %v480_v32 = vpack.c.bf16 %v327_v24, %v326_v22  ;;  %v500_v33 = vpack.c.bf16 %v335_v25, %v334_v23 }
  0xfb   :  { %v475_v34 = vpack.c.bf16 %v325_v30, %v324_v28  ;;  %v495_v35 = vpack.c.bf16 %v333_v31, %v332_v29 }
  0xfc   :  { %512 = vst [vmem:[%s688_s2 + $0x8] sm:$0xff] %v480_v32   ;;  %516 = vst [vmem:[%s688_s2 + $0x28] sm:$0xff] %v500_v33  }
  0xfd   :  { %476 = vst [vmem:[%s688_s2] sm:$0xff] %v475_v34   ;;  %515 = vst [vmem:[%s688_s2 + $0x20] sm:$0xff] %v495_v35   ;;  %v557_v36 = vpop.f32.mrb[4].mxu0  ;;  %v565_v37 = vpop.f32.mrb[4].mxu1 }
  0xfe   :  { %v226_v38 = vpop.f32.mrb[5].mxu0  ;;  %v258_v39 = vpop.f32.mrb[5].mxu1  ;;  %v330_v42 = vmax.f32 %v557_v36, 0.0  ;;  %v338_v43 = vmax.f32 %v565_v37, 0.0 }
  0xff   :  { %v558_v40 = vpop.f32.mrb[6].mxu0  ;;  %v566_v41 = vpop.f32.mrb[6].mxu1  ;;  %v328_v48 = vmax.f32 %v226_v38, 0.0  ;;  %v336_v49 = vmax.f32 %v258_v39, 0.0 }
 0x100   :  { %v331_v44 = vmax.f32 %v558_v40, 0.0  ;;  %v339_v45 = vmax.f32 %v566_v41, 0.0  ;;  %v229_v46 = vpop.f32.mrb[7].mxu0  ;;  %v261_v47 = vpop.f32.mrb[7].mxu1 }
 0x101   :  { %v329_v50 = vmax.f32 %v229_v46, 0.0  ;;  %v337_v51 = vmax.f32 %v261_v47, 0.0 }
 0x102   :  { %v490_v52 = vpack.c.bf16 %v331_v44, %v330_v42  ;;  %v510_v53 = vpack.c.bf16 %v339_v45, %v338_v43 }
 0x103   :  { %v485_v54 = vpack.c.bf16 %v329_v50, %v328_v48  ;;  %v505_v55 = vpack.c.bf16 %v337_v51, %v336_v49 }
 0x104   :  { %514 = vst [vmem:[%s688_s2 + $0x18] sm:$0xff] %v490_v52   ;;  %518 = vst [vmem:[%s688_s2 + $0x38] sm:$0xff] %v510_v53  }
 0x105   :  { %513 = vst [vmem:[%s688_s2 + $0x10] sm:$0xff] %v485_v54   ;;  %517 = vst [vmem:[%s688_s2 + $0x30] sm:$0xff] %v505_v55  }

// kernel: hgnn_transformer_forward.9
= control target key start
LH: loop header
LB: loop body
LE: loop exit
PB: predicated region body
PF: predicated region fallthrough
CT: control target
= control target key end

     0   :  { %s670_s1 = inlined_call_operand.vmem [shape: bf16[128,128], index: 1, kind: input, shape index: {}]   ;;  %s671_s0 = inlined_call_operand.vmem [shape: bf16[128,128], index: 0, kind: input, shape index: {}]   ;;  %s672_s2 = inlined_call_operand.vmem [shape: bf16[128,128], index: 2, kind: output, shape index: {}]  }
   0x1   :  { %v567_v0 = vld [vmem:[%s670_s1] sm:$0xff]   ;;  %v568_v1 = vld [vmem:[%s670_s1 + $0x8] sm:$0xff]   ;;  %v569_v2 = vld [vmem:[%s670_s1 + $0x10] sm:$0xff]  }
   0x2   :  { %519 = vmatprep.subr.bf16.mxu0 %v567_v0  ;;  %551 = vmatprep.subr.bf16.mxu1 %v567_v0  ;;  %v570_v3 = vld [vmem:[%s670_s1 + $0x18] sm:$0xff]   ;;  %v575_v4 = vld [vmem:[%s671_s0] sm:$0xff]   ;;  %v572_v7 = vld [vmem:[%s670_s1 + $0x28] sm:$0xff]  }
   0x3   :  { %520 = vmatpush3.bf16.msra.mxu0 %v567_v0  ;;  %559 = vmatpush3.bf16.msra.mxu1 %v567_v0  ;;  %v576_v5 = vld [vmem:[%s671_s0 + $0x20] sm:$0xff]   ;;  %v573_v8 = vld [vmem:[%s670_s1 + $0x30] sm:$0xff]   ;;  %v574_v9 = vld [vmem:[%s670_s1 + $0x38] sm:$0xff]  }
   0x4   :  { %521 = vmatprep.subr.bf16.mxu0 %v568_v1  ;;  %552 = vmatprep.subr.bf16.mxu1 %v568_v1  ;;  %v571_v6 = vld [vmem:[%s670_s1 + $0x20] sm:$0xff]   ;;  %v577_v10 = vld [vmem:[%s671_s0 + $0x8] sm:$0xff]   ;;  %v579_v12 = vld [vmem:[%s671_s0 + $0x10] sm:$0xff]  }
   0x5   :  { %535 = vmatprep.mubr.bf16.mxu0 %v575_v4  ;;  %543 = vmatprep.mubr.bf16.mxu1 %v576_v5  ;;  %v578_v11 = vld [vmem:[%s671_s0 + $0x28] sm:$0xff]   ;;  %v580_v13 = vld [vmem:[%s671_s0 + $0x30] sm:$0xff]   ;;  %v581_v14 = vld [vmem:[%s671_s0 + $0x18] sm:$0xff]  }
   0x6   :  { %v582_v15 = vld [vmem:[%s671_s0 + $0x38] sm:$0xff]  }
   0x7   :  { %522 = vmatpush3.bf16.msra.mxu0 %v568_v1  ;;  %560 = vmatpush3.bf16.msra.mxu1 %v568_v1 }
   0x8   :  { %523 = vmatprep.subr.bf16.mxu0 %v569_v2  ;;  %553 = vmatprep.subr.bf16.mxu1 %v569_v2 }
   0xb   :  { %524 = vmatpush3.bf16.msra.mxu0 %v569_v2  ;;  %561 = vmatpush3.bf16.msra.mxu1 %v569_v2 }
   0xc   :  { %525 = vmatprep.subr.bf16.mxu0 %v570_v3  ;;  %554 = vmatprep.subr.bf16.mxu1 %v570_v3 }
   0xf   :  { %526 = vmatpush3.bf16.msra.mxu0 %v570_v3  ;;  %562 = vmatpush3.bf16.msra.mxu1 %v570_v3 }
  0x10   :  { %527 = vmatprep.subr.bf16.mxu0 %v571_v6  ;;  %555 = vmatprep.subr.bf16.mxu1 %v571_v6 }
  0x13   :  { %528 = vmatpush3.bf16.msra.mxu0 %v571_v6  ;;  %563 = vmatpush3.bf16.msra.mxu1 %v571_v6 }
  0x14   :  { %529 = vmatprep.subr.bf16.mxu0 %v572_v7  ;;  %556 = vmatprep.subr.bf16.mxu1 %v572_v7 }
  0x17   :  { %530 = vmatpush3.bf16.msra.mxu0 %v572_v7  ;;  %564 = vmatpush3.bf16.msra.mxu1 %v572_v7 }
  0x18   :  { %531 = vmatprep.subr.bf16.mxu0 %v573_v8  ;;  %557 = vmatprep.subr.bf16.mxu1 %v573_v8 }
  0x1b   :  { %532 = vmatpush3.bf16.msra.mxu0 %v573_v8  ;;  %565 = vmatpush3.bf16.msra.mxu1 %v573_v8 }
  0x1c   :  { %533 = vmatprep.subr.bf16.mxu0 %v574_v9  ;;  %558 = vmatprep.subr.bf16.mxu1 %v574_v9 }
  0x1f   :  { %534 = vmatpush3.bf16.msra.mxu0 %v574_v9  ;;  %566 = vmatpush3.bf16.msra.mxu1 %v574_v9 }
  0x22   :  { %536 = vmatmul.mubr.bf16.vlgmr.msra.gmra.mrb[0].mxu0 %v577_v10  ;;  %544 = vmatmul.mubr.bf16.vlgmr.msra.gmra.mrb[0].mxu1 %v578_v11 }
  0x23   :  { %539 = vmatprep.mubr.bf16.mxu0 %v579_v12  ;;  %547 = vmatprep.mubr.bf16.mxu1 %v580_v13 }
  0x2a   :  { %540 = vmatmul.mubr.bf16.gmra.mrb[4].mxu0 %v581_v14  ;;  %548 = vmatmul.mubr.bf16.gmra.mrb[4].mxu1 %v582_v15 }
  0xf5   :  { %v537_v16 = vpop.f32.mrb[0].mxu0  ;;  %v545_v17 = vpop.f32.mrb[0].mxu1 }
  0xf6   :  { %v210_v18 = vpop.f32.mrb[1].mxu0  ;;  %v242_v19 = vpop.f32.mrb[1].mxu1 }
  0xf7   :  { %v538_v20 = vpop.f32.mrb[2].mxu0  ;;  %v546_v21 = vpop.f32.mrb[2].mxu1 }
  0xf8   :  { %v464_v22 = vpack.c.bf16 %v538_v20, %v537_v16  ;;  %v484_v23 = vpack.c.bf16 %v546_v21, %v545_v17  ;;  %v213_v24 = vpop.f32.mrb[3].mxu0  ;;  %v245_v25 = vpop.f32.mrb[3].mxu1 }
  0xf9   :  { %v459_v26 = vpack.c.bf16 %v213_v24, %v210_v18  ;;  %v479_v27 = vpack.c.bf16 %v245_v25, %v242_v19 }
  0xfa   :  { %496 = vst [vmem:[%s672_s2 + $0x8] sm:$0xff] %v464_v22   ;;  %500 = vst [vmem:[%s672_s2 + $0x28] sm:$0xff] %v484_v23  }
  0xfb   :  { %460 = vst [vmem:[%s672_s2] sm:$0xff] %v459_v26   ;;  %499 = vst [vmem:[%s672_s2 + $0x20] sm:$0xff] %v479_v27  }
  0xfd   :  { %v541_v28 = vpop.f32.mrb[4].mxu0  ;;  %v549_v29 = vpop.f32.mrb[4].mxu1 }
  0xfe   :  { %v226_v30 = vpop.f32.mrb[5].mxu0  ;;  %v258_v31 = vpop.f32.mrb[5].mxu1 }
  0xff   :  { %v542_v32 = vpop.f32.mrb[6].mxu0  ;;  %v550_v33 = vpop.f32.mrb[6].mxu1 }
 0x100   :  { %v474_v34 = vpack.c.bf16 %v542_v32, %v541_v28  ;;  %v494_v35 = vpack.c.bf16 %v550_v33, %v549_v29  ;;  %v229_v36 = vpop.f32.mrb[7].mxu0  ;;  %v261_v37 = vpop.f32.mrb[7].mxu1 }
 0x101   :  { %v469_v38 = vpack.c.bf16 %v229_v36, %v226_v30  ;;  %v489_v39 = vpack.c.bf16 %v261_v37, %v258_v31 }
 0x102   :  { %498 = vst [vmem:[%s672_s2 + $0x18] sm:$0xff] %v474_v34   ;;  %502 = vst [vmem:[%s672_s2 + $0x38] sm:$0xff] %v494_v35  }
 0x103   :  { %497 = vst [vmem:[%s672_s2 + $0x10] sm:$0xff] %v469_v38   ;;  %501 = vst [vmem:[%s672_s2 + $0x30] sm:$0xff] %v489_v39  }

// kernel: hgnn_transformer_forward.11
= control target key start
LH: loop header
LB: loop body
LE: loop exit
PB: predicated region body
PF: predicated region fallthrough
CT: control target
= control target key end

     0   :  { %s1257_s12 = smov 0   ;;  %s1259_s13 = smov 0   ;;  %s1416_s0 = inlined_call_operand.vmem [shape: bf16[128,128], index: 0, kind: input, shape index: {}]   ;;  %s1417_s1 = inlined_call_operand.vmem [shape: bf16[128,384], index: 1, kind: input, shape index: {}]   ;;  %s1418_s2 = inlined_call_operand.vmem [shape: f32[1,384], index: 2, kind: input, shape index: {}]   ;;  %s1419_s3 = inlined_call_operand.vmem [shape: bf16[128,384], index: 3, kind: output, shape index: {}]  }
   0x1   :  { %s1261_s14 = smov 0   ;;  %s1263_s15 = smov 0  }
   0x2   :  { %s1265_s16 = smov 0  }
   0x3 LB: > { %s28_s17 = sadd.s32 1, %s1231_s15  ;;  %s967_s18 = sadd.s32 4294967295, %s1235_s16   ;;  %s1235_s16 = sphi %s1265_s16, %s13_s16   ;;  %s1231_s15 = sphi %s1263_s15, %s1424_s15   ;;  %s1227_s14 = sphi %s1261_s14, %s1423_s14   ;;  %s1223_s13 = sphi %s1259_s13, %s1422_s13   ;;  %s1219_s12 = sphi %s1257_s12, %s1421_s12  }
   0x4   : > { %p30_p0 = scmp.ge.s32.totalorder %s28_s17, 3  ;;  %p76_p1 = scmp.ne.s32.totalorder %s1223_s13, %s1219_s12 }
   0x5   : > { %p77_p2 = scmp.eq.s32.totalorder %s1235_s16, 0  ;;  %p134_p4 = scmp.eq.s32.totalorder %s967_s18, 2 }
   0x6   : > { %s1426_s17 = smov (%p30_p0, %s28_s17), 0  ;;  %s69_s20 = sadd.s32 1, %s1223_s13 }
   0x7   : > { %p78_p3 = por %p77_p2, %p76_p1  ;;  %s65_s19 = ssub.s32 %s1231_s15, %s1426_s17 }
   0x8   : > { %p67_p5 = scmp.eq.s32.totalorder %s65_s19, 0  ;;  %p1292_p6 = por %p134_p4, %p76_p1 }
   0x9   : > { %p971_p7 = scmp.ge.s32.totalorder %s1235_s16, 3 }
   0xa   : > { %s1297_s22 = scalar_select %p67_p5, %s1223_s13, %s69_s20  }
   0xb   : > { %168 = sbr.rel (%p971_p7) target bundleno = 32 (0x20), region = 20 }
  0x12   : > { %171 = sbr.rel (!%p78_p3) target bundleno = 32 (0x20), region = 24  ;;  %s173_s23 = sand.u32 (%p78_p3), 1, %s1223_s13  }
  0x13   : > { %s973_s24 = sshll.u32 (%p78_p3), %s1231_s15, 2  ;;  %s972_s25 = sshll.u32 (%p78_p3), %s173_s23, 6 }
  0x14   : > { %s1305_s28 = scalar_lea.vmem (%p78_p3), %s1417_s1, %s973_s24  ;;  %s175_s29 = scalar_lea.vmem (%p78_p3), [#allocation3], %s972_s25 }
  0x15   : > { %v196_v0 = vld [vmem:[%s1305_s28] sm:$0xf] (%p78_p3)  ;;  %v198_v1 = vld [vmem:[%s1305_s28 + $0xc] sm:$0xf] (%p78_p3)  ;;  %v200_v2 = vld [vmem:[%s1305_s28 + $0x18] sm:$0xf] (%p78_p3) }
  0x16   : > { %197 = vst [vmem:[%s175_s29] sm:$0xf] (%p78_p3), %v196_v0  ;;  %199 = vst [vmem:[%s175_s29 + $0x4] sm:$0xf] (%p78_p3), %v198_v1  ;;  %v202_v3 = vld [vmem:[%s1305_s28 + $0x24] sm:$0xf] (%p78_p3) }
  0x17   : > { %v204_v4 = vld [vmem:[%s1305_s28 + $0x30] sm:$0xf] (%p78_p3)  ;;  %201 = vst [vmem:[%s175_s29 + $0x8] sm:$0xf] (%p78_p3), %v200_v2  ;;  %203 = vst [vmem:[%s175_s29 + $0xc] sm:$0xf] (%p78_p3), %v202_v3 }
  0x18   : > { %205 = vst [vmem:[%s175_s29 + $0x10] sm:$0xf] (%p78_p3), %v204_v4  ;;  %v206_v5 = vld [vmem:[%s1305_s28 + $0x3c] sm:$0xf] (%p78_p3)  ;;  %v208_v6 = vld [vmem:[%s1305_s28 + $0x48] sm:$0xf] (%p78_p3) }
  0x19   : > { %v210_v7 = vld [vmem:[%s1305_s28 + $0x54] sm:$0xf]  ;;  %207 = vst [vmem:[%s175_s29 + $0x14] sm:$0xf] %v206_v5  ;;  %209 = vst [vmem:[%s175_s29 + $0x18] sm:$0xf] %v208_v6 }
  0x1a   : > { %211 = vst [vmem:[%s175_s29 + $0x1c] sm:$0xf] %v210_v7  ;;  %v212_v8 = vld [vmem:[%s1305_s28 + $0x60] sm:$0xf]  ;;  %v214_v9 = vld [vmem:[%s1305_s28 + $0x6c] sm:$0xf] }
  0x1b   : > { %v216_v10 = vld [vmem:[%s1305_s28 + $0x78] sm:$0xf]  ;;  %213 = vst [vmem:[%s175_s29 + $0x20] sm:$0xf] %v212_v8  ;;  %215 = vst [vmem:[%s175_s29 + $0x24] sm:$0xf] %v214_v9 }
  0x1c   : > { %217 = vst [vmem:[%s175_s29 + $0x28] sm:$0xf] %v216_v10  ;;  %v218_v11 = vld [vmem:[%s1305_s28 + $0x84] sm:$0xf]  ;;  %v220_v12 = vld [vmem:[%s1305_s28 + $0x90] sm:$0xf] }
  0x1d   : > { %v222_v13 = vld [vmem:[%s1305_s28 + $0x9c] sm:$0xf]  ;;  %219 = vst [vmem:[%s175_s29 + $0x2c] sm:$0xf] %v218_v11  ;;  %221 = vst [vmem:[%s175_s29 + $0x30] sm:$0xf] %v220_v12 }
  0x1e   : > { %223 = vst [vmem:[%s175_s29 + $0x34] sm:$0xf] %v222_v13  ;;  %v224_v14 = vld [vmem:[%s1305_s28 + $0xa8] sm:$0xf]  ;;  %v226_v15 = vld [vmem:[%s1305_s28 + $0xb4] sm:$0xf] }
  0x1f   : > { %225 = vst [vmem:[%s175_s29 + $0x38] sm:$0xf] %v224_v14  ;;  %227 = vst [vmem:[%s175_s29 + $0x3c] sm:$0xf] %v226_v15 }
  0x20 PF: > { %p974_p8 = scmp.ge.s32.totalorder %s1235_s16, 1  ;;  %p287_p9 = scmp.lt.s32.totalorder %s1235_s16, 4 }
  0x22   : > { %p288_p10 = pnand %p974_p8, %p287_p9 }
  0x23   : > { %s294_s30 = sand.u32 (!%p288_p10), 1, %s1219_s12   ;;  %v1189_v16 = vld [vmem:[%s1416_s0] sm:$0xff] (!%p288_p10)   ;;  %v1191_v26 = vld [vmem:[%s1416_s0 + $0x8] sm:$0xff] (!%p288_p10)   ;;  %v1193_v28 = vld [vmem:[%s1416_s0 + $0x10] sm:$0xff] (!%p288_p10)   ;;  %p337_p11 = scmp.lt.s32.totalorder (!%p288_p10), %s1227_s14, 2 }
  0x24   : > { %291 = sbr.rel (%p288_p10) target bundleno = 310 (0x136), region = 69  ;;  %s1329_s6 = sshll.u32 (!%p288_p10), %s294_s30, 6  ;;  %v1190_v17 = vld [vmem:[%s1416_s0 + $0x20] sm:$0xff] (!%p288_p10)   ;;  %1109 = vmatprep.mubr.bf16.mxu0 (!%p288_p10), %v1189_v16  ;;  %v1192_v27 = vld [vmem:[%s1416_s0 + $0x28] sm:$0xff] (!%p288_p10)   ;;  %v1194_v29 = vld [vmem:[%s1416_s0 + $0x30] sm:$0xff] (!%p288_p10)  }
  0x25   : > { %s1335_s9 = scalar_lea.vmem (!%p288_p10), [#allocation3], %s1329_s6  ;;  %1117 = vmatprep.mubr.bf16.mxu1 (!%p288_p10), %v1190_v17  ;;  %v1195_v30 = vld [vmem:[%s1416_s0 + $0x18] sm:$0xff] (!%p288_p10)   ;;  %s1369_s7 = scalar_lea.vmem (!%p288_p10), [#allocation4], %s1329_s6 }
  0x26   : > { %v1181_v18 = vld [vmem:[%s1335_s9] sm:$0xff] (!%p288_p10)   ;;  %v1182_v19 = vld [vmem:[%s1335_s9 + $0x8] sm:$0xff] (!%p288_p10)   ;;  %v1183_v20 = vld [vmem:[%s1335_s9 + $0x10] sm:$0xff] (!%p288_p10)  }
  0x27   : > { %1093 = vmatprep.subr.bf16.mxu0 (!%p288_p10), %v1181_v18  ;;  %1125 = vmatprep.subr.bf16.mxu1 (!%p288_p10), %v1181_v18  ;;  %v1184_v21 = vld [vmem:[%s1335_s9 + $0x18] sm:$0xff] (!%p288_p10)   ;;  %v1185_v22 = vld [vmem:[%s1335_s9 + $0x20] sm:$0xff] (!%p288_p10)   ;;  %v1186_v23 = vld [vmem:[%s1335_s9 + $0x28] sm:$0xff] (!%p288_p10)  }
  0x28   : > { %1094 = vmatpush3.bf16.msra.mxu0 (!%p288_p10), %v1181_v18  ;;  %1133 = vmatpush3.bf16.msra.mxu1 (!%p288_p10), %v1181_v18  ;;  %v1187_v24 = vld [vmem:[%s1335_s9 + $0x30] sm:$0xff] (!%p288_p10)   ;;  %v1188_v25 = vld [vmem:[%s1335_s9 + $0x38] sm:$0xff] (!%p288_p10)  }
  0x29   : > { %1095 = vmatprep.subr.bf16.mxu0 (!%p288_p10), %v1182_v19  ;;  %1126 = vmatprep.subr.bf16.mxu1 (!%p288_p10), %v1182_v19  ;;  %v1196_v31 = vld [vmem:[%s1416_s0 + $0x38] sm:$0xff] (!%p288_p10)  }
  0x2b   : > { %s338_s29 = scalar_select %p337_p11, %s1227_s14, 2 }
  0x2c   : > { %1096 = vmatpush3.bf16.msra.mxu0 %v1182_v19  ;;  %1134 = vmatpush3.bf16.msra.mxu1 %v1182_v19  ;;  %s1011_s6 = sshll.u32 (%p1292_p6), %s1227_s14, 2 }
  0x2d   : > { %1097 = vmatprep.subr.bf16.mxu0 %v1183_v20  ;;  %1127 = vmatprep.subr.bf16.mxu1 %v1183_v20  ;;  %s339_s5 = scalar_lea.vmem %s1418_s2, %s338_s29  ;;  %s768_s10 = scalar_lea.vmem (%p1292_p6), %s1419_s3, %s1011_s6 }
  0x2e   : > { %v993_v33 = vld [vmem:[%s339_s5] ss:$0 sm:$0xff] }
  0x30   : > { %1098 = vmatpush3.bf16.msra.mxu0 %v1183_v20  ;;  %1135 = vmatpush3.bf16.msra.mxu1 %v1183_v20 }
  0x31   : > { %1099 = vmatprep.subr.bf16.mxu0 %v1184_v21  ;;  %1128 = vmatprep.subr.bf16.mxu1 %v1184_v21 }
  0x34   : > { %1100 = vmatpush3.bf16.msra.mxu0 %v1184_v21  ;;  %1136 = vmatpush3.bf16.msra.mxu1 %v1184_v21 }
  0x35   : > { %1101 = vmatprep.subr.bf16.mxu0 %v1185_v22  ;;  %1129 = vmatprep.subr.bf16.mxu1 %v1185_v22 }
  0x38   : > { %1102 = vmatpush3.bf16.msra.mxu0 %v1185_v22  ;;  %1137 = vmatpush3.bf16.msra.mxu1 %v1185_v22 }
  0x39   : > { %1103 = vmatprep.subr.bf16.mxu0 %v1186_v23  ;;  %1130 = vmatprep.subr.bf16.mxu1 %v1186_v23 }
  0x3c   : > { %1104 = vmatpush3.bf16.msra.mxu0 %v1186_v23  ;;  %1138 = vmatpush3.bf16.msra.mxu1 %v1186_v23 }
  0x3d   : > { %1105 = vmatprep.subr.bf16.mxu0 %v1187_v24  ;;  %1131 = vmatprep.subr.bf16.mxu1 %v1187_v24 }
  0x40   : > { %1106 = vmatpush3.bf16.msra.mxu0 %v1187_v24  ;;  %1139 = vmatpush3.bf16.msra.mxu1 %v1187_v24 }
  0x41   : > { %1107 = vmatprep.subr.bf16.mxu0 %v1188_v25  ;;  %1132 = vmatprep.subr.bf16.mxu1 %v1188_v25 }
  0x44   : > { %1108 = vmatpush3.bf16.msra.mxu0 %v1188_v25  ;;  %1140 = vmatpush3.bf16.msra.mxu1 %v1188_v25 }
  0x47   : > { %1110 = vmatmul.mubr.bf16.vlgmr.msra.gmra.mrb[0].mxu0 %v1191_v26  ;;  %1118 = vmatmul.mubr.bf16.vlgmr.msra.gmra.mrb[0].mxu1 %v1192_v27 }
  0x48   : > { %1113 = vmatprep.mubr.bf16.mxu0 %v1193_v28  ;;  %1121 = vmatprep.mubr.bf16.mxu1 %v1194_v29 }
  0x4f   : > { %1114 = vmatmul.mubr.bf16.gmra.mrb[4].mxu0 %v1195_v30  ;;  %1122 = vmatmul.mubr.bf16.gmra.mrb[4].mxu1 %v1196_v31 }
 0x11a   : > { %v1111_v32 = vpop.f32.mrb[0].mxu0  ;;  %v1119_v34 = vpop.f32.mrb[0].mxu1 }
 0x11b   : > { %v540_v35 = vpop.f32.mrb[1].mxu0  ;;  %v572_v36 = vpop.f32.mrb[1].mxu1  ;;  %v663_v39 = vadd.f32 %v1111_v32, %v993_v33  ;;  %v671_v40 = vadd.f32 %v1119_v34, %v993_v33 }
 0x11c   : > { %v1112_v37 = vpop.f32.mrb[2].mxu0  ;;  %v1120_v38 = vpop.f32.mrb[2].mxu1  ;;  %v661_v45 = vadd.f32 %v993_v33, %v540_v35  ;;  %v669_v46 = vadd.f32 %v993_v33, %v572_v36 }
 0x11d   : > { %v664_v41 = vadd.f32 %v1112_v37, %v993_v33  ;;  %v672_v42 = vadd.f32 %v1120_v38, %v993_v33  ;;  %v543_v43 = vpop.f32.mrb[3].mxu0  ;;  %v575_v44 = vpop.f32.mrb[3].mxu1 }
 0x11e   : > { %v662_v47 = vadd.f32 %v993_v33, %v543_v43  ;;  %v670_v48 = vadd.f32 %v993_v33, %v575_v44 }
 0x11f   : > { %v1038_v49 = vpack.c.bf16 %v664_v41, %v663_v39  ;;  %v1058_v50 = vpack.c.bf16 %v672_v42, %v671_v40 }
 0x120   : > { %v1033_v51 = vpack.c.bf16 %v662_v47, %v661_v45  ;;  %v1053_v52 = vpack.c.bf16 %v670_v48, %v669_v46 }
 0x121   : > { %1070 = vst [vmem:[%s1369_s7 + $0x8] sm:$0xff] %v1038_v49   ;;  %1074 = vst [vmem:[%s1369_s7 + $0x28] sm:$0xff] %v1058_v50  }
 0x122   : > { %1034 = vst [vmem:[%s1369_s7] sm:$0xff] %v1033_v51   ;;  %1073 = vst [vmem:[%s1369_s7 + $0x20] sm:$0xff] %v1053_v52   ;;  %v1115_v53 = vpop.f32.mrb[4].mxu0  ;;  %v1123_v54 = vpop.f32.mrb[4].mxu1 }
 0x123   : > { %v556_v55 = vpop.f32.mrb[5].mxu0  ;;  %v588_v56 = vpop.f32.mrb[5].mxu1  ;;  %v667_v59 = vadd.f32 %v1115_v53, %v993_v33  ;;  %v675_v60 = vadd.f32 %v1123_v54, %v993_v33 }
 0x124   : > { %v1116_v57 = vpop.f32.mrb[6].mxu0  ;;  %v1124_v58 = vpop.f32.mrb[6].mxu1  ;;  %v665_v1 = vadd.f32 %v993_v33, %v556_v55  ;;  %v673_v2 = vadd.f32 %v993_v33, %v588_v56  ;;  %763 = sbr.rel (!%p1292_p6) target bundleno = 310 (0x136), region = 85 }
 0x125   : > { %v668_v61 = vadd.f32 %v1116_v57, %v993_v33  ;;  %v676_v62 = vadd.f32 %v1124_v58, %v993_v33  ;;  %v559_v63 = vpop.f32.mrb[7].mxu0  ;;  %v591_v0 = vpop.f32.mrb[7].mxu1 }
 0x126   : > { %v666_v3 = vadd.f32 %v993_v33, %v559_v63  ;;  %v674_v4 = vadd.f32 %v993_v33, %v591_v0 }
 0x127   : > { %v1048_v5 = vpack.c.bf16 %v668_v61, %v667_v59  ;;  %v1068_v6 = vpack.c.bf16 %v676_v62, %v675_v60 }
 0x128   : > { %v1043_v7 = vpack.c.bf16 %v666_v3, %v665_v1  ;;  %v1063_v8 = vpack.c.bf16 %v674_v4, %v673_v2  ;;  %v788_v11 = vld [vmem:[%s1369_s7 + $0x8] sm:$0xf] (%p1292_p6)  ;;  %v790_v12 = vld [vmem:[%s1369_s7 + $0xc] sm:$0xf] (%p1292_p6) }
 0x129   : > { %1072 = vst [vmem:[%s1369_s7 + $0x18] sm:$0xff] %v1048_v5   ;;  %1076 = vst [vmem:[%s1369_s7 + $0x38] sm:$0xff] %v1068_v6   ;;  %v784_v9 = vld [vmem:[%s1369_s7] sm:$0xf] (%p1292_p6)  ;;  %v786_v10 = vld [vmem:[%s1369_s7 + $0x4] sm:$0xf] (%p1292_p6) }
 0x12a   : > { %1071 = vst [vmem:[%s1369_s7 + $0x10] sm:$0xff] %v1043_v7   ;;  %1075 = vst [vmem:[%s1369_s7 + $0x30] sm:$0xff] %v1063_v8   ;;  %v800_v17 = vld [vmem:[%s1369_s7 + $0x20] sm:$0xf] (%p1292_p6)  ;;  %v802_v18 = vld [vmem:[%s1369_s7 + $0x24] sm:$0xf] (%p1292_p6) }
 0x12b   : > { %785 = vst [vmem:[%s768_s10] sm:$0xf] %v784_v9  ;;  %787 = vst [vmem:[%s768_s10 + $0xc] sm:$0xf] %v786_v10  ;;  %v804_v19 = vld [vmem:[%s1369_s7 + $0x28] sm:$0xf] }
 0x12c   : > { %789 = vst [vmem:[%s768_s10 + $0x18] sm:$0xf] %v788_v11  ;;  %791 = vst [vmem:[%s768_s10 + $0x24] sm:$0xf] %v790_v12  ;;  %v806_v20 = vld [vmem:[%s1369_s7 + $0x2c] sm:$0xf] }
 0x12d   : > { %801 = vst [vmem:[%s768_s10 + $0x60] sm:$0xf] %v800_v17  ;;  %803 = vst [vmem:[%s768_s10 + $0x6c] sm:$0xf] %v802_v18 }
 0x12e   : > { %805 = vst [vmem:[%s768_s10 + $0x78] sm:$0xf] %v804_v19  ;;  %807 = vst [vmem:[%s768_s10 + $0x84] sm:$0xf] %v806_v20 }
 0x130   : > { %v796_v15 = vld [vmem:[%s1369_s7 + $0x18] sm:$0xf]  ;;  %v798_v16 = vld [vmem:[%s1369_s7 + $0x1c] sm:$0xf] }
 0x131   : > { %v792_v13 = vld [vmem:[%s1369_s7 + $0x10] sm:$0xf]  ;;  %v794_v14 = vld [vmem:[%s1369_s7 + $0x14] sm:$0xf]  ;;  %797 = vst [vmem:[%s768_s10 + $0x48] sm:$0xf] %v796_v15 }
 0x132   : > { %793 = vst [vmem:[%s768_s10 + $0x30] sm:$0xf] %v792_v13  ;;  %795 = vst [vmem:[%s768_s10 + $0x3c] sm:$0xf] %v794_v14  ;;  %v808_v21 = vld [vmem:[%s1369_s7 + $0x30] sm:$0xf] }
 0x133   : > { %799 = vst [vmem:[%s768_s10 + $0x54] sm:$0xf] %v798_v16  ;;  %v810_v22 = vld [vmem:[%s1369_s7 + $0x34] sm:$0xf]  ;;  %809 = vst [vmem:[%s768_s10 + $0x90] sm:$0xf] %v808_v21 }
 0x134   : > { %811 = vst [vmem:[%s768_s10 + $0x9c] sm:$0xf] %v810_v22  ;;  %v812_v23 = vld [vmem:[%s1369_s7 + $0x38] sm:$0xf]  ;;  %v814_v24 = vld [vmem:[%s1369_s7 + $0x3c] sm:$0xf] }
 0x135   : > { %813 = vst [vmem:[%s768_s10 + $0xa8] sm:$0xf] %v812_v23  ;;  %815 = vst [vmem:[%s768_s10 + $0xb4] sm:$0xf] %v814_v24 }
 0x136 PF: > { %s13_s16 = sadd.s32 1, %s1235_s16   ;;  %s1421_s12 = smov %s1223_s13 }
 0x137   : > { %p10_p12 = scmp.ge.s32.totalorder %s13_s16, 5   ;;  %s1422_s13 = smov %s1297_s22 }
 0x138   : > { %s1423_s14 = smov %s1231_s15  ;;  %s1424_s15 = smov %s1426_s17 }
 0x139   :  { %12 = sbr.rel (!%p10_p12) target bundleno = 3 (0x3), region = 163 }

// kernel: hgnn_transformer_forward.15
= control target key start
LH: loop header
LB: loop body
LE: loop exit
PB: predicated region body
PF: predicated region fallthrough
CT: control target
= control target key end

     0   :  { %s551_s1 = inlined_call_operand.vmem [shape: bf16[128,128], index: 1, kind: input, shape index: {}]   ;;  %s552_s0 = inlined_call_operand.vmem [shape: bf16[128,128], index: 0, kind: input, shape index: {}]   ;;  %s553_s2 = inlined_call_operand.vmem [shape: f32[128,128], index: 2, kind: output, shape index: {}]  }
   0x1   :  { %v424_v0 = vld [vmem:[%s551_s1] sm:$0xff]   ;;  %v425_v1 = vld [vmem:[%s551_s1 + $0x8] sm:$0xff]   ;;  %v426_v2 = vld [vmem:[%s551_s1 + $0x10] sm:$0xff]  }
   0x2   :  { %376 = vmatprep.subr.bf16.mxu0 %v424_v0  ;;  %408 = vmatprep.subr.bf16.mxu1 %v424_v0  ;;  %v427_v3 = vld [vmem:[%s551_s1 + $0x18] sm:$0xff]   ;;  %v432_v4 = vld [vmem:[%s552_s0] sm:$0xff]   ;;  %v429_v7 = vld [vmem:[%s551_s1 + $0x28] sm:$0xff]  }
   0x3   :  { %377 = vmatpush3.bf16.msra.mxu0 %v424_v0  ;;  %416 = vmatpush3.bf16.msra.mxu1 %v424_v0  ;;  %v433_v5 = vld [vmem:[%s552_s0 + $0x20] sm:$0xff]   ;;  %v430_v8 = vld [vmem:[%s551_s1 + $0x30] sm:$0xff]   ;;  %v431_v9 = vld [vmem:[%s551_s1 + $0x38] sm:$0xff]  }
   0x4   :  { %378 = vmatprep.subr.bf16.mxu0 %v425_v1  ;;  %409 = vmatprep.subr.bf16.mxu1 %v425_v1  ;;  %v428_v6 = vld [vmem:[%s551_s1 + $0x20] sm:$0xff]   ;;  %v434_v10 = vld [vmem:[%s552_s0 + $0x8] sm:$0xff]   ;;  %v436_v12 = vld [vmem:[%s552_s0 + $0x10] sm:$0xff]  }
   0x5   :  { %392 = vmatprep.mubr.bf16.mxu0 %v432_v4  ;;  %400 = vmatprep.mubr.bf16.mxu1 %v433_v5  ;;  %v435_v11 = vld [vmem:[%s552_s0 + $0x28] sm:$0xff]   ;;  %v437_v13 = vld [vmem:[%s552_s0 + $0x30] sm:$0xff]   ;;  %v438_v14 = vld [vmem:[%s552_s0 + $0x18] sm:$0xff]  }
   0x6   :  { %v439_v15 = vld [vmem:[%s552_s0 + $0x38] sm:$0xff]  }
   0x7   :  { %379 = vmatpush3.bf16.msra.mxu0 %v425_v1  ;;  %417 = vmatpush3.bf16.msra.mxu1 %v425_v1 }
   0x8   :  { %380 = vmatprep.subr.bf16.mxu0 %v426_v2  ;;  %410 = vmatprep.subr.bf16.mxu1 %v426_v2 }
   0xb   :  { %381 = vmatpush3.bf16.msra.mxu0 %v426_v2  ;;  %418 = vmatpush3.bf16.msra.mxu1 %v426_v2 }
   0xc   :  { %382 = vmatprep.subr.bf16.mxu0 %v427_v3  ;;  %411 = vmatprep.subr.bf16.mxu1 %v427_v3 }
   0xf   :  { %383 = vmatpush3.bf16.msra.mxu0 %v427_v3  ;;  %419 = vmatpush3.bf16.msra.mxu1 %v427_v3 }
  0x10   :  { %384 = vmatprep.subr.bf16.mxu0 %v428_v6  ;;  %412 = vmatprep.subr.bf16.mxu1 %v428_v6 }
  0x13   :  { %385 = vmatpush3.bf16.msra.mxu0 %v428_v6  ;;  %420 = vmatpush3.bf16.msra.mxu1 %v428_v6 }
  0x14   :  { %386 = vmatprep.subr.bf16.mxu0 %v429_v7  ;;  %413 = vmatprep.subr.bf16.mxu1 %v429_v7 }
  0x17   :  { %387 = vmatpush3.bf16.msra.mxu0 %v429_v7  ;;  %421 = vmatpush3.bf16.msra.mxu1 %v429_v7 }
  0x18   :  { %388 = vmatprep.subr.bf16.mxu0 %v430_v8  ;;  %414 = vmatprep.subr.bf16.mxu1 %v430_v8 }
  0x1b   :  { %389 = vmatpush3.bf16.msra.mxu0 %v430_v8  ;;  %422 = vmatpush3.bf16.msra.mxu1 %v430_v8 }
  0x1c   :  { %390 = vmatprep.subr.bf16.mxu0 %v431_v9  ;;  %415 = vmatprep.subr.bf16.mxu1 %v431_v9 }
  0x1f   :  { %391 = vmatpush3.bf16.msra.mxu0 %v431_v9  ;;  %423 = vmatpush3.bf16.msra.mxu1 %v431_v9 }
  0x22   :  { %393 = vmatmul.mubr.bf16.vlgmr.msra.gmra.mrb[0].mxu0 %v434_v10  ;;  %401 = vmatmul.mubr.bf16.vlgmr.msra.gmra.mrb[0].mxu1 %v435_v11 }
  0x23   :  { %396 = vmatprep.mubr.bf16.mxu0 %v436_v12  ;;  %404 = vmatprep.mubr.bf16.mxu1 %v437_v13 }
  0x2a   :  { %397 = vmatmul.mubr.bf16.gmra.mrb[4].mxu0 %v438_v14  ;;  %405 = vmatmul.mubr.bf16.gmra.mrb[4].mxu1 %v439_v15 }
  0xf5   :  { %v394_v16 = vpop.f32.mrb[0].mxu0  ;;  %v402_v17 = vpop.f32.mrb[0].mxu1 }
  0xf6   :  { %326 = vst [vmem:[%s553_s2 + $0x10] sm:$0xff] %v394_v16  ;;  %334 = vst [vmem:[%s553_s2 + $0x50] sm:$0xff] %v402_v17  ;;  %v210_v18 = vpop.f32.mrb[1].mxu0  ;;  %v242_v19 = vpop.f32.mrb[1].mxu1 }
  0xf7   :  { %324 = vst [vmem:[%s553_s2] sm:$0xff] %v210_v18  ;;  %332 = vst [vmem:[%s553_s2 + $0x40] sm:$0xff] %v242_v19  ;;  %v395_v20 = vpop.f32.mrb[2].mxu0  ;;  %v403_v21 = vpop.f32.mrb[2].mxu1 }
  0xf8   :  { %327 = vst [vmem:[%s553_s2 + $0x18] sm:$0xff] %v395_v20  ;;  %335 = vst [vmem:[%s553_s2 + $0x58] sm:$0xff] %v403_v21  ;;  %v213_v22 = vpop.f32.mrb[3].mxu0  ;;  %v245_v23 = vpop.f32.mrb[3].mxu1 }
  0xf9   :  { %325 = vst [vmem:[%s553_s2 + $0x8] sm:$0xff] %v213_v22  ;;  %333 = vst [vmem:[%s553_s2 + $0x48] sm:$0xff] %v245_v23 }
  0xfd   :  { %v398_v24 = vpop.f32.mrb[4].mxu0  ;;  %v406_v25 = vpop.f32.mrb[4].mxu1 }
  0xfe   :  { %330 = vst [vmem:[%s553_s2 + $0x30] sm:$0xff] %v398_v24  ;;  %338 = vst [vmem:[%s553_s2 + $0x70] sm:$0xff] %v406_v25  ;;  %v226_v26 = vpop.f32.mrb[5].mxu0  ;;  %v258_v27 = vpop.f32.mrb[5].mxu1 }
  0xff   :  { %328 = vst [vmem:[%s553_s2 + $0x20] sm:$0xff] %v226_v26  ;;  %336 = vst [vmem:[%s553_s2 + $0x60] sm:$0xff] %v258_v27  ;;  %v399_v28 = vpop.f32.mrb[6].mxu0  ;;  %v407_v29 = vpop.f32.mrb[6].mxu1 }
 0x100   :  { %331 = vst [vmem:[%s553_s2 + $0x38] sm:$0xff] %v399_v28  ;;  %339 = vst [vmem:[%s553_s2 + $0x78] sm:$0xff] %v407_v29  ;;  %v229_v30 = vpop.f32.mrb[7].mxu0  ;;  %v261_v31 = vpop.f32.mrb[7].mxu1 }
 0x101   :  { %329 = vst [vmem:[%s553_s2 + $0x28] sm:$0xff] %v229_v30  ;;  %337 = vst [vmem:[%s553_s2 + $0x68] sm:$0xff] %v261_v31 }

// kernel: hgnn_transformer_forward.12
= control target key start
LH: loop header
LB: loop body
LE: loop exit
PB: predicated region body
PF: predicated region fallthrough
CT: control target
= control target key end

     0   :  { %s3336_s21 = smov 0   ;;  %s3338_s22 = smov 0   ;;  %s4208_s0 = inlined_call_operand.vmem [shape: bf16[128,128], index: 0, kind: input, shape index: {}]   ;;  %s4209_s1 = inlined_call_operand.vmem [shape: bf16[4,128,8], index: 1, kind: input, shape index: {}]   ;;  %s4210_s2 = inlined_call_operand.vmem [shape: bf16[4,128,8], index: 2, kind: input, shape index: {}]   ;;  %s4211_s3 = inlined_call_operand.vmem [shape: bf16[4,128,8], index: 3, kind: input, shape index: {}]   ;;  %s4212_s4 = inlined_call_operand.vmem [shape: bf16[4,8,128], index: 4, kind: input, shape index: {}]   ;;  %s4213_s5 = inlined_call_operand.vmem [shape: f32[1,128], index: 5, kind: input, shape index: {}]   ;;  %s4214_s6 = inlined_call_operand.vmem [shape: f32[1,128], index: 6, kind: input, shape index: {}]   ;;  %s4215_s7 = inlined_call_operand.vmem [shape: f32[1,128], index: 7, kind: input, shape index: {}]   ;;  %s4216_s8 = inlined_call_operand.vmem [shape: f32[1,128], index: 8, kind: input, shape index: {}]   ;;  %s4217_s9 = inlined_call_operand.vmem [shape: f32[1,128], index: 9, kind: input, shape index: {}]   ;;  %s4218_s10 = inlined_call_operand.vmem [shape: bf16[128,128], index: 10, kind: input, shape index: {}]   ;;  %s4219_s11 = inlined_call_operand.vmem [shape: f32[1,128], index: 11, kind: input, shape index: {}]   ;;  %s4220_s12 = inlined_call_operand.vmem [shape: bf16[128,128], index: 12, kind: input, shape index: {}]   ;;  %s4221_s13 = inlined_call_operand.vmem [shape: f32[1,128], index: 13, kind: input, shape index: {}]   ;;  %s4222_s14 = inlined_call_operand.vmem [shape: f32[1,128], index: 14, kind: input, shape index: {}]   ;;  %s4223_s15 = inlined_call_operand.vmem [shape: f32[1,128], index: 15, kind: input, shape index: {}]   ;;  %s4224_s16 = inlined_call_operand.vmem [shape: bf16[128,128], index: 16, kind: output, shape index: {}]  }
   0x1   :  { %4229 = sst [smem:[#allocation6_spill]] %s4208_s0  ;;  %s3340_s23 = smov 0  }
   0x2   :  { %4230 = sst [smem:[#allocation7_spill]] %s4224_s16 }
   0x3 LB: > { %4231 = sst [smem:[#allocation3_spill]] %s3244_s22  ;;  %s35_s24 = sadd.s32 1, %s3244_s22  ;;  %s3248_s23 = sphi %s3340_s23, %s26_s23   ;;  %s3244_s22 = sphi %s3338_s22, %s4238_s22   ;;  %s3240_s21 = sphi %s3336_s21, %s4237_s21  }
   0x4   : > { %4232 = sst [smem:[#allocation4_spill]] %s3248_s23  ;;  %p2604_p0 = scmp.ge.s32.totalorder %s3248_s23, 1 }
   0x5   : > { %p36_p1 = scmp.ge.s32.totalorder %s35_s24, 4  ;;  %p521_p2 = scmp.lt.s32.totalorder %s3248_s23, 5 }
   0x7   : > { %s4240_s24 = smov (%p36_p1, %s35_s24), 0  ;;  %p522_p3 = pnand %p2604_p0, %p521_p2 }
   0x8   : > { %4233 = sst [smem:[#allocation5_spill]] %s4240_s24  ;;  %p601_p4 = scmp.lt.s32.totalorder (!%p522_p3), %s3240_s21, 3 }
   0x9   : > { %525 = sbr.rel (%p522_p3) target bundleno = 2186 (0x88a), region = 84  ;;  %p2612_p5 = scmp.ne.s32.totalorder (!%p522_p3), %s3240_s21, 0 }
  0x10   : > { %s602_s25 = scalar_select %p601_p4, %s3240_s21, 3 }
  0x11   : > { %634 = sbr.rel (%p2612_p5) target bundleno = 26 (0x1a), region = 88  ;;  %v3250_v0 = vmov (!%p2612_p5), 0.0  }
  0x12   : > { %s2699_s26 = sshll.u32 %s602_s25, 6  ;;  %s2611_s27 = sshll.u32 %s602_s25, 2  ;;  %635 = vst [vmem:[#allocation2] sm:$0xff] (!%p2612_p5), %v3250_v0  ;;  %636 = vst [vmem:[#allocation2 + $0x8] sm:$0xff] (!%p2612_p5), %v3250_v0 }
  0x13   : > { %s3361_s30 = scalar_lea.vmem %s4209_s1, %s2699_s26  ;;  %s3366_s18 = scalar_lea.vmem %s4210_s2, %s2699_s26  ;;  %637 = vst [vmem:[#allocation2 + $0x10] sm:$0xff] (!%p2612_p5), %v3250_v0  ;;  %638 = vst [vmem:[#allocation2 + $0x18] sm:$0xff] (!%p2612_p5), %v3250_v0 }
  0x14   : > { %s3371_s24 = scalar_lea.vmem %s4211_s3, %s2699_s26  ;;  %s3376_s16 = scalar_lea.vmem %s4212_s4, %s2611_s27  ;;  %639 = vst [vmem:[#allocation2 + $0x20] sm:$0xff] (!%p2612_p5), %v3250_v0  ;;  %640 = vst [vmem:[#allocation2 + $0x28] sm:$0xff] (!%p2612_p5), %v3250_v0 }
  0x15   : > { %641 = vst [vmem:[#allocation2 + $0x30] sm:$0xff] (!%p2612_p5), %v3250_v0  ;;  %642 = vst [vmem:[#allocation2 + $0x38] sm:$0xff] (!%p2612_p5), %v3250_v0 }
  0x16   : > { %643 = vst [vmem:[#allocation2 + $0x40] sm:$0xff] (!%p2612_p5), %v3250_v0  ;;  %644 = vst [vmem:[#allocation2 + $0x48] sm:$0xff] (!%p2612_p5), %v3250_v0 }
  0x17   : > { %645 = vst [vmem:[#allocation2 + $0x50] sm:$0xff] (!%p2612_p5), %v3250_v0  ;;  %646 = vst [vmem:[#allocation2 + $0x58] sm:$0xff] (!%p2612_p5), %v3250_v0 }
  0x18   : > { %647 = vst [vmem:[#allocation2 + $0x60] sm:$0xff] %v3250_v0  ;;  %648 = vst [vmem:[#allocation2 + $0x68] sm:$0xff] %v3250_v0 }
  0x19   : > { %649 = vst [vmem:[#allocation2 + $0x70] sm:$0xff] %v3250_v0  ;;  %650 = vst [vmem:[#allocation2 + $0x78] sm:$0xff] %v3250_v0 }
  0x1a PF: > { %v3057_v1 = vld [vmem:[%s3366_s18] sm:$0xff]   ;;  %vm786_vm0 = vcmask 64512   ;;  %v3058_v2 = vld [vmem:[%s3366_s18 + $0x8] sm:$0xff]   ;;  %v3059_v4 = vld [vmem:[%s3366_s18 + $0x10] sm:$0xff]   ;;  %vm1278_vm1 = vcmask 1043456   ;;  %p2654_p6 = scmp.ne.s32.totalorder %s3240_s21, 3 }
  0x1b   : > { %3023 = vmatprep.subr.msk.bf16.mxu0 %vm786_vm0, %v3057_v1  ;;  %v812_v3 = vsel %vm786_vm0, %v3057_v1, 0  ;;  %v815_v5 = vsel %vm786_vm0, %v3058_v2, 0  ;;  %v3065_v6 = vld [vmem:[%s3361_s30] sm:$0xff]   ;;  %v818_v7 = vsel %vm786_vm0, %v3059_v4, 0  ;;  %v3060_v8 = vld [vmem:[%s3366_s18 + $0x18] sm:$0xff]   ;;  %v3062_v12 = vld [vmem:[%s3366_s18 + $0x28] sm:$0xff]  }
  0x1c   : > { %2878 = vmatpush3.bf16.xpose.msra.mxu0 %v812_v3  ;;  %2893 = vmatprep.mubr.msk.bf16.mxu0 %vm786_vm0, %v3065_v6  ;;  %v821_v9 = vsel %vm786_vm0, %v3060_v8, 0  ;;  %v3061_v10 = vld [vmem:[%s3366_s18 + $0x20] sm:$0xff]   ;;  %v827_v13 = vsel %vm786_vm0, %v3062_v12, 0  ;;  %v3063_v14 = vld [vmem:[%s3366_s18 + $0x30] sm:$0xff]   ;;  %v3064_v16 = vld [vmem:[%s3366_s18 + $0x38] sm:$0xff]   ;;  %s4234_s25 = sld [smem:[#allocation6_spill]] (!%p2654_p6) }
  0x1d   : > { %3024 = vmatprep.subr.msk.bf16.mxu0 %vm786_vm0, %v3058_v2  ;;  %v824_v11 = vsel %vm786_vm0, %v3061_v10, 0  ;;  %v830_v15 = vsel %vm786_vm0, %v3063_v14, 0  ;;  %v833_v17 = vsel %vm786_vm0, %v3064_v16, 0  ;;  %v3066_v18 = vld [vmem:[%s3361_s30 + $0x8] sm:$0xff]   ;;  %v3067_v19 = vld [vmem:[%s3361_s30 + $0x10] sm:$0xff]   ;;  %v3068_v20 = vld [vmem:[%s3361_s30 + $0x18] sm:$0xff]  }
  0x1e   : > { %v3069_v21 = vld [vmem:[%s3361_s30 + $0x20] sm:$0xff]   ;;  %v3070_v22 = vld [vmem:[%s3361_s30 + $0x28] sm:$0xff]   ;;  %v3071_v23 = vld [vmem:[%s3361_s30 + $0x30] sm:$0xff]   ;;  %s4235_s0 = sld [smem:[#allocation7_spill]] (!%p2654_p6) }
  0x1f   : > { %v3072_v24 = vld [vmem:[%s3361_s30 + $0x38] sm:$0xff]   ;;  %v2613_v25 = vld [vmem:[%s4214_s6] ss:$0 sm:$0xff]  ;;  %v3074_v59 = vld [vmem:[%s3371_s24 + $0x8] sm:$0xff]  }
  0x20   : > { %v3073_v58 = vld [vmem:[%s3371_s24] sm:$0xff]   ;;  %v3075_v60 = vld [vmem:[%s3371_s24 + $0x10] sm:$0xff]  }
  0x21   : > { %2909 = vmatprep.subr.bf16.mxu1 %v3073_v58 }
  0x22   : > { %2910 = vmatpush3.bf16.msra.mxu1 %v3073_v58  ;;  %v3077_v58 = vld [vmem:[%s3371_s24 + $0x20] sm:$0xff]  }
  0x23   : > { %2911 = vmatprep.subr.bf16.mxu1 %v3074_v59 }
  0x24   : > { %2880 = vmatpush3.bf16.xpose.msra.mxu0 %v815_v5 }
  0x25   : > { %3025 = vmatprep.subr.msk.bf16.mxu0 %vm786_vm0, %v3059_v4 }
  0x26   : > { %2912 = vmatpush3.bf16.msra.mxu1 %v3074_v59 }
  0x27   : > { %2913 = vmatprep.subr.bf16.mxu1 %v3075_v60 }
  0x2a   : > { %2914 = vmatpush3.bf16.msra.mxu1 %v3075_v60  ;;  %v3078_v60 = vld [vmem:[%s3371_s24 + $0x28] sm:$0xff]  }
  0x2c   : > { %2882 = vmatpush3.bf16.xpose.msra.mxu0 %v818_v7 }
  0x2d   : > { %3026 = vmatprep.subr.msk.bf16.mxu0 %vm786_vm0, %v3060_v8 }
  0x34   : > { %2884 = vmatpush3.bf16.xpose.msra.mxu0 %v821_v9 }
  0x35   : > { %3027 = vmatprep.subr.msk.bf16.mxu0 %vm786_vm0, %v3061_v10 }
  0x3c   : > { %2886 = vmatpush3.bf16.xpose.msra.mxu0 %v824_v11 }
  0x3d   : > { %3028 = vmatprep.subr.msk.bf16.mxu0 %vm786_vm0, %v3062_v12 }
  0x44   : > { %2888 = vmatpush3.bf16.xpose.msra.mxu0 %v827_v13 }
  0x45   : > { %3029 = vmatprep.subr.msk.bf16.mxu0 %vm786_vm0, %v3063_v14 }
  0x4c   : > { %2890 = vmatpush3.bf16.xpose.msra.mxu0 %v830_v15 }
  0x4d   : > { %3030 = vmatprep.subr.msk.bf16.mxu0 %vm786_vm0, %v3064_v16 }
  0x54   : > { %2892 = vmatpush3.bf16.xpose.msra.mxu0 %v833_v17 }
  0x5b   : > { %2894 = vmatmul.mubr.msk.bf16.vlgmr.msra.gmra.mrb[0].mxu0 %vm786_vm0, %v3066_v18 }
  0x5c   : > { %2897 = vmatprep.mubr.msk.bf16.mxu0 %vm786_vm0, %v3067_v19 }
  0x63   : > { %2898 = vmatmul.mubr.msk.bf16.gmra.mrb[4].mxu0 %vm786_vm0, %v3068_v20 }
  0x64   : > { %2901 = vmatprep.mubr.msk.bf16.mxu0 %vm786_vm0, %v3069_v21 }
  0x6b   : > { %2902 = vmatmul.mubr.msk.bf16.gmra.mrb[8].mxu0 %vm786_vm0, %v3070_v22 }
  0x6c   : > { %2905 = vmatprep.mubr.msk.bf16.mxu0 %vm786_vm0, %v3071_v23 }
  0x73   : > { %2906 = vmatmul.mubr.msk.bf16.gmra.mrb[12].mxu0 %vm786_vm0, %v3072_v24 }
 0x12e   : > { %v2895_v26 = vpop.f32.mrb[0].mxu0 }
 0x12f   : > { %v878_v27 = vadd.f32 %v2895_v26, %v2613_v25  ;;  %v869_v28 = vpop.f32.mrb[1].mxu0 }
 0x130   : > { %v870_v29 = vadd.f32 %v2613_v25, %v869_v28  ;;  %v2896_v30 = vpop.f32.mrb[2].mxu0 }
 0x131   : > { %936 = vmax.xlane.f32.xlu1 %v878_v27  ;;  %v872_v31 = vpop.f32.mrb[3].mxu0  ;;  %v881_v32 = vadd.f32 %v2896_v30, %v2613_v25 }
 0x132   : > { %932 = vmax.xlane.f32.xlu0 %v870_v29  ;;  %v873_v33 = vadd.f32 %v2613_v25, %v872_v31 }
 0x135   : > { %938 = vmax.xlane.f32.xlu1 %v881_v32 }
 0x136   : > { %v2899_v34 = vpop.f32.mrb[4].mxu0  ;;  %934 = vmax.xlane.f32.xlu0 %v873_v33 }
 0x137   : > { %v885_v35 = vpop.f32.mrb[5].mxu0  ;;  %v3424_v40 = vadd.f32 %v2899_v34, %v2613_v25 }
 0x138   : > { %v886_v36 = vadd.f32 %v2613_v25, %v885_v35  ;;  %v2900_v37 = vpop.f32.mrb[6].mxu0 }
 0x139   : > { %v888_v38 = vpop.f32.mrb[7].mxu0  ;;  %v3427_v41 = vadd.f32 %v2900_v37, %v2613_v25 }
 0x13a   : > { %v3422_v39 = vadd.f32 %v2613_v25, %v888_v38  ;;  %940 = vmax.xlane.f32.xlu0 %v886_v36 }
 0x13c   : > { %942 = vmax.xlane.f32.xlu1 %v3422_v39 }
 0x13e   : > { %v2903_v42 = vpop.f32.mrb[8].mxu0  ;;  %944 = vmax.xlane.f32.xlu0 %v3424_v40 }
 0x13f   : > { %v901_v43 = vpop.f32.mrb[9].mxu0  ;;  %v3436_v48 = vadd.f32 %v2903_v42, %v2613_v25 }
 0x140   : > { %v3430_v44 = vadd.f32 %v2613_v25, %v901_v43  ;;  %v2904_v45 = vpop.f32.mrb[10].mxu0  ;;  %946 = vmax.xlane.f32.xlu1 %v3427_v41 }
 0x141   : > { %v904_v46 = vpop.f32.mrb[11].mxu0  ;;  %v3439_v49 = vadd.f32 %v2904_v45, %v2613_v25 }
 0x142   : > { %v3433_v47 = vadd.f32 %v2613_v25, %v904_v46  ;;  %948 = vmax.xlane.f32.xlu0 %v3430_v44 }
 0x144   : > { %950 = vmax.xlane.f32.xlu1 %v3433_v47 }
 0x146   : > { %v2907_v50 = vpop.f32.mrb[12].mxu0  ;;  %952 = vmax.xlane.f32.xlu0 %v3436_v48 }
 0x147   : > { %v917_v51 = vpop.f32.mrb[13].mxu0  ;;  %v3448_v56 = vadd.f32 %v2907_v50, %v2613_v25  ;;  %v3076_v50 = vld [vmem:[%s3371_s24 + $0x18] sm:$0xff]  }
 0x148   : > { %v3442_v52 = vadd.f32 %v2613_v25, %v917_v51  ;;  %v2908_v53 = vpop.f32.mrb[14].mxu0  ;;  %954 = vmax.xlane.f32.xlu1 %v3439_v49  ;;  %2915 = vmatprep.subr.bf16.mxu1 %v3076_v50 }
 0x149   : > { %v920_v54 = vpop.f32.mrb[15].mxu0  ;;  %v3451_v57 = vadd.f32 %v2908_v53, %v2613_v25  ;;  %2916 = vmatpush3.bf16.msra.mxu1 %v3076_v50 }
 0x14a   : > { %v3445_v55 = vadd.f32 %v2613_v25, %v920_v54  ;;  %956 = vmax.xlane.f32.xlu0 %v3442_v52  ;;  %2917 = vmatprep.subr.bf16.mxu1 %v3077_v58 }
 0x14c   : > { %958 = vmax.xlane.f32.xlu1 %v3445_v55 }
 0x14d   : > { %2918 = vmatpush3.bf16.msra.mxu1 %v3077_v58 }
 0x14e   : > { %960 = vmax.xlane.f32.xlu0 %v3448_v56  ;;  %2919 = vmatprep.subr.bf16.mxu1 %v3078_v60 }
 0x150   : > { %962 = vmax.xlane.f32.xlu1 %v3451_v57 }
 0x151   : > { %2920 = vmatpush3.bf16.msra.mxu1 %v3078_v60 }
 0x1be   : > { %v937_v61 = vpop.xlane.xlu1 %936 }
 0x1bf   : > { %v966_v62 = vsub.f32 %v878_v27, %v937_v61  ;;  %v933_v63 = vpop.xlane.xlu0 %932 }
 0x1c0   : > { %v964_v0 = vsub.f32 %v870_v29, %v933_v63  ;;  %v3079_v63 = vld [vmem:[%s3371_s24 + $0x30] sm:$0xff]  }
 0x1c1   : > { %v984_v3 = vmul.f32 1.442695, %v966_v62  ;;  %2921 = vmatprep.subr.bf16.mxu1 %v3079_v63 }
 0x1c2   : > { %v980_v1 = vmul.f32 1.442695, %v964_v0  ;;  %v939_v2 = vpop.xlane.xlu1 %938  ;;  %2922 = vmatpush3.bf16.msra.mxu1 %v3079_v63 }
 0x1c3   : > { %v967_v4 = vsub.f32 %v881_v32, %v939_v2  ;;  %v935_v5 = vpop.xlane.xlu0 %934  ;;  %v1253_v2 = vld [vmem:[%s3376_s16] sm:$0xf] }
 0x1c4   : > { %3081 = vpow2.f32 %v980_v1  ;;  %v965_v6 = vsub.f32 %v873_v33, %v935_v5  ;;  %v3080_v1 = vld [vmem:[%s3371_s24 + $0x38] sm:$0xff]  }
 0x1c5   : > { %3083 = vpow2.f32 %v984_v3  ;;  %v986_v8 = vmul.f32 1.442695, %v967_v4  ;;  %2923 = vmatprep.subr.bf16.mxu1 %v3080_v1  ;;  %v1280_v3 = vsel %vm1278_vm1, %v1253_v2, 0 }
 0x1c6   : > { %v982_v7 = vmul.f32 1.442695, %v965_v6  ;;  %2924 = vmatpush3.bf16.msra.mxu1 %v3080_v1 }
 0x1c7   : > { %v941_v9 = vpop.xlane.xlu0 %940  ;;  %3031 = vmatprep.subr.msk.bf16.mxu1 %vm1278_vm1, %v1253_v2 }
 0x1c8   : > { %3085 = vpow2.f32 %v982_v7  ;;  %v968_v10 = vsub.f32 %v886_v36, %v941_v9 }
 0x1c9   : > { %v943_v11 = vpop.xlane.xlu1 %942  ;;  %3087 = vpow2.f32 %v986_v8 }
 0x1ca   : > { %v988_v12 = vmul.f32 1.442695, %v968_v10  ;;  %v969_v13 = vsub.f32 %v3422_v39, %v943_v11 }
 0x1cb   : > { %v945_v14 = vpop.xlane.xlu0 %944 }
 0x1cc   : > { %3089 = vpow2.f32 %v988_v12  ;;  %v990_v15 = vmul.f32 1.442695, %v969_v13  ;;  %v970_v16 = vsub.f32 %v3424_v40, %v945_v14 }
 0x1cd   : > { %v947_v17 = vpop.xlane.xlu1 %946 }
 0x1ce   : > { %v3460_v18 = vpop.eup %3081  ;;  %v992_v19 = vmul.f32 1.442695, %v970_v16  ;;  %v971_v20 = vsub.f32 %v3427_v41, %v947_v17  ;;  %3091 = vpow2.f32 %v990_v15 }
 0x1cf   : > { %1012 = vadd.xlane.f32.xlu0 %v3460_v18  ;;  %v949_v21 = vpop.xlane.xlu0 %948  ;;  %v3465_v24 = vpop.eup %3083 }
 0x1d0   : > { %3093 = vpow2.f32 %v992_v19  ;;  %v994_v22 = vmul.f32 1.442695, %v971_v20  ;;  %v972_v23 = vsub.f32 %v3430_v44, %v949_v21 }
 0x1d1   : > { %v951_v25 = vpop.xlane.xlu1 %950 }
 0x1d2   : > { %v3467_v26 = vpop.eup %3085  ;;  %v996_v27 = vmul.f32 1.442695, %v972_v23  ;;  %v973_v28 = vsub.f32 %v3433_v47, %v951_v25  ;;  %3095 = vpow2.f32 %v994_v22 }
 0x1d3   : > { %1016 = vadd.xlane.f32.xlu0 %v3465_v24  ;;  %1014 = vadd.xlane.f32.xlu1 %v3467_v26  ;;  %v953_v29 = vpop.xlane.xlu0 %952  ;;  %v3473_v32 = vpop.eup %3087 }
 0x1d4   : > { %3097 = vpow2.f32 %v996_v27  ;;  %v998_v30 = vmul.f32 1.442695, %v973_v28  ;;  %v974_v31 = vsub.f32 %v3436_v48, %v953_v29 }
 0x1d5   : > { %v955_v33 = vpop.xlane.xlu1 %954 }
 0x1d6   : > { %v3475_v34 = vpop.eup %3089  ;;  %v1000_v35 = vmul.f32 1.442695, %v974_v31  ;;  %v975_v36 = vsub.f32 %v3439_v49, %v955_v33  ;;  %3099 = vpow2.f32 %v998_v30 }
 0x1d7   : > { %1018 = vadd.xlane.f32.xlu1 %v3473_v32  ;;  %1020 = vadd.xlane.f32.xlu0 %v3475_v34  ;;  %v957_v37 = vpop.xlane.xlu0 %956 }
 0x1d8   : > { %3101 = vpow2.f32 %v1000_v35  ;;  %v1002_v38 = vmul.f32 1.442695, %v975_v36  ;;  %v976_v39 = vsub.f32 %v3442_v52, %v957_v37  ;;  %v3481_v40 = vpop.eup %3091 }
 0x1d9   : > { %v959_v41 = vpop.xlane.xlu1 %958 }
 0x1da   : > { %v3483_v42 = vpop.eup %3093  ;;  %v1004_v43 = vmul.f32 1.442695, %v976_v39  ;;  %v977_v44 = vsub.f32 %v3445_v55, %v959_v41  ;;  %3103 = vpow2.f32 %v1002_v38 }
 0x1db   : > { %1022 = vadd.xlane.f32.xlu1 %v3481_v40  ;;  %1024 = vadd.xlane.f32.xlu0 %v3483_v42  ;;  %v961_v45 = vpop.xlane.xlu0 %960 }
 0x1dc   : > { %3105 = vpow2.f32 %v1004_v43  ;;  %v1006_v46 = vmul.f32 1.442695, %v977_v44  ;;  %v978_v47 = vsub.f32 %v3448_v56, %v961_v45  ;;  %v3489_v48 = vpop.eup %3095 }
 0x1dd   : > { %v963_v49 = vpop.xlane.xlu1 %962 }
 0x1de   : > { %v3492_v51 = vpop.eup %3097  ;;  %v1008_v52 = vmul.f32 1.442695, %v978_v47  ;;  %v979_v53 = vsub.f32 %v3451_v57, %v963_v49  ;;  %3107 = vpow2.f32 %v1006_v46 }
 0x1df   : > { %1026 = vadd.xlane.f32.xlu1 %v3489_v48  ;;  %1028 = vadd.xlane.f32.xlu0 %v3492_v51 }
 0x1e0   : > { %3109 = vpow2.f32 %v1008_v52  ;;  %v1010_v54 = vmul.f32 1.442695, %v979_v53  ;;  %v3497_v55 = vpop.eup %3099 }
 0x1e2   : > { %v3499_v56 = vpop.eup %3101  ;;  %3111 = vpow2.f32 %v1010_v54 }
 0x1e3   : > { %1030 = vadd.xlane.f32.xlu1 %v3497_v55  ;;  %1032 = vadd.xlane.f32.xlu0 %v3499_v56 }
 0x1e4   : > { %v3504_v57 = vpop.eup %3103 }
 0x1e6   : > { %v3506_v59 = vpop.eup %3105 }
 0x1e7   : > { %1034 = vadd.xlane.f32.xlu1 %v3504_v57  ;;  %1036 = vadd.xlane.f32.xlu0 %v3506_v59 }
 0x1e8   : > { %v3511_v61 = vpop.eup %3107 }
 0x1ea   : > { %v3513_v62 = vpop.eup %3109 }
 0x1eb   : > { %1038 = vadd.xlane.f32.xlu1 %v3511_v61  ;;  %1040 = vadd.xlane.f32.xlu0 %v3513_v62 }
 0x1ec   : > { %v3518_v0 = vpop.eup %3111 }
 0x1ef   : > { %1042 = vadd.xlane.f32.xlu1 %v3518_v0 }
 0x25c   : > { %v1013_v4 = vpop.xlane.xlu0 %1012 }
 0x25d   : > { %3113 = vrcp.f32 %v1013_v4 }
 0x260   : > { %v1015_v5 = vpop.xlane.xlu1 %1014  ;;  %v1017_v6 = vpop.xlane.xlu0 %1016 }
 0x261   : > { %3115 = vrcp.f32 %v1015_v5 }
 0x262   : > { %3117 = vrcp.f32 %v1017_v6 }
 0x264   : > { %v1019_v7 = vpop.xlane.xlu1 %1018  ;;  %v1021_v8 = vpop.xlane.xlu0 %1020 }
 0x265   : > { %3119 = vrcp.f32 %v1019_v7 }
 0x266   : > { %3121 = vrcp.f32 %v1021_v8 }
 0x267   : > { %v3114_v11 = vpop.eup %3113 }
 0x268   : > { %v1023_v9 = vpop.xlane.xlu1 %1022  ;;  %v1025_v10 = vpop.xlane.xlu0 %1024  ;;  %v1060_v15 = vmul.f32 %v3114_v11, %v3460_v18 }
 0x269   : > { %3123 = vrcp.f32 %v1023_v9 }
 0x26a   : > { %3125 = vrcp.f32 %v1025_v10 }
 0x26b   : > { %v3116_v12 = vpop.eup %3115 }
 0x26c   : > { %v1027_v13 = vpop.xlane.xlu1 %1026  ;;  %v1029_v14 = vpop.xlane.xlu0 %1028  ;;  %v1061_v16 = vmul.f32 %v3116_v12, %v3467_v26 }
 0x26d   : > { %v3118_v17 = vpop.eup %3117  ;;  %3127 = vrcp.f32 %v1027_v13 }
 0x26e   : > { %v1076_v19 = vpack.c.bf16 %v1061_v16, %v1060_v15  ;;  %3129 = vrcp.f32 %v1029_v14  ;;  %v1062_v23 = vmul.f32 %v3118_v17, %v3465_v24 }
 0x26f   : > { %v3120_v20 = vpop.eup %3119 }
 0x270   : > { %v1031_v21 = vpop.xlane.xlu1 %1030  ;;  %2925 = vmatprep.mubr.bf16.mxu1 %v1076_v19  ;;  %v1033_v22 = vpop.xlane.xlu0 %1032  ;;  %v1063_v25 = vmul.f32 %v3120_v20, %v3473_v32 }
 0x271   : > { %v3122_v27 = vpop.eup %3121  ;;  %3131 = vrcp.f32 %v1031_v21  ;;  %v1231_v21 = vld [vmem:[#allocation2 + $0x10] sm:$0xff] }
 0x272   : > { %v1077_v28 = vpack.c.bf16 %v1063_v25, %v1062_v23  ;;  %3133 = vrcp.f32 %v1033_v22  ;;  %v1064_v30 = vmul.f32 %v3122_v27, %v3475_v34  ;;  %v1229_v22 = vld [vmem:[#allocation2] sm:$0xff]  ;;  %v1232_v25 = vld [vmem:[#allocation2 + $0x18] sm:$0xff] }
 0x273   : > { %v3124_v29 = vpop.eup %3123 }
 0x274   : > { %v1035_v18 = vpop.xlane.xlu1 %1034  ;;  %2926 = vmatmul.mubr.bf16.vlgmr.msra.gmra.mrb[0].mxu1 %v1077_v28  ;;  %v1037_v26 = vpop.xlane.xlu0 %1036  ;;  %v1065_v31 = vmul.f32 %v3124_v29, %v3481_v40  ;;  %v1230_v29 = vld [vmem:[#allocation2 + $0x8] sm:$0xff] }
 0x275   : > { %v3126_v33 = vpop.eup %3125  ;;  %3135 = vrcp.f32 %v1035_v18  ;;  %2942 = vmatpush3.bf16.msra.mxu1 %v1280_v3 }
 0x276   : > { %v1078_v35 = vpack.c.bf16 %v1065_v31, %v1064_v30  ;;  %3137 = vrcp.f32 %v1037_v26  ;;  %v1066_v37 = vmul.f32 %v3126_v33, %v3483_v42 }
 0x277   : > { %v3128_v36 = vpop.eup %3127 }
 0x278   : > { %v1039_v24 = vpop.xlane.xlu1 %1038  ;;  %2929 = vmatprep.mubr.bf16.mxu1 %v1078_v35  ;;  %v1041_v32 = vpop.xlane.xlu0 %1040  ;;  %v1067_v38 = vmul.f32 %v3128_v36, %v3489_v48  ;;  %v1235_v35 = vld [vmem:[#allocation2 + $0x30] sm:$0xff]  ;;  %v1233_v36 = vld [vmem:[#allocation2 + $0x20] sm:$0xff] }
 0x279   : > { %v3130_v39 = vpop.eup %3129  ;;  %3139 = vrcp.f32 %v1039_v24 }
 0x27a   : > { %v1079_v41 = vpack.c.bf16 %v1067_v38, %v1066_v37  ;;  %3141 = vrcp.f32 %v1041_v32  ;;  %v1068_v40 = vmul.f32 %v3130_v39, %v3492_v51  ;;  %v1236_v32 = vld [vmem:[#allocation2 + $0x38] sm:$0xff]  ;;  %v1234_v39 = vld [vmem:[#allocation2 + $0x28] sm:$0xff] }
 0x27b   : > { %v3132_v43 = vpop.eup %3131 }
 0x27c   : > { %v1043_v34 = vpop.xlane.xlu1 %1042  ;;  %2930 = vmatmul.mubr.bf16.gmra.mrb[4].mxu1 %v1079_v41  ;;  %v1069_v44 = vmul.f32 %v3132_v43, %v3497_v55  ;;  %v3134_v45 = vpop.eup %3133 }
 0x27d   : > { %3143 = vrcp.f32 %v1043_v34  ;;  %v1070_v42 = vmul.f32 %v3134_v45, %v3499_v56  ;;  %v1239_v45 = vld [vmem:[#allocation2 + $0x50] sm:$0xff] }
 0x27e   : > { %v1080_v46 = vpack.c.bf16 %v1069_v44, %v1068_v40 }
 0x27f   : > { %v3136_v47 = vpop.eup %3135 }
 0x280   : > { %2933 = vmatprep.mubr.bf16.mxu1 %v1080_v46  ;;  %v1071_v48 = vmul.f32 %v3136_v47, %v3504_v57  ;;  %v3138_v49 = vpop.eup %3137  ;;  %v1237_v46 = vld [vmem:[#allocation2 + $0x40] sm:$0xff] }
 0x281   : > { %v1072_v53 = vmul.f32 %v3138_v49, %v3506_v59 }
 0x282   : > { %v1081_v50 = vpack.c.bf16 %v1071_v48, %v1070_v42  ;;  %v1240_v42 = vld [vmem:[#allocation2 + $0x58] sm:$0xff] }
 0x283   : > { %v3140_v52 = vpop.eup %3139 }
 0x284   : > { %2934 = vmatmul.mubr.bf16.gmra.mrb[8].mxu1 %v1081_v50  ;;  %v1073_v54 = vmul.f32 %v3140_v52, %v3511_v61  ;;  %v3142_v51 = vpop.eup %3141  ;;  %v1238_v50 = vld [vmem:[#allocation2 + $0x48] sm:$0xff] }
 0x285   : > { %v1074_v60 = vmul.f32 %v3142_v51, %v3513_v62 }
 0x286   : > { %v1082_v58 = vpack.c.bf16 %v1073_v54, %v1072_v53 }
 0x287   : > { %v3144_v55 = vpop.eup %3143 }
 0x288   : > { %2937 = vmatprep.mubr.bf16.mxu1 %v1082_v58  ;;  %v1075_v63 = vmul.f32 %v3144_v55, %v3518_v0  ;;  %v1243_v55 = vld [vmem:[#allocation2 + $0x70] sm:$0xff] }
 0x28a   : > { %v1083_v1 = vpack.c.bf16 %v1075_v63, %v1074_v60  ;;  %v1241_v60 = vld [vmem:[#allocation2 + $0x60] sm:$0xff] }
 0x28c   : > { %2938 = vmatmul.mubr.bf16.gmra.mrb[12].mxu1 %v1083_v1  ;;  %v1244_v1 = vld [vmem:[#allocation2 + $0x78] sm:$0xff] }
 0x347   : > { %v2927_v56 = vpop.f32.mrb[0].mxu1 }
 0x348   : > { %v1166_v57 = vpop.f32.mrb[1].mxu1 }
 0x349   : > { %v2928_v2 = vpop.f32.mrb[2].mxu1 }
 0x34a   : > { %v1246_v3 = vpack.c.bf16 %v2928_v2, %v2927_v56  ;;  %v1169_v4 = vpop.f32.mrb[3].mxu1  ;;  %v1242_v2 = vld [vmem:[#allocation2 + $0x68] sm:$0xff] }
 0x34b   : > { %v1245_v5 = vpack.c.bf16 %v1169_v4, %v1166_v57 }
 0x34d   : > { %2943 = vmatprep.mubr.msk.bf16.mxu1 %vm786_vm0, %v1245_v5 }
 0x34e   : > { %2944 = vmatmul.mubr.msk.bf16.vlgmr.msra.gmra.mrb[16].mxu1 %vm786_vm0, %v1246_v3 }
 0x34f   : > { %v2931_v59 = vpop.f32.mrb[4].mxu1 }
 0x350   : > { %v1182_v61 = vpop.f32.mrb[5].mxu1 }
 0x351   : > { %v2932_v6 = vpop.f32.mrb[6].mxu1 }
 0x352   : > { %v1248_v7 = vpack.c.bf16 %v2932_v6, %v2931_v59  ;;  %v1185_v8 = vpop.f32.mrb[7].mxu1  ;;  %v2719_v6 = vld [vmem:[%s4234_s25] sm:$0xff] (!%p2654_p6)  }
 0x353   : > { %v1247_v62 = vpack.c.bf16 %v1185_v8, %v1182_v61  ;;  %v2720_v8 = vunpack.c.l.bf16 (!%p2654_p6), %v2719_v6 }
 0x355   : > { %2947 = vmatprep.mubr.msk.bf16.mxu1 %vm786_vm0, %v1247_v62  ;;  %v3554_v62 = vld [vmem:[%s4213_s5] ss:$0 sm:$0xff] (!%p2654_p6) }
 0x356   : > { %2948 = vmatmul.mubr.msk.bf16.gmra.mrb[20].mxu1 %vm786_vm0, %v1248_v7 }
 0x357   : > { %v2935_v0 = vpop.f32.mrb[8].mxu1 }
 0x358   : > { %v1198_v9 = vpop.f32.mrb[9].mxu1 }
 0x359   : > { %v2936_v10 = vpop.f32.mrb[10].mxu1 }
 0x35a   : > { %v1250_v11 = vpack.c.bf16 %v2936_v10, %v2935_v0  ;;  %v1201_v12 = vpop.f32.mrb[11].mxu1  ;;  %v2790_v0 = vld [vmem:[%s4234_s25 + $0x8] sm:$0xff] (!%p2654_p6)   ;;  %v2721_v10 = vunpack.c.h.bf16 (!%p2654_p6), %v2719_v6 }
 0x35b   : > { %v1249_v13 = vpack.c.bf16 %v1201_v12, %v1198_v9 }
 0x35d   : > { %2951 = vmatprep.mubr.msk.bf16.mxu1 %vm786_vm0, %v1249_v13  ;;  %v2725_v13 = vunpack.c.h.bf16 (!%p2654_p6), %v2790_v0 }
 0x35e   : > { %2952 = vmatmul.mubr.msk.bf16.gmra.mrb[24].mxu1 %vm786_vm0, %v1250_v11  ;;  %v2724_v11 = vunpack.c.l.bf16 (!%p2654_p6), %v2790_v0 }
 0x35f   : > { %v2939_v14 = vpop.f32.mrb[12].mxu1 }
 0x360   : > { %v1214_v15 = vpop.f32.mrb[13].mxu1 }
 0x361   : > { %v2940_v16 = vpop.f32.mrb[14].mxu1 }
 0x362   : > { %v1252_v17 = vpack.c.bf16 %v2940_v16, %v2939_v14  ;;  %v1217_v19 = vpop.f32.mrb[15].mxu1 }
 0x363   : > { %v1251_v20 = vpack.c.bf16 %v1217_v19, %v1214_v15  ;;  %v2791_v15 = vld [vmem:[%s4234_s25 + $0x10] sm:$0xff] (!%p2654_p6)  }
 0x364   : > { %v2728_v19 = vunpack.c.l.bf16 (!%p2654_p6), %v2791_v15 }
 0x365   : > { %2955 = vmatprep.mubr.msk.bf16.mxu1 %vm786_vm0, %v1251_v20 }
 0x366   : > { %2956 = vmatmul.mubr.msk.bf16.gmra.mrb[28].mxu1 %vm786_vm0, %v1252_v17 }
 0x421   : > { %v2945_v23 = vpop.f32.mrb[16].mxu1 }
 0x422   : > { %v1381_v27 = vadd.f32 %v2945_v23, %v1231_v21  ;;  %v1316_v28 = vpop.f32.mrb[17].mxu1  ;;  %v2729_v21 = vunpack.c.h.bf16 (!%p2654_p6), %v2791_v15  ;;  %v2792_v23 = vld [vmem:[%s4234_s25 + $0x18] sm:$0xff] (!%p2654_p6)  }
 0x423   : > { %v1379_v18 = vadd.f32 %v1316_v28, %v1229_v22  ;;  %v2946_v26 = vpop.f32.mrb[18].mxu1 }
 0x424   : > { %1397 = vst [vmem:[#allocation2 + $0x10] sm:$0xff] %v1381_v27  ;;  %v1382_v30 = vadd.f32 %v2946_v26, %v1232_v25  ;;  %v1319_v31 = vpop.f32.mrb[19].mxu1  ;;  %v3568_v25 = vld [vmem:[%s4215_s7] ss:$0 sm:$0xff] (!%p2654_p6) }
 0x425   : > { %1395 = vst [vmem:[#allocation2] sm:$0xff] %v1379_v18  ;;  %v1380_v33 = vadd.f32 %v1319_v31, %v1230_v29 }
 0x426   : > { %1398 = vst [vmem:[#allocation2 + $0x18] sm:$0xff] %v1382_v30  ;;  %v2732_v30 = vunpack.c.l.bf16 (!%p2654_p6), %v2792_v23 }
 0x427   : > { %1396 = vst [vmem:[#allocation2 + $0x8] sm:$0xff] %v1380_v33 }
 0x429   : > { %v2949_v24 = vpop.f32.mrb[20].mxu1 }
 0x42a   : > { %v1385_v37 = vadd.f32 %v2949_v24, %v1235_v35  ;;  %v1332_v38 = vpop.f32.mrb[21].mxu1  ;;  %v2733_v24 = vunpack.c.h.bf16 (!%p2654_p6), %v2792_v23 }
 0x42b   : > { %v1383_v41 = vadd.f32 %v1332_v38, %v1233_v36  ;;  %v2950_v43 = vpop.f32.mrb[22].mxu1  ;;  %v1450_v9 = vld [vmem:[#allocation2 + $0x10] sm:$0xff] (!%p2654_p6) }
 0x42c   : > { %1401 = vst [vmem:[#allocation2 + $0x30] sm:$0xff] %v1385_v37  ;;  %v1386_v34 = vadd.f32 %v2950_v43, %v1236_v32  ;;  %v1335_v40 = vpop.f32.mrb[23].mxu1  ;;  %v1448_v7 = vld [vmem:[#allocation2] sm:$0xff] (!%p2654_p6)  ;;  %v1466_v27 = vadd.f32 (!%p2654_p6), %v2724_v11, %v1450_v9  ;;  %v2794_v43 = vld [vmem:[%s4234_s25 + $0x28] sm:$0xff] (!%p2654_p6)  }
 0x42d   : > { %1399 = vst [vmem:[#allocation2 + $0x20] sm:$0xff] %v1383_v41  ;;  %v1384_v44 = vadd.f32 %v1335_v40, %v1234_v39  ;;  %v1451_v14 = vld [vmem:[#allocation2 + $0x18] sm:$0xff] (!%p2654_p6)  ;;  %v1464_v16 = vadd.f32 (!%p2654_p6), %v2720_v8, %v1448_v7  ;;  %v2793_v32 = vld [vmem:[%s4234_s25 + $0x20] sm:$0xff] (!%p2654_p6)  }
 0x42e   : > { %1402 = vst [vmem:[#allocation2 + $0x38] sm:$0xff] %v1386_v34  ;;  %v1449_v12 = vld [vmem:[#allocation2 + $0x8] sm:$0xff] (!%p2654_p6)  ;;  %v1467_v28 = vadd.f32 (!%p2654_p6), %v2725_v13, %v1451_v14  ;;  %v3577_v31 = vadd.f32 (!%p2654_p6), %v3554_v62, %v1466_v27 }
 0x42f   : > { %1400 = vst [vmem:[#allocation2 + $0x28] sm:$0xff] %v1384_v44  ;;  %v1465_v17 = vadd.f32 (!%p2654_p6), %v2721_v10, %v1449_v12  ;;  %v3571_v29 = vadd.f32 (!%p2654_p6), %v3554_v62, %v1464_v16 }
 0x430   : > { %v3580_v33 = vadd.f32 (!%p2654_p6), %v3554_v62, %v1467_v28  ;;  %v1511_v39 = vmul.f32 (!%p2654_p6), %v3568_v25, %v3577_v31 }
 0x431   : > { %v2953_v47 = vpop.f32.mrb[24].mxu1  ;;  %v3574_v18 = vadd.f32 (!%p2654_p6), %v3554_v62, %v1465_v17  ;;  %v1509_v37 = vmul.f32 (!%p2654_p6), %v3568_v25, %v3571_v29 }
 0x432   : > { %v1389_v48 = vadd.f32 %v2953_v47, %v1239_v45  ;;  %v1348_v49 = vpop.f32.mrb[25].mxu1  ;;  %v2736_v45 = vunpack.c.l.bf16 (!%p2654_p6), %v2793_v32  ;;  %1529 = vadd.xlane.f32.xlu1 (!%p2654_p6), %v1511_v39  ;;  %v1512_v47 = vmul.f32 (!%p2654_p6), %v3568_v25, %v3580_v33 }
 0x433   : > { %v1387_v52 = vadd.f32 %v1348_v49, %v1237_v46  ;;  %v2954_v53 = vpop.f32.mrb[26].mxu1  ;;  %v1454_v36 = vld [vmem:[#allocation2 + $0x30] sm:$0xff] (!%p2654_p6)  ;;  %1525 = vadd.xlane.f32.xlu0 (!%p2654_p6), %v1509_v37  ;;  %v1510_v34 = vmul.f32 (!%p2654_p6), %v3568_v25, %v3574_v18  ;;  %v2737_v49 = vunpack.c.h.bf16 (!%p2654_p6), %v2793_v32  ;;  %v3145_v37 = vld [vmem:[%s4218_s10] sm:$0xff] (!%p2654_p6)  }
 0x434   : > { %1405 = vst [vmem:[#allocation2 + $0x50] sm:$0xff] %v1389_v48  ;;  %v1390_v54 = vadd.f32 %v2954_v53, %v1240_v42  ;;  %v1351_v51 = vpop.f32.mrb[27].mxu1  ;;  %v1452_v20 = vld [vmem:[#allocation2 + $0x20] sm:$0xff] (!%p2654_p6)  ;;  %v1470_v44 = vadd.f32 (!%p2654_p6), %v2732_v30, %v1454_v36  ;;  %2959 = vmatprep.subr.bf16.mxu0 (!%p2654_p6), %v3145_v37 }
 0x435   : > { %1403 = vst [vmem:[#allocation2 + $0x40] sm:$0xff] %v1387_v52  ;;  %v1388_v58 = vadd.f32 %v1351_v51, %v1238_v50  ;;  %v1468_v26 = vadd.f32 (!%p2654_p6), %v2728_v19, %v1452_v20  ;;  %v1455_v38 = vld [vmem:[#allocation2 + $0x38] sm:$0xff] (!%p2654_p6)  ;;  %v2795_v52 = vld [vmem:[%s4234_s25 + $0x30] sm:$0xff] (!%p2654_p6)   ;;  %2960 = vmatpush3.bf16.msra.mxu0 (!%p2654_p6), %v3145_v37  ;;  %v3146_v37 = vld [vmem:[%s4218_s10 + $0x8] sm:$0xff] (!%p2654_p6)  }
 0x436   : > { %1406 = vst [vmem:[#allocation2 + $0x58] sm:$0xff] %v1390_v54  ;;  %v1453_v22 = vld [vmem:[#allocation2 + $0x28] sm:$0xff] (!%p2654_p6)  ;;  %v1471_v48 = vadd.f32 (!%p2654_p6), %v2733_v24, %v1455_v38  ;;  %v3608_v54 = vadd.f32 (!%p2654_p6), %v3554_v62, %v1470_v44  ;;  %1531 = vadd.xlane.f32.xlu1 (!%p2654_p6), %v1512_v47  ;;  %v2745_v8 = vunpack.c.h.bf16 (!%p2654_p6), %v2795_v52  ;;  %2961 = vmatprep.subr.bf16.mxu0 (!%p2654_p6), %v3146_v37 }
 0x437   : > { %1404 = vst [vmem:[#allocation2 + $0x48] sm:$0xff] %v1388_v58  ;;  %v1469_v35 = vadd.f32 (!%p2654_p6), %v2729_v21, %v1453_v22  ;;  %v3595_v40 = vadd.f32 (!%p2654_p6), %v3554_v62, %v1468_v26  ;;  %1527 = vadd.xlane.f32.xlu0 (!%p2654_p6), %v1510_v34  ;;  %v2740_v58 = vunpack.c.l.bf16 (!%p2654_p6), %v2794_v43 }
 0x439   : > { %v2957_v63 = vpop.f32.mrb[28].mxu1  ;;  %1414 = sbr.rel (%p2654_p6) target bundleno = 2186 (0x88a), region = 92  ;;  %v3600_v42 = vadd.f32 (!%p2654_p6), %v3554_v62, %v1469_v35  ;;  %v1513_v53 = vmul.f32 (!%p2654_p6), %v3568_v25, %v3595_v40  ;;  %2962 = vmatpush3.bf16.msra.mxu0 (!%p2654_p6), %v3146_v37 }
 0x43a   : > { %v1393_v56 = vadd.f32 %v2957_v63, %v1243_v55  ;;  %v1364_v57 = vpop.f32.mrb[29].mxu1  ;;  %v3613_v63 = vadd.f32 (!%p2654_p6), %v3554_v62, %v1471_v48 }
 0x43b   : > { %v1391_v3 = vadd.f32 %v1364_v57, %v1241_v60  ;;  %v2958_v4 = vpop.f32.mrb[30].mxu1  ;;  %v1458_v50 = vld [vmem:[#allocation2 + $0x50] sm:$0xff] (!%p2654_p6)  ;;  %v1514_v60 = vmul.f32 (!%p2654_p6), %v3568_v25, %v3600_v42  ;;  %1533 = vadd.xlane.f32.xlu0 (!%p2654_p6), %v1513_v53 }
 0x43c   : > { %1409 = vst [vmem:[#allocation2 + $0x70] sm:$0xff] %v1393_v56  ;;  %v1394_v5 = vadd.f32 %v2958_v4, %v1244_v1  ;;  %v1367_v59 = vpop.f32.mrb[31].mxu1  ;;  %v1456_v41 = vld [vmem:[#allocation2 + $0x40] sm:$0xff] (!%p2654_p6)  ;;  %v2741_v56 = vunpack.c.h.bf16 (!%p2654_p6), %v2794_v43 }
 0x43d   : > { %1407 = vst [vmem:[#allocation2 + $0x60] sm:$0xff] %v1391_v3  ;;  %v1392_v61 = vadd.f32 %v1367_v59, %v1242_v2  ;;  %v1472_v51 = vadd.f32 (!%p2654_p6), %v2736_v45, %v1456_v41  ;;  %v1459_v55 = vld [vmem:[#allocation2 + $0x58] sm:$0xff] (!%p2654_p6)  ;;  %v1515_v3 = vmul.f32 (!%p2654_p6), %v3568_v25, %v3608_v54  ;;  %v2744_v59 = vunpack.c.l.bf16 (!%p2654_p6), %v2795_v52  ;;  %1535 = vadd.xlane.f32.xlu1 (!%p2654_p6), %v1514_v60 }
 0x43e   : > { %1410 = vst [vmem:[#allocation2 + $0x78] sm:$0xff] %v1394_v5  ;;  %v1457_v46 = vld [vmem:[#allocation2 + $0x48] sm:$0xff] (!%p2654_p6)  ;;  %v2796_v2 = vld [vmem:[%s4234_s25 + $0x38] sm:$0xff] (!%p2654_p6)   ;;  %v1474_v5 = vadd.f32 (!%p2654_p6), %v2740_v58, %v1458_v50  ;;  %v1475_v7 = vadd.f32 (!%p2654_p6), %v2741_v56, %v1459_v55 }
 0x43f   : > { %1408 = vst [vmem:[#allocation2 + $0x68] sm:$0xff] %v1392_v61  ;;  %v1473_v1 = vadd.f32 (!%p2654_p6), %v2737_v49, %v1457_v46  ;;  %v3621_v4 = vadd.f32 (!%p2654_p6), %v3554_v62, %v1472_v51  ;;  %v1516_v61 = vmul.f32 (!%p2654_p6), %v3568_v25, %v3613_v63  ;;  %1537 = vadd.xlane.f32.xlu0 (!%p2654_p6), %v1515_v3  ;;  %v2748_v12 = vunpack.c.l.bf16 (!%p2654_p6), %v2796_v2 }
 0x440   : > { %v3631_v10 = vadd.f32 %v3554_v62, %v1474_v5  ;;  %v3636_v14 = vadd.f32 %v3554_v62, %v1475_v7  ;;  %v2749_v17 = vunpack.c.h.bf16 %v2796_v2 }
 0x441   : > { %v3626_v6 = vadd.f32 %v3554_v62, %v1473_v1  ;;  %v1517_v9 = vmul.f32 %v3568_v25, %v3621_v4  ;;  %1539 = vadd.xlane.f32.xlu1 %v1516_v61 }
 0x442   : > { %v1519_v20 = vmul.f32 %v3568_v25, %v3631_v10  ;;  %v1520_v23 = vmul.f32 %v3568_v25, %v3636_v14 }
 0x443   : > { %v1518_v13 = vmul.f32 %v3568_v25, %v3626_v6  ;;  %v1462_v16 = vld [vmem:[#allocation2 + $0x70] sm:$0xff]  ;;  %1541 = vadd.xlane.f32.xlu0 %v1517_v9 }
 0x444   : > { %v1460_v57 = vld [vmem:[#allocation2 + $0x60] sm:$0xff]  ;;  %v1478_v22 = vadd.f32 %v2748_v12, %v1462_v16 }
 0x445   : > { %v1476_v11 = vadd.f32 %v2744_v59, %v1460_v57  ;;  %v1463_v19 = vld [vmem:[#allocation2 + $0x78] sm:$0xff]  ;;  %1543 = vadd.xlane.f32.xlu1 %v1518_v13 }
 0x446   : > { %v1461_v0 = vld [vmem:[#allocation2 + $0x68] sm:$0xff]  ;;  %v1479_v28 = vadd.f32 %v2749_v17, %v1463_v19  ;;  %v3651_v30 = vadd.f32 %v3554_v62, %v1478_v22 }
 0x447   : > { %v1477_v15 = vadd.f32 %v2745_v8, %v1461_v0  ;;  %v3641_v21 = vadd.f32 %v3554_v62, %v1476_v11  ;;  %1545 = vadd.xlane.f32.xlu0 %v1519_v20 }
 0x448   : > { %v3656_v36 = vadd.f32 %v3554_v62, %v1479_v28  ;;  %v1523_v24 = vmul.f32 %v3568_v25, %v3651_v30 }
 0x449   : > { %v3646_v27 = vadd.f32 %v3554_v62, %v1477_v15  ;;  %v1521_v26 = vmul.f32 %v3568_v25, %v3641_v21  ;;  %1547 = vadd.xlane.f32.xlu1 %v1520_v23 }
 0x44a   : > { %v1524_v32 = vmul.f32 %v3568_v25, %v3656_v36 }
 0x44b   : > { %v1522_v35 = vmul.f32 %v3568_v25, %v3646_v27  ;;  %1549 = vadd.xlane.f32.xlu0 %v1521_v26 }
 0x44d   : > { %1551 = vadd.xlane.f32.xlu1 %v1522_v35 }
 0x44f   : > { %1553 = vadd.xlane.f32.xlu0 %v1523_v24 }
 0x451   : > { %1555 = vadd.xlane.f32.xlu1 %v1524_v32 }
 0x4bf   : > { %v1530_v62 = vpop.xlane.xlu1 %1529 }
 0x4c0   : > { %v1526_v38 = vpop.xlane.xlu0 %1525  ;;  %v1559_v41 = vmul.f32 0.03125, %v1530_v62 }
 0x4c1   : > { %v1557_v39 = vmul.f32 0.03125, %v1526_v38 }
 0x4c2   : > { %v1575_v34 = vsub.f32 %v3577_v31, %v1559_v41 }
 0x4c3   : > { %v1573_v43 = vsub.f32 %v3571_v29, %v1557_v39  ;;  %v1532_v46 = vpop.xlane.xlu1 %1531 }
 0x4c4   : > { %v1528_v44 = vpop.xlane.xlu0 %1527  ;;  %v1560_v48 = vmul.f32 0.03125, %v1532_v46  ;;  %v3671_v49 = vmul.f32 %v3568_v25, %v1575_v34 }
 0x4c5   : > { %v1558_v45 = vmul.f32 0.03125, %v1528_v44  ;;  %v3668_v47 = vmul.f32 %v3568_v25, %v1573_v43 }
 0x4c6   : > { %v1576_v53 = vsub.f32 %v3580_v33, %v1560_v48  ;;  %v1607_v58 = vmul.f32 %v3671_v49, %v3671_v49 }
 0x4c7   : > { %v1574_v50 = vsub.f32 %v3574_v18, %v1558_v45  ;;  %v1605_v52 = vmul.f32 %v3668_v47, %v3668_v47 }
 0x4c8   : > { %v1534_v29 = vpop.xlane.xlu0 %1533  ;;  %v3683_v1 = vmul.f32 %v3568_v25, %v1576_v53 }
 0x4c9   : > { %v1561_v51 = vmul.f32 0.03125, %v1534_v29  ;;  %1621 = vadd.xlane.f32.xlu0 %v1605_v52  ;;  %v3680_v55 = vmul.f32 %v3568_v25, %v1574_v50 }
 0x4ca   : > { %v1536_v31 = vpop.xlane.xlu1 %1535  ;;  %v1608_v5 = vmul.f32 %v3683_v1, %v3683_v1 }
 0x4cb   : > { %v1562_v60 = vmul.f32 0.03125, %v1536_v31  ;;  %v1577_v18 = vsub.f32 %v3595_v40, %v1561_v51  ;;  %v1606_v56 = vmul.f32 %v3680_v55, %v3680_v55 }
 0x4cc   : > { %v1538_v57 = vpop.xlane.xlu0 %1537 }
 0x4cd   : > { %v1578_v33 = vsub.f32 %v3600_v42, %v1562_v60  ;;  %v1563_v2 = vmul.f32 0.03125, %v1538_v57  ;;  %1625 = vadd.xlane.f32.xlu0 %v1607_v58  ;;  %1623 = vadd.xlane.f32.xlu1 %v1606_v56  ;;  %v3692_v59 = vmul.f32 %v3568_v25, %v1577_v18  ;;  %v3148_v18 = vld [vmem:[%s4218_s10 + $0x18] sm:$0xff]   ;;  %v3150_v57 = vld [vmem:[%s4218_s10 + $0x28] sm:$0xff]  }
 0x4ce   : > { %v1540_v3 = vpop.xlane.xlu1 %1539 }
 0x4cf   : > { %v1564_v61 = vmul.f32 0.03125, %v1540_v3  ;;  %v3695_v7 = vmul.f32 %v3568_v25, %v1578_v33  ;;  %v1579_v40 = vsub.f32 %v3608_v54, %v1563_v2  ;;  %v1609_v42 = vmul.f32 %v3692_v59, %v3692_v59  ;;  %v3149_v33 = vld [vmem:[%s4218_s10 + $0x20] sm:$0xff]   ;;  %v3151_v2 = vld [vmem:[%s4218_s10 + $0x30] sm:$0xff]   ;;  %v3152_v3 = vld [vmem:[%s4218_s10 + $0x38] sm:$0xff]  }
 0x4d0   : > { %v1542_v0 = vpop.xlane.xlu0 %1541 }
 0x4d1   : > { %v1580_v8 = vsub.f32 %v3613_v63, %v1564_v61  ;;  %v1565_v9 = vmul.f32 0.03125, %v1542_v0  ;;  %1627 = vadd.xlane.f32.xlu1 %v1608_v5  ;;  %1629 = vadd.xlane.f32.xlu0 %v1609_v42  ;;  %v1610_v12 = vmul.f32 %v3695_v7, %v3695_v7  ;;  %v3704_v13 = vmul.f32 %v3568_v25, %v1579_v40  ;;  %v3153_v5 = vld [vmem:[%s4220_s12] sm:$0xff]   ;;  %v3154_v61 = vld [vmem:[%s4220_s12 + $0x8] sm:$0xff]   ;;  %v3155_v40 = vld [vmem:[%s4220_s12 + $0x10] sm:$0xff]  }
 0x4d2   : > { %v1544_v11 = vpop.xlane.xlu1 %1543  ;;  %2991 = vmatprep.subr.bf16.mxu1 %v3153_v5  ;;  %v3156_v42 = vld [vmem:[%s4220_s12 + $0x18] sm:$0xff]   ;;  %v3158_v0 = vld [vmem:[%s4220_s12 + $0x28] sm:$0xff]  }
 0x4d3   : > { %v1566_v15 = vmul.f32 0.03125, %v1544_v11  ;;  %v3707_v16 = vmul.f32 %v3568_v25, %v1580_v8  ;;  %v1581_v54 = vsub.f32 %v3621_v4, %v1565_v9  ;;  %v1611_v63 = vmul.f32 %v3704_v13, %v3704_v13  ;;  %2992 = vmatpush3.bf16.msra.mxu1 %v3153_v5  ;;  %v3157_v8 = vld [vmem:[%s4220_s12 + $0x20] sm:$0xff]  }
 0x4d4   : > { %v1546_v19 = vpop.xlane.xlu0 %1545  ;;  %2993 = vmatprep.subr.bf16.mxu1 %v3154_v61 }
 0x4d5   : > { %v1582_v17 = vsub.f32 %v3626_v6, %v1566_v15  ;;  %v1567_v20 = vmul.f32 0.03125, %v1546_v19  ;;  %1631 = vadd.xlane.f32.xlu1 %v1610_v12  ;;  %1633 = vadd.xlane.f32.xlu0 %v1611_v63  ;;  %v1612_v23 = vmul.f32 %v3707_v16, %v3707_v16  ;;  %v3716_v28 = vmul.f32 %v3568_v25, %v1581_v54 }
 0x4d6   : > { %v1548_v22 = vpop.xlane.xlu1 %1547 }
 0x4d7   : > { %v1568_v26 = vmul.f32 0.03125, %v1548_v22  ;;  %v3719_v35 = vmul.f32 %v3568_v25, %v1582_v17  ;;  %v1583_v4 = vsub.f32 %v3631_v10, %v1567_v20  ;;  %v1613_v6 = vmul.f32 %v3716_v28, %v3716_v28  ;;  %2994 = vmatpush3.bf16.msra.mxu1 %v3154_v61 }
 0x4d8   : > { %v1550_v32 = vpop.xlane.xlu0 %1549  ;;  %2995 = vmatprep.subr.bf16.mxu1 %v3155_v40 }
 0x4d9   : > { %v1584_v24 = vsub.f32 %v3636_v14, %v1568_v26  ;;  %v1569_v38 = vmul.f32 0.03125, %v1550_v32  ;;  %1635 = vadd.xlane.f32.xlu1 %v1612_v23  ;;  %1637 = vadd.xlane.f32.xlu0 %v1613_v6  ;;  %v1614_v62 = vmul.f32 %v3719_v35, %v3719_v35  ;;  %v3731_v41 = vmul.f32 %v3568_v25, %v1583_v4 }
 0x4da   : > { %v1552_v39 = vpop.xlane.xlu1 %1551 }
 0x4db   : > { %v1570_v10 = vmul.f32 0.03125, %v1552_v39  ;;  %v3734_v43 = vmul.f32 %v3568_v25, %v1584_v24  ;;  %v1585_v14 = vsub.f32 %v3641_v21, %v1569_v38  ;;  %v1615_v34 = vmul.f32 %v3731_v41, %v3731_v41  ;;  %v3147_v21 = vld [vmem:[%s4218_s10 + $0x10] sm:$0xff]   ;;  %2996 = vmatpush3.bf16.msra.mxu1 %v3155_v40 }
 0x4dc   : > { %v1554_v45 = vpop.xlane.xlu0 %1553  ;;  %2963 = vmatprep.subr.bf16.mxu0 %v3147_v21  ;;  %2997 = vmatprep.subr.bf16.mxu1 %v3156_v42 }
 0x4dd   : > { %v1586_v44 = vsub.f32 %v3646_v27, %v1570_v10  ;;  %v1571_v46 = vmul.f32 0.03125, %v1554_v45  ;;  %1639 = vadd.xlane.f32.xlu1 %v1614_v62  ;;  %1641 = vadd.xlane.f32.xlu0 %v1615_v34  ;;  %v1616_v50 = vmul.f32 %v3734_v43, %v3734_v43  ;;  %v3743_v52 = vmul.f32 %v3568_v25, %v1585_v14 }
 0x4de   : > { %v1556_v48 = vpop.xlane.xlu1 %1555  ;;  %2964 = vmatpush3.bf16.msra.mxu0 %v3147_v21 }
 0x4df   : > { %v1572_v53 = vmul.f32 0.03125, %v1556_v48  ;;  %v3749_v29 = vmul.f32 %v3568_v25, %v1586_v44  ;;  %v1587_v27 = vsub.f32 %v3651_v30, %v1571_v46  ;;  %v1617_v51 = vmul.f32 %v3743_v52, %v3743_v52  ;;  %2965 = vmatprep.subr.bf16.mxu0 %v3148_v18  ;;  %2998 = vmatpush3.bf16.msra.mxu1 %v3156_v42 }
 0x4e0   : > { %2999 = vmatprep.subr.bf16.mxu1 %v3157_v8 }
 0x4e1   : > { %v1588_v31 = vsub.f32 %v3656_v36, %v1572_v53  ;;  %1643 = vadd.xlane.f32.xlu1 %v1616_v50  ;;  %1645 = vadd.xlane.f32.xlu0 %v1617_v51  ;;  %v1618_v58 = vmul.f32 %v3749_v29, %v3749_v29  ;;  %v3758_v60 = vmul.f32 %v3568_v25, %v1587_v27  ;;  %v3804_v50 = vld [vmem:[%s4216_s8] ss:$0 sm:$0xff] }
 0x4e2   : > { %2966 = vmatpush3.bf16.msra.mxu0 %v3148_v18 }
 0x4e3   : > { %v3764_v30 = vmul.f32 %v3568_v25, %v1588_v31  ;;  %v1619_v56 = vmul.f32 %v3758_v60, %v3758_v60  ;;  %2967 = vmatprep.subr.bf16.mxu0 %v3149_v33  ;;  %3000 = vmatpush3.bf16.msra.mxu1 %v3157_v8 }
 0x4e4   : > { %3001 = vmatprep.subr.bf16.mxu1 %v3158_v0 }
 0x4e5   : > { %1647 = vadd.xlane.f32.xlu1 %v1618_v58  ;;  %1649 = vadd.xlane.f32.xlu0 %v1619_v56  ;;  %v1620_v36 = vmul.f32 %v3764_v30, %v3764_v30 }
 0x4e6   : > { %2968 = vmatpush3.bf16.msra.mxu0 %v3149_v33  ;;  %v3811_v33 = vld [vmem:[%s4217_s9] ss:$0 sm:$0xff] }
 0x4e7   : > { %2969 = vmatprep.subr.bf16.mxu0 %v3150_v57  ;;  %3002 = vmatpush3.bf16.msra.mxu1 %v3158_v0 }
 0x4e9   : > { %1651 = vadd.xlane.f32.xlu1 %v1620_v36 }
 0x4ea   : > { %2970 = vmatpush3.bf16.msra.mxu0 %v3150_v57 }
 0x4eb   : > { %2971 = vmatprep.subr.bf16.mxu0 %v3151_v2 }
 0x4ee   : > { %2972 = vmatpush3.bf16.msra.mxu0 %v3151_v2 }
 0x4ef   : > { %2973 = vmatprep.subr.bf16.mxu0 %v3152_v3 }
 0x4f2   : > { %2974 = vmatpush3.bf16.msra.mxu0 %v3152_v3 }
 0x556   : > { %v1622_v9 = vpop.xlane.xlu0 %1621 }
 0x557   : > { %v1653_v11 = vmul.f32 0.03125, %v1622_v9 }
 0x559   : > { %v1669_v12 = vadd.f32 1e-05, %v1653_v11 }
 0x55a   : > { %v1624_v15 = vpop.xlane.xlu1 %1623  ;;  %v1626_v54 = vpop.xlane.xlu0 %1625 }
 0x55b   : > { %3161 = vrsqrt.f32 %v1669_v12  ;;  %v1654_v63 = vmul.f32 0.03125, %v1624_v15  ;;  %v1655_v17 = vmul.f32 0.03125, %v1626_v54 }
 0x55d   : > { %v1670_v19 = vadd.f32 1e-05, %v1654_v63  ;;  %v1671_v20 = vadd.f32 1e-05, %v1655_v17 }
 0x55e   : > { %v1628_v22 = vpop.xlane.xlu1 %1627  ;;  %v1630_v23 = vpop.xlane.xlu0 %1629 }
 0x55f   : > { %3163 = vrsqrt.f32 %v1670_v19  ;;  %v1656_v26 = vmul.f32 0.03125, %v1628_v22  ;;  %v1657_v4 = vmul.f32 0.03125, %v1630_v23 }
 0x560   : > { %3165 = vrsqrt.f32 %v1671_v20 }
 0x561   : > { %v1672_v6 = vadd.f32 1e-05, %v1656_v26  ;;  %v1673_v24 = vadd.f32 1e-05, %v1657_v4 }
 0x562   : > { %v1632_v32 = vpop.xlane.xlu1 %1631  ;;  %v1634_v37 = vpop.xlane.xlu0 %1633 }
 0x563   : > { %3167 = vrsqrt.f32 %v1672_v6  ;;  %v1658_v38 = vmul.f32 0.03125, %v1632_v32  ;;  %v1659_v39 = vmul.f32 0.03125, %v1634_v37 }
 0x564   : > { %3169 = vrsqrt.f32 %v1673_v24 }
 0x565   : > { %v3162_v62 = vpop.eup %3161  ;;  %v1674_v10 = vadd.f32 1e-05, %v1658_v38  ;;  %v1675_v14 = vadd.f32 1e-05, %v1659_v39 }
 0x566   : > { %v1636_v34 = vpop.xlane.xlu1 %1635  ;;  %v1638_v44 = vpop.xlane.xlu0 %1637  ;;  %v1701_v45 = vmul.f32 %v3162_v62, %v3668_v47 }
 0x567   : > { %3171 = vrsqrt.f32 %v1674_v10  ;;  %v1660_v46 = vmul.f32 0.03125, %v1636_v34  ;;  %v1661_v48 = vmul.f32 0.03125, %v1638_v44 }
 0x568   : > { %3173 = vrsqrt.f32 %v1675_v14  ;;  %v1724_v56 = vmul.f32 %v3804_v50, %v1701_v45 }
 0x569   : > { %v3164_v21 = vpop.eup %3163  ;;  %v1676_v53 = vadd.f32 1e-05, %v1660_v46  ;;  %v1677_v27 = vadd.f32 1e-05, %v1661_v48 }
 0x56a   : > { %v3166_v51 = vpop.eup %3165  ;;  %v1640_v31 = vpop.xlane.xlu1 %1639  ;;  %v1702_v18 = vmul.f32 %v3164_v21, %v3680_v55  ;;  %v3816_v8 = vadd.f32 %v3811_v33, %v1724_v56 }
 0x56b   : > { %v1642_v58 = vpop.xlane.xlu0 %1641  ;;  %3175 = vrsqrt.f32 %v1676_v53  ;;  %v1662_v47 = vmul.f32 0.03125, %v1640_v31  ;;  %v1703_v57 = vmul.f32 %v3166_v51, %v3671_v49 }
 0x56c   : > { %v1663_v36 = vmul.f32 0.03125, %v1642_v58  ;;  %3177 = vrsqrt.f32 %v1677_v27  ;;  %v1725_v2 = vmul.f32 %v3804_v50, %v1702_v18 }
 0x56d   : > { %v3168_v3 = vpop.eup %3167  ;;  %v1678_v5 = vadd.f32 1e-05, %v1662_v47  ;;  %v1726_v11 = vmul.f32 %v3804_v50, %v1703_v57 }
 0x56e   : > { %v1679_v61 = vadd.f32 1e-05, %v1663_v36  ;;  %v3170_v40 = vpop.eup %3169  ;;  %v1644_v55 = vpop.xlane.xlu1 %1643  ;;  %v3819_v0 = vadd.f32 %v3811_v33, %v1725_v2  ;;  %v1704_v9 = vmul.f32 %v3168_v3, %v3683_v1 }
 0x56f   : > { %v1646_v42 = vpop.xlane.xlu0 %1645  ;;  %3179 = vrsqrt.f32 %v1678_v5  ;;  %v1664_v49 = vmul.f32 0.03125, %v1644_v55  ;;  %v1705_v63 = vmul.f32 %v3170_v40, %v3692_v59  ;;  %v3828_v26 = vadd.f32 %v3811_v33, %v1726_v11 }
 0x570   : > { %v1665_v12 = vmul.f32 0.03125, %v1646_v42  ;;  %3181 = vrsqrt.f32 %v1679_v61  ;;  %v1763_v15 = vpack.c.bf16 %v3819_v0, %v3816_v8  ;;  %v1727_v54 = vmul.f32 %v3804_v50, %v1704_v9 }
 0x571   : > { %v3172_v17 = vpop.eup %3171  ;;  %v1680_v19 = vadd.f32 1e-05, %v1664_v49  ;;  %v1728_v24 = vmul.f32 %v3804_v50, %v1705_v63 }
 0x572   : > { %v1681_v20 = vadd.f32 1e-05, %v1665_v12  ;;  %v3174_v22 = vpop.eup %3173  ;;  %v1648_v23 = vpop.xlane.xlu1 %1647  ;;  %2975 = vmatprep.mubr.bf16.mxu0 %v1763_v15  ;;  %v3831_v4 = vadd.f32 %v3811_v33, %v1727_v54  ;;  %v1706_v6 = vmul.f32 %v3172_v17, %v3695_v7 }
 0x573   : > { %v1650_v1 = vpop.xlane.xlu0 %1649  ;;  %3183 = vrsqrt.f32 %v1680_v19  ;;  %v1666_v32 = vmul.f32 0.03125, %v1648_v23  ;;  %v1707_v37 = vmul.f32 %v3174_v22, %v3704_v13  ;;  %v3840_v7 = vadd.f32 %v3811_v33, %v1728_v24 }
 0x574   : > { %v1667_v59 = vmul.f32 0.03125, %v1650_v1  ;;  %3185 = vrsqrt.f32 %v1681_v20  ;;  %v1764_v38 = vpack.c.bf16 %v3831_v4, %v3828_v26  ;;  %v1729_v39 = vmul.f32 %v3804_v50, %v1706_v6 }
 0x575   : > { %v3176_v62 = vpop.eup %3175  ;;  %v1682_v10 = vadd.f32 1e-05, %v1666_v32  ;;  %v1730_v46 = vmul.f32 %v3804_v50, %v1707_v37 }
 0x576   : > { %v1683_v14 = vadd.f32 1e-05, %v1667_v59  ;;  %v3178_v34 = vpop.eup %3177  ;;  %v1652_v44 = vpop.xlane.xlu1 %1651  ;;  %2976 = vmatmul.mubr.bf16.vlgmr.msra.gmra.mrb[0].mxu0 %v1764_v38  ;;  %v3843_v45 = vadd.f32 %v3811_v33, %v1729_v39  ;;  %v1708_v13 = vmul.f32 %v3176_v62, %v3707_v16 }
 0x577   : > { %3187 = vrsqrt.f32 %v1682_v10  ;;  %v1668_v48 = vmul.f32 0.03125, %v1652_v44  ;;  %v1709_v21 = vmul.f32 %v3178_v34, %v3716_v28  ;;  %v3852_v18 = vadd.f32 %v3811_v33, %v1730_v46 }
 0x578   : > { %3189 = vrsqrt.f32 %v1683_v14  ;;  %v1765_v53 = vpack.c.bf16 %v3843_v45, %v3840_v7  ;;  %v1731_v27 = vmul.f32 %v3804_v50, %v1708_v13 }
 0x579   : > { %v3180_v51 = vpop.eup %3179  ;;  %v1684_v31 = vadd.f32 1e-05, %v1668_v48  ;;  %v1732_v28 = vmul.f32 %v3804_v50, %v1709_v21 }
 0x57a   : > { %v3182_v58 = vpop.eup %3181  ;;  %2979 = vmatprep.mubr.bf16.mxu0 %v1765_v53  ;;  %v3855_v16 = vadd.f32 %v3811_v33, %v1731_v27  ;;  %v1710_v56 = vmul.f32 %v3180_v51, %v3719_v35 }
 0x57b   : > { %3191 = vrsqrt.f32 %v1684_v31  ;;  %v1711_v47 = vmul.f32 %v3182_v58, %v3731_v41  ;;  %v3864_v5 = vadd.f32 %v3811_v33, %v1732_v28 }
 0x57c   : > { %v1766_v36 = vpack.c.bf16 %v3855_v16, %v3852_v18  ;;  %v1733_v57 = vmul.f32 %v3804_v50, %v1710_v56 }
 0x57d   : > { %v3184_v2 = vpop.eup %3183  ;;  %v1734_v40 = vmul.f32 %v3804_v50, %v1711_v47 }
 0x57e   : > { %v3186_v3 = vpop.eup %3185  ;;  %2980 = vmatmul.mubr.bf16.gmra.mrb[4].mxu0 %v1766_v36  ;;  %v3867_v61 = vadd.f32 %v3811_v33, %v1733_v57  ;;  %v1712_v35 = vmul.f32 %v3184_v2, %v3734_v43 }
 0x57f   : > { %v1713_v41 = vmul.f32 %v3186_v3, %v3743_v52  ;;  %v3876_v49 = vadd.f32 %v3811_v33, %v1734_v40 }
 0x580   : > { %v1767_v55 = vpack.c.bf16 %v3867_v61, %v3864_v5  ;;  %v1735_v42 = vmul.f32 %v3804_v50, %v1712_v35 }
 0x581   : > { %v3188_v9 = vpop.eup %3187  ;;  %v1736_v15 = vmul.f32 %v3804_v50, %v1713_v41 }
 0x582   : > { %v3190_v11 = vpop.eup %3189  ;;  %2983 = vmatprep.mubr.bf16.mxu0 %v1767_v55  ;;  %v3879_v12 = vadd.f32 %v3811_v33, %v1735_v42  ;;  %v1714_v43 = vmul.f32 %v3188_v9, %v3749_v29 }
 0x583   : > { %v1715_v52 = vmul.f32 %v3190_v11, %v3758_v60  ;;  %v3888_v19 = vadd.f32 %v3811_v33, %v1736_v15 }
 0x584   : > { %v1768_v54 = vpack.c.bf16 %v3879_v12, %v3876_v49  ;;  %v1737_v63 = vmul.f32 %v3804_v50, %v1714_v43 }
 0x585   : > { %v3192_v17 = vpop.eup %3191  ;;  %v1738_v29 = vmul.f32 %v3804_v50, %v1715_v52 }
 0x586   : > { %2984 = vmatmul.mubr.bf16.gmra.mrb[8].mxu0 %v1768_v54  ;;  %v3891_v20 = vadd.f32 %v3811_v33, %v1737_v63  ;;  %v1716_v22 = vmul.f32 %v3192_v17, %v3764_v30  ;;  %v3159_v30 = vld [vmem:[%s4220_s12 + $0x30] sm:$0xff]  }
 0x587   : > { %v3899_v1 = vadd.f32 %v3811_v33, %v1738_v29  ;;  %3003 = vmatprep.subr.bf16.mxu1 %v3159_v30 }
 0x588   : > { %v1769_v60 = vpack.c.bf16 %v3891_v20, %v3888_v19  ;;  %v1739_v23 = vmul.f32 %v3804_v50, %v1716_v22  ;;  %3004 = vmatpush3.bf16.msra.mxu1 %v3159_v30  ;;  %v3160_v50 = vld [vmem:[%s4220_s12 + $0x38] sm:$0xff]  }
 0x589   : > { %3005 = vmatprep.subr.bf16.mxu1 %v3160_v50 }
 0x58a   : > { %2987 = vmatprep.mubr.bf16.mxu0 %v1769_v60  ;;  %v3902_v6 = vadd.f32 %v3811_v33, %v1739_v23  ;;  %v2659_v33 = vld [vmem:[%s4219_s11] ss:$0 sm:$0xff] }
 0x58c   : > { %v1770_v24 = vpack.c.bf16 %v3902_v6, %v3899_v1  ;;  %3006 = vmatpush3.bf16.msra.mxu1 %v3160_v50 }
 0x58e   : > { %2988 = vmatmul.mubr.bf16.gmra.mrb[12].mxu0 %v1770_v24 }
 0x649   : > { %v2977_v32 = vpop.f32.mrb[0].mxu0 }
 0x64a   : > { %v1885_v59 = vadd.f32 %v2977_v32, %v2659_v33  ;;  %v1876_v37 = vpop.f32.mrb[1].mxu0 }
 0x64b   : > { %v1877_v38 = vadd.f32 %v2659_v33, %v1876_v37  ;;  %v2978_v39 = vpop.f32.mrb[2].mxu0 }
 0x64c   : > { %v1888_v62 = vadd.f32 %v2978_v39, %v2659_v33  ;;  %v1879_v10 = vpop.f32.mrb[3].mxu0  ;;  %v1941_v34 = vmax.f32 %v1885_v59, 0.0 }
 0x64d   : > { %v1880_v14 = vadd.f32 %v2659_v33, %v1879_v10  ;;  %v1939_v13 = vmax.f32 %v1877_v38, 0.0 }
 0x64e   : > { %v1942_v44 = vmax.f32 %v1888_v62, 0.0 }
 0x64f   : > { %v1940_v46 = vmax.f32 %v1880_v14, 0.0 }
 0x650   : > { %v1956_v48 = vpack.c.bf16 %v1942_v44, %v1941_v34 }
 0x651   : > { %v2981_v21 = vpop.f32.mrb[4].mxu0  ;;  %v1955_v53 = vpack.c.bf16 %v1940_v46, %v1939_v13  ;;  %v3918_v13 = vld [vmem:[%s4221_s13] ss:$0 sm:$0xff] }
 0x652   : > { %v1901_v27 = vadd.f32 %v2981_v21, %v2659_v33  ;;  %v1892_v51 = vpop.f32.mrb[5].mxu0 }
 0x653   : > { %v1893_v31 = vadd.f32 %v2659_v33, %v1892_v51  ;;  %v2982_v58 = vpop.f32.mrb[6].mxu0  ;;  %3007 = vmatprep.mubr.bf16.mxu1 %v1955_v53 }
 0x654   : > { %v1904_v56 = vadd.f32 %v2982_v58, %v2659_v33  ;;  %v1895_v28 = vpop.f32.mrb[7].mxu0  ;;  %3008 = vmatmul.mubr.bf16.vlgmr.msra.gmra.mrb[0].mxu1 %v1956_v48  ;;  %v1945_v36 = vmax.f32 %v1901_v27, 0.0 }
 0x655   : > { %v1896_v47 = vadd.f32 %v2659_v33, %v1895_v28  ;;  %v1943_v2 = vmax.f32 %v1893_v31, 0.0 }
 0x656   : > { %v1946_v57 = vmax.f32 %v1904_v56, 0.0 }
 0x657   : > { %v1944_v3 = vmax.f32 %v1896_v47, 0.0 }
 0x658   : > { %v1958_v35 = vpack.c.bf16 %v1946_v57, %v1945_v36 }
 0x659   : > { %v1957_v40 = vpack.c.bf16 %v1944_v3, %v1943_v2  ;;  %v2985_v41 = vpop.f32.mrb[8].mxu0 }
 0x65a   : > { %v1917_v55 = vadd.f32 %v2985_v41, %v2659_v33  ;;  %v1908_v42 = vpop.f32.mrb[9].mxu0 }
 0x65b   : > { %v1909_v9 = vadd.f32 %v2659_v33, %v1908_v42  ;;  %v2986_v11 = vpop.f32.mrb[10].mxu0  ;;  %3011 = vmatprep.mubr.bf16.mxu1 %v1957_v40 }
 0x65c   : > { %v1920_v43 = vadd.f32 %v2986_v11, %v2659_v33  ;;  %v1911_v15 = vpop.f32.mrb[11].mxu0  ;;  %3012 = vmatmul.mubr.bf16.gmra.mrb[4].mxu1 %v1958_v35  ;;  %v1949_v54 = vmax.f32 %v1917_v55, 0.0 }
 0x65d   : > { %v1912_v52 = vadd.f32 %v2659_v33, %v1911_v15  ;;  %v1947_v17 = vmax.f32 %v1909_v9, 0.0 }
 0x65e   : > { %v1950_v63 = vmax.f32 %v1920_v43, 0.0 }
 0x65f   : > { %v1948_v22 = vmax.f32 %v1912_v52, 0.0 }
 0x660   : > { %v1960_v29 = vpack.c.bf16 %v1950_v63, %v1949_v54 }
 0x661   : > { %v1959_v60 = vpack.c.bf16 %v1948_v22, %v1947_v17  ;;  %v2989_v23 = vpop.f32.mrb[12].mxu0 }
 0x662   : > { %v1933_v24 = vadd.f32 %v2989_v23, %v2659_v33  ;;  %v1924_v30 = vpop.f32.mrb[13].mxu0 }
 0x663   : > { %v1925_v50 = vadd.f32 %v2659_v33, %v1924_v30  ;;  %v2990_v32 = vpop.f32.mrb[14].mxu0  ;;  %3015 = vmatprep.mubr.bf16.mxu1 %v1959_v60 }
 0x664   : > { %v1936_v59 = vadd.f32 %v2990_v32, %v2659_v33  ;;  %v1927_v37 = vpop.f32.mrb[15].mxu0  ;;  %3016 = vmatmul.mubr.bf16.gmra.mrb[8].mxu1 %v1960_v29  ;;  %v1953_v39 = vmax.f32 %v1933_v24, 0.0 }
 0x665   : > { %v1928_v38 = vadd.f32 %v2659_v33, %v1927_v37  ;;  %v1951_v10 = vmax.f32 %v1925_v50, 0.0 }
 0x666   : > { %v1954_v62 = vmax.f32 %v1936_v59, 0.0 }
 0x667   : > { %v1952_v14 = vmax.f32 %v1928_v38, 0.0 }
 0x668   : > { %v1962_v34 = vpack.c.bf16 %v1954_v62, %v1953_v39 }
 0x669   : > { %v1961_v44 = vpack.c.bf16 %v1952_v14, %v1951_v10 }
 0x66b   : > { %3019 = vmatprep.mubr.bf16.mxu1 %v1961_v44 }
 0x66c   : > { %3020 = vmatmul.mubr.bf16.gmra.mrb[12].mxu1 %v1962_v34 }
 0x727   : > { %v3009_v46 = vpop.f32.mrb[0].mxu1 }
 0x728   : > { %v2077_v48 = vadd.f32 %v3009_v46, %v3918_v13  ;;  %v2068_v21 = vpop.f32.mrb[1].mxu1 }
 0x729   : > { %v2069_v53 = vadd.f32 %v3918_v13, %v2068_v21  ;;  %v3010_v33 = vpop.f32.mrb[2].mxu1 }
 0x72a   : > { %v3923_v27 = vadd.f32 %v2077_v48, %v3828_v26  ;;  %v2080_v51 = vadd.f32 %v3010_v33, %v3918_v13  ;;  %v2071_v31 = vpop.f32.mrb[3].mxu1 }
 0x72b   : > { %v2072_v58 = vadd.f32 %v3918_v13, %v2071_v31  ;;  %v3928_v56 = vadd.f32 %v2069_v53, %v3816_v8 }
 0x72c   : > { %v3931_v28 = vadd.f32 %v2080_v51, %v3831_v4  ;;  %v2149_v47 = vmul.f32 %v3568_v25, %v3923_v27 }
 0x72d   : > { %v3936_v36 = vadd.f32 %v2072_v58, %v3819_v0  ;;  %v2147_v8 = vmul.f32 %v3568_v25, %v3928_v56 }
 0x72e   : > { %2167 = vadd.xlane.f32.xlu0 %v2149_v47  ;;  %v2150_v26 = vmul.f32 %v3568_v25, %v3931_v28 }
 0x72f   : > { %v3013_v57 = vpop.f32.mrb[4].mxu1  ;;  %v2148_v55 = vmul.f32 %v3568_v25, %v3936_v36 }
 0x730   : > { %v2093_v2 = vadd.f32 %v3013_v57, %v3918_v13  ;;  %2169 = vadd.xlane.f32.xlu1 %v2150_v26  ;;  %v2084_v3 = vpop.f32.mrb[5].mxu1 }
 0x731   : > { %v2085_v4 = vadd.f32 %v3918_v13, %v2084_v3  ;;  %v3014_v35 = vpop.f32.mrb[6].mxu1 }
 0x732   : > { %v3945_v40 = vadd.f32 %v2093_v2, %v3852_v18  ;;  %v2096_v0 = vadd.f32 %v3014_v35, %v3918_v13  ;;  %2163 = vadd.xlane.f32.xlu0 %v2147_v8  ;;  %v2087_v41 = vpop.f32.mrb[7].mxu1 }
 0x733   : > { %v2088_v42 = vadd.f32 %v3918_v13, %v2087_v41  ;;  %v3952_v9 = vadd.f32 %v2085_v4, %v3840_v7 }
 0x734   : > { %v3955_v11 = vadd.f32 %v2096_v0, %v3855_v16  ;;  %2165 = vadd.xlane.f32.xlu1 %v2148_v55  ;;  %v2153_v18 = vmul.f32 %v3568_v25, %v3945_v40  ;;  %v3968_v16 = vld [vmem:[%s4215_s7] ss:$0 sm:$0xff] }
 0x735   : > { %v3960_v43 = vadd.f32 %v2088_v42, %v3843_v45  ;;  %v2151_v63 = vmul.f32 %v3968_v16, %v3952_v9 }
 0x736   : > { %2175 = vadd.xlane.f32.xlu0 %v2153_v18  ;;  %v2154_v15 = vmul.f32 %v3568_v25, %v3955_v11 }
 0x737   : > { %v3017_v52 = vpop.f32.mrb[8].mxu1  ;;  %v2152_v60 = vmul.f32 %v3968_v16, %v3960_v43 }
 0x738   : > { %v2109_v54 = vadd.f32 %v3017_v52, %v3918_v13  ;;  %2177 = vadd.xlane.f32.xlu1 %v2154_v15  ;;  %v2100_v7 = vpop.f32.mrb[9].mxu1 }
 0x739   : > { %v2101_v45 = vadd.f32 %v3918_v13, %v2100_v7  ;;  %v3018_v17 = vpop.f32.mrb[10].mxu1 }
 0x73a   : > { %v3974_v22 = vadd.f32 %v2109_v54, %v3876_v49  ;;  %v2112_v25 = vadd.f32 %v3018_v17, %v3918_v13  ;;  %2171 = vadd.xlane.f32.xlu0 %v2151_v63  ;;  %v2103_v29 = vpop.f32.mrb[11].mxu1 }
 0x73b   : > { %v2104_v23 = vadd.f32 %v3918_v13, %v2103_v29  ;;  %v3981_v24 = vadd.f32 %v2101_v45, %v3864_v5 }
 0x73c   : > { %v3984_v30 = vadd.f32 %v2112_v25, %v3879_v12  ;;  %2173 = vadd.xlane.f32.xlu1 %v2152_v60  ;;  %v2157_v49 = vmul.f32 %v3968_v16, %v3974_v22 }
 0x73d   : > { %v3989_v50 = vadd.f32 %v2104_v23, %v3867_v61  ;;  %v2155_v5 = vmul.f32 %v3968_v16, %v3981_v24 }
 0x73e   : > { %2183 = vadd.xlane.f32.xlu0 %v2157_v49  ;;  %v2158_v32 = vmul.f32 %v3968_v16, %v3984_v30 }
 0x73f   : > { %v3021_v59 = vpop.f32.mrb[12].mxu1  ;;  %v2156_v61 = vmul.f32 %v3968_v16, %v3989_v50 }
 0x740   : > { %2185 = vadd.xlane.f32.xlu1 %v2158_v32  ;;  %v2116_v37 = vpop.f32.mrb[13].mxu1  ;;  %v2125_v12 = vadd.f32 %v3021_v59, %v3918_v13 }
 0x741   : > { %v2117_v38 = vadd.f32 %v3918_v13, %v2116_v37  ;;  %v3022_v39 = vpop.f32.mrb[14].mxu1 }
 0x742   : > { %2179 = vadd.xlane.f32.xlu0 %v2155_v5  ;;  %v2119_v62 = vpop.f32.mrb[15].mxu1  ;;  %v2128_v14 = vadd.f32 %v3022_v39, %v3918_v13  ;;  %v4005_v44 = vadd.f32 %v2125_v12, %v3899_v1 }
 0x743   : > { %v4000_v10 = vadd.f32 %v2117_v38, %v3888_v19  ;;  %v2120_v34 = vadd.f32 %v3918_v13, %v2119_v62 }
 0x744   : > { %2181 = vadd.xlane.f32.xlu1 %v2156_v61  ;;  %v4013_v21 = vadd.f32 %v2128_v14, %v3902_v6  ;;  %v2161_v13 = vmul.f32 %v3968_v16, %v4005_v44 }
 0x745   : > { %v4008_v46 = vadd.f32 %v2120_v34, %v3891_v20  ;;  %v2159_v48 = vmul.f32 %v3968_v16, %v4000_v10 }
 0x746   : > { %v2162_v1 = vmul.f32 %v3968_v16, %v4013_v21 }
 0x747   : > { %2187 = vadd.xlane.f32.xlu0 %v2159_v48  ;;  %v2160_v19 = vmul.f32 %v3968_v16, %v4008_v46 }
 0x749   : > { %2189 = vadd.xlane.f32.xlu1 %v2160_v19 }
 0x74b   : > { %2191 = vadd.xlane.f32.xlu0 %v2161_v13 }
 0x74d   : > { %2193 = vadd.xlane.f32.xlu1 %v2162_v1 }
 0x7bb   : > { %v2168_v20 = vpop.xlane.xlu0 %2167 }
 0x7bc   : > { %v2197_v53 = vmul.f32 0.03125, %v2168_v20 }
 0x7bd   : > { %v2170_v33 = vpop.xlane.xlu1 %2169 }
 0x7be   : > { %v2213_v51 = vsub.f32 %v3923_v27, %v2197_v53  ;;  %v2198_v6 = vmul.f32 0.03125, %v2170_v33 }
 0x7bf   : > { %v2164_v31 = vpop.xlane.xlu0 %2163 }
 0x7c0   : > { %v2214_v58 = vsub.f32 %v3931_v28, %v2198_v6  ;;  %v2195_v47 = vmul.f32 0.03125, %v2164_v31  ;;  %v4024_v26 = vmul.f32 %v3968_v16, %v2213_v51 }
 0x7c1   : > { %v2166_v57 = vpop.xlane.xlu1 %2165 }
 0x7c2   : > { %v2211_v2 = vsub.f32 %v3928_v56, %v2195_v47  ;;  %v2196_v3 = vmul.f32 0.03125, %v2166_v57  ;;  %v2245_v8 = vmul.f32 %v4024_v26, %v4024_v26  ;;  %v4030_v4 = vmul.f32 %v3968_v16, %v2214_v58 }
 0x7c3   : > { %v2176_v35 = vpop.xlane.xlu0 %2175 }
 0x7c4   : > { %v2212_v27 = vsub.f32 %v3936_v36, %v2196_v3  ;;  %v2201_v0 = vmul.f32 0.03125, %v2176_v35  ;;  %2263 = vadd.xlane.f32.xlu0 %v2245_v8  ;;  %v2246_v28 = vmul.f32 %v4030_v4, %v4030_v4  ;;  %v4036_v41 = vmul.f32 %v3968_v16, %v2211_v2 }
 0x7c5   : > { %v2178_v55 = vpop.xlane.xlu1 %2177 }
 0x7c6   : > { %v2217_v56 = vsub.f32 %v3945_v40, %v2201_v0  ;;  %v2202_v42 = vmul.f32 0.03125, %v2178_v55  ;;  %2265 = vadd.xlane.f32.xlu1 %v2246_v28  ;;  %v2243_v18 = vmul.f32 %v4036_v41, %v4036_v41  ;;  %v4042_v15 = vmul.f32 %v3968_v16, %v2212_v27 }
 0x7c7   : > { %v2172_v36 = vpop.xlane.xlu0 %2171 }
 0x7c8   : > { %v2218_v52 = vsub.f32 %v3955_v11, %v2202_v42  ;;  %v2199_v54 = vmul.f32 0.03125, %v2172_v36  ;;  %2259 = vadd.xlane.f32.xlu0 %v2243_v18  ;;  %v2244_v7 = vmul.f32 %v4042_v15, %v4042_v15  ;;  %v4048_v63 = vmul.f32 %v3968_v16, %v2217_v56 }
 0x7c9   : > { %v2174_v40 = vpop.xlane.xlu1 %2173 }
 0x7ca   : > { %v2215_v45 = vsub.f32 %v3952_v9, %v2199_v54  ;;  %v2200_v17 = vmul.f32 0.03125, %v2174_v40  ;;  %2261 = vadd.xlane.f32.xlu1 %v2244_v7  ;;  %v2249_v25 = vmul.f32 %v4048_v63, %v4048_v63  ;;  %v4054_v29 = vmul.f32 %v3968_v16, %v2218_v52 }
 0x7cb   : > { %v2184_v11 = vpop.xlane.xlu0 %2183 }
 0x7cc   : > { %v2216_v60 = vsub.f32 %v3960_v43, %v2200_v17  ;;  %v2205_v23 = vmul.f32 0.03125, %v2184_v11  ;;  %2271 = vadd.xlane.f32.xlu0 %v2249_v25  ;;  %v2250_v49 = vmul.f32 %v4054_v29, %v4054_v29  ;;  %v4060_v32 = vmul.f32 %v3968_v16, %v2215_v45 }
 0x7cd   : > { %v2186_v9 = vpop.xlane.xlu1 %2185 }
 0x7ce   : > { %v2221_v59 = vsub.f32 %v3974_v22, %v2205_v23  ;;  %v2206_v37 = vmul.f32 0.03125, %v2186_v9  ;;  %2273 = vadd.xlane.f32.xlu1 %v2250_v49  ;;  %v2247_v5 = vmul.f32 %v4060_v32, %v4060_v32  ;;  %v4066_v12 = vmul.f32 %v3968_v16, %v2216_v60 }
 0x7cf   : > { %v2180_v43 = vpop.xlane.xlu0 %2179 }
 0x7d0   : > { %v2222_v38 = vsub.f32 %v3984_v30, %v2206_v37  ;;  %v2203_v39 = vmul.f32 0.03125, %v2180_v43  ;;  %2267 = vadd.xlane.f32.xlu0 %v2247_v5  ;;  %v2248_v62 = vmul.f32 %v4066_v12, %v4066_v12  ;;  %v4072_v61 = vmul.f32 %v3968_v16, %v2221_v59 }
 0x7d1   : > { %v2182_v22 = vpop.xlane.xlu1 %2181 }
 0x7d2   : > { %v2219_v14 = vsub.f32 %v3981_v24, %v2203_v39  ;;  %v2204_v34 = vmul.f32 0.03125, %v2182_v22  ;;  %2269 = vadd.xlane.f32.xlu1 %v2248_v62  ;;  %v2253_v48 = vmul.f32 %v4072_v61, %v4072_v61  ;;  %v4078_v19 = vmul.f32 %v3968_v16, %v2222_v38  ;;  %v4120_v39 = vld [vmem:[%s4222_s14] ss:$0 sm:$0xff] }
 0x7d4   : > { %v2220_v30 = vsub.f32 %v3989_v50, %v2204_v34  ;;  %2279 = vadd.xlane.f32.xlu0 %v2253_v48  ;;  %v2188_v13 = vpop.xlane.xlu0 %2187  ;;  %v2254_v1 = vmul.f32 %v4078_v19, %v4078_v19  ;;  %v4084_v20 = vmul.f32 %v3968_v16, %v2219_v14 }
 0x7d5   : > { %v2207_v53 = vmul.f32 0.03125, %v2188_v13 }
 0x7d6   : > { %2281 = vadd.xlane.f32.xlu1 %v2254_v1  ;;  %v2190_v24 = vpop.xlane.xlu1 %2189  ;;  %v2251_v33 = vmul.f32 %v4084_v20, %v4084_v20  ;;  %v4089_v51 = vmul.f32 %v3968_v16, %v2220_v30 }
 0x7d7   : > { %v2223_v6 = vsub.f32 %v4000_v10, %v2207_v53  ;;  %v2208_v50 = vmul.f32 0.03125, %v2190_v24 }
 0x7d8   : > { %2275 = vadd.xlane.f32.xlu0 %v2251_v33  ;;  %v2192_v31 = vpop.xlane.xlu0 %2191  ;;  %v2252_v58 = vmul.f32 %v4089_v51, %v4089_v51 }
 0x7d9   : > { %v2224_v47 = vsub.f32 %v4008_v46, %v2208_v50  ;;  %v2209_v57 = vmul.f32 0.03125, %v2192_v31  ;;  %v4096_v2 = vmul.f32 %v3968_v16, %v2223_v6  ;;  %v4128_v6 = vld [vmem:[%s4223_s15] ss:$0 sm:$0xff] }
 0x7da   : > { %2277 = vadd.xlane.f32.xlu1 %v2252_v58  ;;  %v2194_v3 = vpop.xlane.xlu1 %2193 }
 0x7db   : > { %v2225_v8 = vsub.f32 %v4005_v44, %v2209_v57  ;;  %v2210_v35 = vmul.f32 0.03125, %v2194_v3  ;;  %v2255_v10 = vmul.f32 %v4096_v2, %v4096_v2  ;;  %v4102_v27 = vmul.f32 %v3968_v16, %v2224_v47 }
 0x7dd   : > { %v2226_v0 = vsub.f32 %v4013_v21, %v2210_v35  ;;  %2283 = vadd.xlane.f32.xlu0 %v2255_v10  ;;  %v2256_v46 = vmul.f32 %v4102_v27, %v4102_v27  ;;  %v4108_v28 = vmul.f32 %v3968_v16, %v2225_v8 }
 0x7df   : > { %2285 = vadd.xlane.f32.xlu1 %v2256_v46  ;;  %v2257_v44 = vmul.f32 %v4108_v28, %v4108_v28  ;;  %v4113_v55 = vmul.f32 %v3968_v16, %v2226_v0 }
 0x7e1   : > { %2287 = vadd.xlane.f32.xlu0 %v2257_v44  ;;  %v2258_v56 = vmul.f32 %v4113_v55, %v4113_v55 }
 0x7e3   : > { %2289 = vadd.xlane.f32.xlu1 %v2258_v56 }
 0x851   : > { %v2264_v21 = vpop.xlane.xlu0 %2263 }
 0x852   : > { %v2293_v42 = vmul.f32 0.03125, %v2264_v21 }
 0x853   : > { %v2266_v18 = vpop.xlane.xlu1 %2265 }
 0x854   : > { %v2309_v36 = vadd.f32 1e-05, %v2293_v42  ;;  %v2294_v52 = vmul.f32 0.03125, %v2266_v18 }
 0x855   : > { %v2260_v54 = vpop.xlane.xlu0 %2259 }
 0x856   : > { %3193 = vrsqrt.f32 %v2309_v36  ;;  %v2310_v7 = vadd.f32 1e-05, %v2294_v52  ;;  %v2291_v40 = vmul.f32 0.03125, %v2260_v54 }
 0x857   : > { %v2262_v45 = vpop.xlane.xlu1 %2261 }
 0x858   : > { %3195 = vrsqrt.f32 %v2310_v7  ;;  %v2307_v17 = vadd.f32 1e-05, %v2291_v40  ;;  %v2292_v25 = vmul.f32 0.03125, %v2262_v45 }
 0x859   : > { %v2272_v16 = vpop.xlane.xlu0 %2271 }
 0x85a   : > { %3197 = vrsqrt.f32 %v2307_v17  ;;  %v2308_v11 = vadd.f32 1e-05, %v2292_v25  ;;  %v2297_v60 = vmul.f32 0.03125, %v2272_v16 }
 0x85b   : > { %v2274_v23 = vpop.xlane.xlu1 %2273 }
 0x85c   : > { %3199 = vrsqrt.f32 %v2308_v11  ;;  %v2313_v49 = vadd.f32 1e-05, %v2297_v60  ;;  %v2298_v9 = vmul.f32 0.03125, %v2274_v23 }
 0x85d   : > { %v2268_v59 = vpop.xlane.xlu0 %2267 }
 0x85e   : > { %3201 = vrsqrt.f32 %v2313_v49  ;;  %v2314_v37 = vadd.f32 1e-05, %v2298_v9  ;;  %v2295_v5 = vmul.f32 0.03125, %v2268_v59 }
 0x85f   : > { %v2270_v43 = vpop.xlane.xlu1 %2269 }
 0x860   : > { %v3194_v38 = vpop.eup %3193  ;;  %3203 = vrsqrt.f32 %v2314_v37  ;;  %v2311_v62 = vadd.f32 1e-05, %v2295_v5  ;;  %v2296_v22 = vmul.f32 0.03125, %v2270_v43 }
 0x861   : > { %v2341_v14 = vmul.f32 %v3194_v38, %v4024_v26  ;;  %v2280_v34 = vpop.xlane.xlu0 %2279 }
 0x862   : > { %v3196_v48 = vpop.eup %3195  ;;  %3205 = vrsqrt.f32 %v2311_v62  ;;  %v2312_v30 = vadd.f32 1e-05, %v2296_v22  ;;  %v2301_v13 = vmul.f32 0.03125, %v2280_v34 }
 0x863   : > { %v2364_v1 = vmul.f32 %v4120_v39, %v2341_v14  ;;  %v2342_v53 = vmul.f32 %v3196_v48, %v4030_v4  ;;  %v2282_v24 = vpop.xlane.xlu1 %2281 }
 0x864   : > { %v3198_v33 = vpop.eup %3197  ;;  %3207 = vrsqrt.f32 %v2312_v30  ;;  %v2317_v50 = vadd.f32 1e-05, %v2301_v13  ;;  %v2302_v31 = vmul.f32 0.03125, %v2282_v24 }
 0x865   : > { %v2365_v26 = vmul.f32 %v4120_v39, %v2342_v53  ;;  %v2339_v58 = vmul.f32 %v3198_v33, %v4036_v41  ;;  %v2276_v47 = vpop.xlane.xlu0 %2275  ;;  %v2387_v4 = vadd.f32 %v4128_v6, %v2364_v1 }
 0x866   : > { %v3200_v57 = vpop.eup %3199  ;;  %3209 = vrsqrt.f32 %v2317_v50  ;;  %v2318_v3 = vadd.f32 1e-05, %v2302_v31  ;;  %v2299_v8 = vmul.f32 0.03125, %v2276_v47 }
 0x867   : > { %v2388_v35 = vadd.f32 %v4128_v6, %v2365_v26  ;;  %v2362_v10 = vmul.f32 %v4120_v39, %v2339_v58  ;;  %v2340_v0 = vmul.f32 %v3200_v57, %v4042_v15  ;;  %v2278_v46 = vpop.xlane.xlu1 %2277 }
 0x868   : > { %v3202_v44 = vpop.eup %3201  ;;  %3211 = vrsqrt.f32 %v2318_v3  ;;  %v2315_v56 = vadd.f32 1e-05, %v2299_v8  ;;  %v2300_v21 = vmul.f32 0.03125, %v2278_v46 }
 0x869   : > { %v2758_v42 = vpack.c.bf16 %v2388_v35, %v2387_v4  ;;  %v2363_v41 = vmul.f32 %v4120_v39, %v2340_v0  ;;  %v2345_v18 = vmul.f32 %v3202_v44, %v4048_v63  ;;  %v2385_v52 = vadd.f32 %v4128_v6, %v2362_v10 }
 0x86a   : > { %v3204_v36 = vpop.eup %3203  ;;  %3213 = vrsqrt.f32 %v2315_v56  ;;  %v2316_v54 = vadd.f32 1e-05, %v2300_v21  ;;  %v2284_v7 = vpop.xlane.xlu0 %2283 }
 0x86b   : > { %2797 = vst [vmem:[%s4235_s0 + $0x8] sm:$0xff] %v2758_v42   ;;  %v2386_v15 = vadd.f32 %v4128_v6, %v2363_v41  ;;  %v2368_v40 = vmul.f32 %v4120_v39, %v2345_v18  ;;  %v2346_v45 = vmul.f32 %v3204_v36, %v4054_v29  ;;  %v2303_v17 = vmul.f32 0.03125, %v2284_v7 }
 0x86c   : > { %v3206_v25 = vpop.eup %3205  ;;  %3215 = vrsqrt.f32 %v2316_v54  ;;  %v2286_v63 = vpop.xlane.xlu1 %2285 }
 0x86d   : > { %v2753_v16 = vpack.c.bf16 %v2386_v15, %v2385_v52  ;;  %v2369_v11 = vmul.f32 %v4120_v39, %v2346_v45  ;;  %v2343_v60 = vmul.f32 %v3206_v25, %v4060_v32  ;;  %v2391_v49 = vadd.f32 %v4128_v6, %v2368_v40 }
 0x86e   : > { %v3208_v23 = vpop.eup %3207  ;;  %v2319_v9 = vadd.f32 1e-05, %v2303_v17  ;;  %v2304_v59 = vmul.f32 0.03125, %v2286_v63  ;;  %v2288_v37 = vpop.xlane.xlu0 %2287 }
 0x86f   : > { %2754 = vst [vmem:[%s4235_s0] sm:$0xff] %v2753_v16   ;;  %v2392_v29 = vadd.f32 %v4128_v6, %v2369_v11  ;;  %v2366_v5 = vmul.f32 %v4120_v39, %v2343_v60  ;;  %v2344_v43 = vmul.f32 %v3208_v23, %v4066_v12  ;;  %v2305_v38 = vmul.f32 0.03125, %v2288_v37 }
 0x870   : > { %v3210_v62 = vpop.eup %3209  ;;  %3217 = vrsqrt.f32 %v2319_v9  ;;  %v2320_v32 = vadd.f32 1e-05, %v2304_v59  ;;  %v2290_v22 = vpop.xlane.xlu1 %2289 }
 0x871   : > { %v2768_v14 = vpack.c.bf16 %v2392_v29, %v2391_v49  ;;  %v2367_v34 = vmul.f32 %v4120_v39, %v2344_v43  ;;  %v2349_v48 = vmul.f32 %v3210_v62, %v4072_v61  ;;  %v2321_v13 = vadd.f32 1e-05, %v2305_v38 }
 0x872   : > { %v3212_v30 = vpop.eup %3211  ;;  %3219 = vrsqrt.f32 %v2320_v32  ;;  %v2306_v1 = vmul.f32 0.03125, %v2290_v22  ;;  %v2389_v12 = vadd.f32 %v4128_v6, %v2366_v5 }
 0x873   : > { %2799 = vst [vmem:[%s4235_s0 + $0x18] sm:$0xff] %v2768_v14   ;;  %v2390_v53 = vadd.f32 %v4128_v6, %v2367_v34  ;;  %v2372_v24 = vmul.f32 %v4120_v39, %v2349_v48  ;;  %v2350_v33 = vmul.f32 %v3212_v30, %v4078_v19  ;;  %3221 = vrsqrt.f32 %v2321_v13 }
 0x874   : > { %v3214_v50 = vpop.eup %3213  ;;  %v2322_v31 = vadd.f32 1e-05, %v2306_v1 }
 0x875   : > { %v2763_v61 = vpack.c.bf16 %v2390_v53, %v2389_v12  ;;  %v2373_v26 = vmul.f32 %v4120_v39, %v2350_v33  ;;  %v2347_v58 = vmul.f32 %v3214_v50, %v4084_v20  ;;  %v2395_v57 = vadd.f32 %v4128_v6, %v2372_v24 }
 0x876   : > { %v3216_v47 = vpop.eup %3215  ;;  %3223 = vrsqrt.f32 %v2322_v31 }
 0x877   : > { %2798 = vst [vmem:[%s4235_s0 + $0x10] sm:$0xff] %v2763_v61   ;;  %v2396_v3 = vadd.f32 %v4128_v6, %v2373_v26  ;;  %v2370_v19 = vmul.f32 %v4120_v39, %v2347_v58  ;;  %v2348_v8 = vmul.f32 %v3216_v47, %v4089_v51 }
 0x879   : > { %v2778_v4 = vpack.c.bf16 %v2396_v3, %v2395_v57  ;;  %v2371_v35 = vmul.f32 %v4120_v39, %v2348_v8  ;;  %v2393_v20 = vadd.f32 %v4128_v6, %v2370_v19 }
 0x87a   : > { %v3218_v10 = vpop.eup %3217 }
 0x87b   : > { %2801 = vst [vmem:[%s4235_s0 + $0x28] sm:$0xff] %v2778_v4   ;;  %v2394_v0 = vadd.f32 %v4128_v6, %v2371_v35  ;;  %v2351_v46 = vmul.f32 %v3218_v10, %v4096_v2 }
 0x87c   : > { %v3220_v44 = vpop.eup %3219 }
 0x87d   : > { %v2773_v56 = vpack.c.bf16 %v2394_v0, %v2393_v20  ;;  %v2374_v21 = vmul.f32 %v4120_v39, %v2351_v46  ;;  %v2352_v51 = vmul.f32 %v3220_v44, %v4102_v27  ;;  %v3222_v42 = vpop.eup %3221 }
 0x87e   : > { %v2353_v18 = vmul.f32 %v3222_v42, %v4108_v28 }
 0x87f   : > { %2800 = vst [vmem:[%s4235_s0 + $0x20] sm:$0xff] %v2773_v56   ;;  %v2375_v41 = vmul.f32 %v4120_v39, %v2352_v51  ;;  %v2397_v52 = vadd.f32 %v4128_v6, %v2374_v21 }
 0x880   : > { %v3224_v36 = vpop.eup %3223  ;;  %v2376_v54 = vmul.f32 %v4120_v39, %v2353_v18 }
 0x881   : > { %v2398_v2 = vadd.f32 %v4128_v6, %v2375_v41  ;;  %v2354_v7 = vmul.f32 %v3224_v36, %v4113_v55 }
 0x882   : > { %v2399_v40 = vadd.f32 %v4128_v6, %v2376_v54 }
 0x883   : > { %v2783_v15 = vpack.c.bf16 %v2398_v2, %v2397_v52  ;;  %v2377_v27 = vmul.f32 %v4120_v39, %v2354_v7 }
 0x885   : > { %2802 = vst [vmem:[%s4235_s0 + $0x30] sm:$0xff] %v2783_v15   ;;  %v2400_v28 = vadd.f32 %v4128_v6, %v2377_v27 }
 0x887   : > { %v2788_v45 = vpack.c.bf16 %v2400_v28, %v2399_v40 }
 0x889   : > { %2803 = vst [vmem:[%s4235_s0 + $0x38] sm:$0xff] %v2788_v45  }
 0x88a PF: > { %s4236_s17 = sld [smem:[#allocation4_spill]]  ;;  %s4237_s21 = sld [smem:[#allocation3_spill]] }
 0x88b   : > { %s4238_s22 = sld [smem:[#allocation5_spill]] }
 0x890   : > { %s26_s23 = sadd.s32 1, %s4236_s17  }
 0x891   : > { %p23_p7 = scmp.ge.s32.totalorder %s26_s23, 6  }
 0x893   :  { %25 = sbr.rel (!%p23_p7) target bundleno = 3 (0x3), region = 134 }

</bundles_post_ra>
